<compile_context>
chip_gen: v7x
topology: tpu7x:2x2x1
jax: 0.10.0
libtpu: 0.0.40
codegen_flags: <defaults>
</compile_context>

<pallas_src>
import functools
import math

import numpy as np

import jax
import jax.numpy as jnp
from jax.experimental import pallas as pl
from jax.experimental.pallas import tpu as pltpu


# ----------------------------------------------------------------------------
# Helpers for packing the network into MXU-friendly operands (done once at init)
# ----------------------------------------------------------------------------
def _conv_out(n, k, s):
    return (n - k) // s + 1


def _selection_matrix(ih, iw, kh, kw, stride, rows_per_tap, in_rows):
    """0/1 gather matrix S of shape (kh*kw*rows_per_tap, in_rows).

    S[t*rows_per_tap + p_out, p_in] = 1, where p_out = oh*OW_out + ow enumerates conv
    output positions (row-major) and p_in = (stride*oh + ki)*iw + (stride*ow + kj) is the
    input position read by filter tap t = ki*kw + kj.  Extra (padding) rows/columns stay
    zero, so padded activation rows are never sourced and never read downstream.
    """
    oh = _conv_out(ih, kh, stride)
    ow = _conv_out(iw, kw, stride)
    S = np.zeros((kh * kw * rows_per_tap, in_rows), np.float32)
    for ki in range(kh):
        for kj in range(kw):
            t = ki * kw + kj
            for a in range(oh):
                for b in range(ow):
                    p_out = a * ow + b
                    p_in = (stride * a + ki) * iw + (stride * b + kj)
                    S[t * rows_per_tap + p_out, p_in] = 1.0
    return S


def init_torch_params(key, cfg):
    """Deterministic synthetic parameters in PyTorch layouts.

    Convs: (out, in, kh, kw).  Linears are stored directly as (in, out) matrices
    (PyTorch keeps the transpose; values are synthetic so only the layout matters).
    """
    c = cfg['in_channels']
    hid = cfg['hidden_dims']
    sd = cfg['state_dim']
    ks = jax.random.split(key, 8 + 2 * len(hid))

    def w(k, shape, fan_in):
        return jax.random.normal(k, shape, jnp.float32) / math.sqrt(fan_in)

    def small(k, shape):
        return 0.01 * jax.random.normal(k, shape, jnp.float32)

    p = {
        'conv1_w': w(ks[0], (32, c, 8, 8), c * 64),
        'conv1_b': small(ks[1], (32,)),
        'conv2_w': w(ks[2], (64, 32, 4, 4), 32 * 16),
        'conv2_b': small(ks[3], (64,)),
        'conv3_w': w(ks[4], (64, 64, 3, 3), 64 * 9),
        'conv3_b': small(ks[5], (64,)),
        'proj_w': w(ks[6], (1024, hid[-1]), 1024),      # (in, out)
        'proj_b': small(ks[7], (hid[-1],)),
    }
    mlp = []
    d = sd
    for i, h in enumerate(hid):
        mlp.append((w(ks[8 + 2 * i], (d, h), d), small(ks[9 + 2 * i], (h,))))
        d = h
    p['mlp'] = mlp
    return p


def pack_params(p, cfg):
    """Pre-transpose / pre-pack everything into matmul-ready bf16 operands."""
    c = cfg['in_channels']
    hid = cfg['hidden_dims']
    H = W = int(math.sqrt(cfg['visual_dim'] // c))
    oh1, ow1 = _conv_out(H, 8, 4), _conv_out(W, 8, 4)
    oh2, ow2 = _conv_out(oh1, 4, 2), _conv_out(ow1, 4, 2)
    oh3, ow3 = _conv_out(oh2, 3, 1), _conv_out(ow2, 3, 1)
    p1 = oh1 * ow1                       # 225
    p2 = oh2 * ow2                       # 36
    p2p = ((p2 + 7) // 8) * 8            # 40  (sublane-aligned tap blocks)
    p3 = oh3 * ow3                       # 16
    p3p = ((p3 + 7) // 8) * 8            # 16

    def bf(x):
        return jnp.asarray(x, jnp.bfloat16)

    def bias(x):
        return jnp.asarray(x, jnp.float32).reshape(1, -1)

    packed = {
        # conv1: patch feature order (c, ki, kj) == PyTorch weight.reshape(O, C*KH*KW)
        'w1': bf(p['conv1_w'].reshape(32, c * 64).T),                      # (c*64, 32)
        'b1': bias(p['conv1_b']),
        # conv2: 0/1 gather matrix + tap-major (t, cin) weight pack
        's2': bf(_selection_matrix(oh1, ow1, 4, 4, 2, p2p, p1)),           # (16*p2p, p1)
        'w2': bf(jnp.transpose(p['conv2_w'], (2, 3, 1, 0)).reshape(16 * 32, 64)),
        'b2': bias(p['conv2_b']),
        # conv3
        's3': bf(_selection_matrix(oh2, ow2, 3, 3, 1, p3p, p2p)),          # (9*p3p, p2p)
        'w3': bf(jnp.transpose(p['conv3_w'], (2, 3, 1, 0)).reshape(9 * 64, 64)),
        'b3': bias(p['conv3_b']),
        # projection: fold PyTorch's channel-major flatten (c*16 + hw) into a row
        # permutation so the kernel consumes conv3's natural (position, channel) tile.
        'wp': bf(p['proj_w'].reshape(64, p3, hid[-1]).transpose(1, 0, 2)
                 .reshape(p3 * 64, hid[-1])),                              # (p3*64, hid)
        'bp': bias(p['proj_b']),
        'mlp': [(bf(wm), bias(bm)) for wm, bm in p['mlp']],
    }
    dims = dict(P1=p1, F1=c * 64, C1=32, T2=16, P2P=p2p, C2=64,
                T3=9, P3=p3, P3P=p3p, C3=64, HID=hid[-1], S=cfg['state_dim'],
                n_mlp=len(hid))
    return packed, dims


# ----------------------------------------------------------------------------
# Fused Pallas kernel: whole forward pass for one sample per grid step
# ----------------------------------------------------------------------------
def _fused_kernel(*refs, dims):
    P1, F1, C1 = dims['P1'], dims['F1'], dims['C1']
    T2, P2P, C2 = dims['T2'], dims['P2P'], dims['C2']
    T3, P3, P3P, C3 = dims['T3'], dims['P3'], dims['P3P'], dims['C3']
    HID, n_mlp = dims['HID'], dims['n_mlp']

    patches_ref, state_ref = refs[0], refs[1]
    (w1_ref, b1_ref, s2_ref, w2_ref, b2_ref,
     s3_ref, w3_ref, b3_ref, wp_ref, bp_ref) = refs[2:12]
    mlp_refs = refs[12:12 + 2 * n_mlp]
    out_ref = refs[12 + 2 * n_mlp]
    a3_scr = refs[12 + 2 * n_mlp + 1]

    f32, bf16 = jnp.float32, jnp.bfloat16

    # ---------------- visual path: conv1 -> conv2 -> conv3 -> flatten -> proj --------
    # conv1: plain matmul on the precomputed (positions, c*kh*kw) patch tile.
    a1 = jnp.dot(patches_ref[0], w1_ref[...], preferred_element_type=f32)   # (P1, C1)
    a1 = jnp.maximum(a1 + b1_ref[...], 0.0).astype(bf16)

    # conv2: one selection matmul gathers all 4x4 receptive-field taps, then an
    # unrolled per-tap accumulation against the (tap, cin)-packed weights.
    g2 = jnp.dot(s2_ref[...], a1, preferred_element_type=f32)               # (T2*P2P, C1)
    acc2 = jnp.zeros((P2P, C2), f32)
    for t in range(T2):
        acc2 = acc2 + jnp.dot(g2[t * P2P:(t + 1) * P2P, :].astype(bf16),
                              w2_ref[t * C1:(t + 1) * C1, :],
                              preferred_element_type=f32)
    a2 = jnp.maximum(acc2 + b2_ref[...], 0.0).astype(bf16)                  # (P2P, C2)

    # conv3: same pattern (3x3 taps).
    g3 = jnp.dot(s3_ref[...], a2, preferred_element_type=f32)               # (T3*P3P, C2)
    acc3 = jnp.zeros((P3P, C3), f32)
    for t in range(T3):
        acc3 = acc3 + jnp.dot(g3[t * P3P:(t + 1) * P3P, :].astype(bf16),
                              w3_ref[t * C2:(t + 1) * C2, :],
                              preferred_element_type=f32)
    a3_scr[...] = jnp.maximum(acc3 + b3_ref[...], 0.0).astype(bf16)         # (P3P, C3)

    # Flatten + RLProjection.  PyTorch's channel-major flatten permutation is folded into
    # wp at init, so we simply contract each position row against its weight block.
    pacc = jnp.zeros((1, HID), f32)
    for hw in range(P3):
        pacc = pacc + jnp.dot(a3_scr[hw:hw + 1, :],
                              wp_ref[hw * C3:(hw + 1) * C3, :],
                              preferred_element_type=f32)
    visual_out = jnp.maximum(pacc + bp_ref[...], 0.0)                       # (1, HID) f32

    # ---------------- state path: MLPBase (Linear + ReLU stack) ----------------------
    h = state_ref[0].astype(bf16)                                           # (1, S)
    state_out = None
    for li in range(n_mlp):
        wm_ref, bm_ref = mlp_refs[2 * li], mlp_refs[2 * li + 1]
        state_out = jnp.maximum(
            jnp.dot(h, wm_ref[...], preferred_element_type=f32) + bm_ref[...], 0.0)
        h = state_out.astype(bf16)

    # ---------------- concat([visual, state]) : one lane-dense 256-wide store --------
    out_ref[0, :, 0:HID] = visual_out.astype(out_ref.dtype)
    out_ref[0, :, HID:2 * HID] = state_out.astype(out_ref.dtype)


# ----------------------------------------------------------------------------
# Wrapper
# ----------------------------------------------------------------------------
def nature_fuse_forward(packed, dims, x, cfg):
    """x: (B, state_dim + visual_dim) f32 -> (B, 2*hidden_dims[-1]) f32."""
    c = cfg['in_channels']
    sd = cfg['state_dim']
    hid = dims['HID']
    H = W = int(math.sqrt(cfg['visual_dim'] // c))
    B = x.shape[0]

    state_x = x[:, :sd].reshape(B, 1, sd)
    visual_x = x[:, sd:].reshape(B, c, H, W)

    # conv1 im2col as a single identity-kernel conv, emitted channel-last so the patch
    # tile is already (positions, features) for the MXU.  Feature order is (c, ki, kj),
    # matching PyTorch's weight.reshape(out, c*kh*kw).
    patches = jax.lax.conv_general_dilated_patches(
        visual_x.astype(jnp.bfloat16),
        filter_shape=(8, 8),
        window_strides=(4, 4),
        padding='VALID',
        dimension_numbers=('NCHW', 'OIHW', 'NHWC'),
    )                                                     # (B, OH1, OW1, c*64)
    patches = patches.reshape(B, dims['P1'], dims['F1'])

    n_mlp = dims['n_mlp']
    weight_args = [packed['w1'], packed['b1'],
                   packed['s2'], packed['w2'], packed['b2'],
                   packed['s3'], packed['w3'], packed['b3'],
                   packed['wp'], packed['bp']]
    for wm, bm in packed['mlp']:
        weight_args += [wm, bm]

    def whole(arr):
        nd = arr.ndim
        return pl.BlockSpec(arr.shape, lambda b, _nd=nd: (0,) * _nd)

    in_specs = ([pl.BlockSpec((1, dims['P1'], dims['F1']), lambda b: (b, 0, 0)),
                 pl.BlockSpec((1, 1, sd), lambda b: (b, 0, 0))]
                + [whole(a) for a in weight_args])
    out_specs = pl.BlockSpec((1, 1, 2 * hid), lambda b: (b, 0, 0))

    flops = 2 * B * (
        dims['P1'] * dims['F1'] * dims['C1']
        + dims['T2'] * dims['P2P'] * dims['P1'] * dims['C1']
        + dims['T2'] * dims['P2P'] * dims['C1'] * dims['C2']
        + dims['T3'] * dims['P3P'] * dims['P2P'] * dims['C2']
        + dims['T3'] * dims['P3P'] * dims['C2'] * dims['C3']
        + dims['P3'] * dims['C3'] * hid
        + sd * hid + (n_mlp - 1) * hid * hid)
    bytes_accessed = (sum(int(a.size) * a.dtype.itemsize for a in weight_args)
                      + int(patches.size) * 2 + B * sd * 4 + B * 2 * hid * 4)

    grid_spec = pltpu.PrefetchScalarGridSpec(
        num_scalar_prefetch=0,
        grid=(B,),
        in_specs=in_specs,
        out_specs=out_specs,
        scratch_shapes=[pltpu.VMEM((dims['P3P'], dims['C3']), jnp.bfloat16)],
    )

    out = pl.pallas_call(
        functools.partial(_fused_kernel, dims=dims),
        grid_spec=grid_spec,
        out_shape=jax.ShapeDtypeStruct((B, 1, 2 * hid), jnp.float32),
        compiler_params=pltpu.CompilerParams(dimension_semantics=("parallel",)),
        cost_estimate=pl.CostEstimate(flops=flops, transcendentals=0,
                                      bytes_accessed=bytes_accessed),
    )(patches, state_x, *weight_args)
    return out.reshape(B, 2 * hid)


# ----------------------------------------------------------------------------
# Pure-JAX reference (same bf16-matmul / f32-accumulate numerics) for validation
# ----------------------------------------------------------------------------
def reference_forward(p, x, cfg):
    c = cfg['in_channels']
    sd = cfg['state_dim']
    H = W = int(math.sqrt(cfg['visual_dim'] // c))
    B = x.shape[0]
    bf16, f32 = jnp.bfloat16, jnp.float32

    state_x = x[:, :sd]
    v = x[:, sd:].reshape(B, c, H, W)

    def conv(z, w, b, s):
        y = jax.lax.conv_general_dilated(
            z.astype(bf16), w.astype(bf16), window_strides=(s, s), padding='VALID',
            dimension_numbers=('NCHW', 'OIHW', 'NCHW'), preferred_element_type=f32)
        return jax.nn.relu(y + b.reshape(1, -1, 1, 1))

    y = conv(v, p['conv1_w'], p['conv1_b'], 4)
    y = conv(y, p['conv2_w'], p['conv2_b'], 2)
    y = conv(y, p['conv3_w'], p['conv3_b'], 1)
    flat = y.reshape(B, -1)                                   # nn.Flatten on NCHW

    def linrelu(z, w, b):
        return jax.nn.relu(
            jnp.dot(z.astype(bf16), w.astype(bf16), preferred_element_type=f32) + b)

    visual_out = linrelu(flat, p['proj_w'], p['proj_b'])
    s = state_x
    for wm, bm in p['mlp']:
        s = linrelu(s, wm, bm)
    return jnp.concatenate([visual_out, s], axis=-1)


# ----------------------------------------------------------------------------
if __name__ == "__main__":
    # 64x64 spatial is required so the hard-coded NatureEncoder.output_dim == 1024
    # ((64-8)/4+1=15 -> (15-4)/2+1=6 -> 6-3+1=4 ; 64*4*4 = 1024).
    cfg = dict(
        in_channels=1,
        visual_dim=1 * 64 * 64,     # 4096
        state_dim=16,
        hidden_dims=[128, 128],
    )
    batch = 2

    key = jax.random.PRNGKey(0)
    k_par, k_x = jax.random.split(key)
    torch_params = init_torch_params(k_par, cfg)
    packed, dims = pack_params(torch_params, cfg)

    x = jax.random.normal(
        k_x, (batch, cfg['state_dim'] + cfg['visual_dim']), jnp.float32)

    fwd = jax.jit(lambda pk, xx: nature_fuse_forward(pk, dims, xx, cfg))
    out = jax.block_until_ready(fwd(packed, x))

    expected_shape = (batch, 2 * cfg['hidden_dims'][-1])
    assert out.shape == expected_shape, (out.shape, expected_shape)
    assert bool(jnp.all(jnp.isfinite(out)))

    ref = jax.block_until_ready(reference_forward(torch_params, x, cfg))
    max_err = float(jnp.max(jnp.abs(out - ref)))
    assert jnp.allclose(out, ref, rtol=2e-2, atol=2e-2), f"max_err={max_err}"

    print("KERNEL_OK")
</pallas_src>

<mosaic_0001>
module attributes {stable_mosaic.version = 11 : i64} {
  func.func @_fused_kernel(%arg0: i32, %arg1: memref<1x225x64xbf16, #tpu.memory_space<vmem>>, %arg2: memref<1x1x16xf32, #tpu.memory_space<vmem>>, %arg3: memref<64x32xbf16, #tpu.memory_space<vmem>>, %arg4: memref<1x32xf32, #tpu.memory_space<vmem>>, %arg5: memref<640x225xbf16, #tpu.memory_space<vmem>>, %arg6: memref<512x64xbf16, #tpu.memory_space<vmem>>, %arg7: memref<1x64xf32, #tpu.memory_space<vmem>>, %arg8: memref<144x40xbf16, #tpu.memory_space<vmem>>, %arg9: memref<576x64xbf16, #tpu.memory_space<vmem>>, %arg10: memref<1x64xf32, #tpu.memory_space<vmem>>, %arg11: memref<1024x128xbf16, #tpu.memory_space<vmem>>, %arg12: memref<1x128xf32, #tpu.memory_space<vmem>>, %arg13: memref<16x128xbf16, #tpu.memory_space<vmem>>, %arg14: memref<1x128xf32, #tpu.memory_space<vmem>>, %arg15: memref<128x128xbf16, #tpu.memory_space<vmem>>, %arg16: memref<1x128xf32, #tpu.memory_space<vmem>>, %arg17: memref<1x1x256xf32, #tpu.memory_space<vmem>>, %arg18: memref<16x64xbf16, #tpu.memory_space<vmem>>) attributes {dimension_semantics = [#tpu.dimension_semantics<parallel>], iteration_bounds = array<i64: 2>, scalar_prefetch = 0 : i64, scratch_operands = 1 : i64, tpu.core_type = #tpu.core_type<tc>, window_params = [{transform_indices = @transform_0, window_bounds = array<i64: 1, 225, 64>}, {transform_indices = @transform_1, window_bounds = array<i64: 1, 1, 16>}, {pipeline_mode = #tpu.pipeline_mode<synchronous>, transform_indices = @transform_2, window_bounds = array<i64: 64, 32>}, {pipeline_mode = #tpu.pipeline_mode<synchronous>, transform_indices = @transform_3, window_bounds = array<i64: 1, 32>}, {pipeline_mode = #tpu.pipeline_mode<synchronous>, transform_indices = @transform_4, window_bounds = array<i64: 640, 225>}, {pipeline_mode = #tpu.pipeline_mode<synchronous>, transform_indices = @transform_5, window_bounds = array<i64: 512, 64>}, {pipeline_mode = #tpu.pipeline_mode<synchronous>, transform_indices = @transform_6, window_bounds = array<i64: 1, 64>}, {pipeline_mode = #tpu.pipeline_mode<synchronous>, transform_indices = @transform_7, window_bounds = array<i64: 144, 40>}, {pipeline_mode = #tpu.pipeline_mode<synchronous>, transform_indices = @transform_8, window_bounds = array<i64: 576, 64>}, {pipeline_mode = #tpu.pipeline_mode<synchronous>, transform_indices = @transform_9, window_bounds = array<i64: 1, 64>}, {pipeline_mode = #tpu.pipeline_mode<synchronous>, transform_indices = @transform_10, window_bounds = array<i64: 1024, 128>}, {pipeline_mode = #tpu.pipeline_mode<synchronous>, transform_indices = @transform_11, window_bounds = array<i64: 1, 128>}, {pipeline_mode = #tpu.pipeline_mode<synchronous>, transform_indices = @transform_12, window_bounds = array<i64: 16, 128>}, {pipeline_mode = #tpu.pipeline_mode<synchronous>, transform_indices = @transform_13, window_bounds = array<i64: 1, 128>}, {pipeline_mode = #tpu.pipeline_mode<synchronous>, transform_indices = @transform_14, window_bounds = array<i64: 128, 128>}, {pipeline_mode = #tpu.pipeline_mode<synchronous>, transform_indices = @transform_15, window_bounds = array<i64: 1, 128>}, {transform_indices = @transform_16, window_bounds = array<i64: 1, 1, 256>}]} {
    %c0 = arith.constant 0 : index
    %c0_0 = arith.constant 0 : index
    %c0_1 = arith.constant 0 : index
    %0 = vector.load %arg1[%c0, %c0_0, %c0_1] : memref<1x225x64xbf16, #tpu.memory_space<vmem>>, vector<1x225x64xbf16>
    %1 = vector.shape_cast %0 : vector<1x225x64xbf16> to vector<225x64xbf16>
    %c0_2 = arith.constant 0 : index
    %c0_3 = arith.constant 0 : index
    %2 = vector.load %arg3[%c0_2, %c0_3] : memref<64x32xbf16, #tpu.memory_space<vmem>>, vector<64x32xbf16>
    %cst = arith.constant dense<0.000000e+00> : vector<225x32xf32>
    %3 = tpu.matmul %1, %2, %cst {dimension_numbers = #tpu.dot_dimension_numbers<[1], [0], [0], [1], [0, 0, 1, 1], [], []>} : vector<225x64xbf16>, vector<64x32xbf16>, vector<225x32xf32> -> vector<225x32xf32>
    %c0_4 = arith.constant 0 : index
    %c0_5 = arith.constant 0 : index
    %4 = vector.load %arg4[%c0_4, %c0_5] : memref<1x32xf32, #tpu.memory_space<vmem>>, vector<1x32xf32>
    %5 = vector.broadcast %4 : vector<1x32xf32> to vector<225x32xf32>
    %6 = arith.addf %3, %5 : vector<225x32xf32>
    %cst_6 = arith.constant 0.000000e+00 : f32
    %7 = vector.broadcast %cst_6 : f32 to vector<225x32xf32>
    %8 = arith.maximumf %6, %7 : vector<225x32xf32>
    %9 = arith.truncf %8 : vector<225x32xf32> to vector<225x32xbf16>
    %c0_7 = arith.constant 0 : index
    %c0_8 = arith.constant 0 : index
    %10 = vector.load %arg5[%c0_7, %c0_8] : memref<640x225xbf16, #tpu.memory_space<vmem>>, vector<640x225xbf16>
    %cst_9 = arith.constant dense<0.000000e+00> : vector<640x32xf32>
    %11 = tpu.matmul %10, %9, %cst_9 {dimension_numbers = #tpu.dot_dimension_numbers<[1], [0], [0], [1], [0, 0, 1, 1], [], []>} : vector<640x225xbf16>, vector<225x32xbf16>, vector<640x32xf32> -> vector<640x32xf32>
    %cst_10 = arith.constant 0.000000e+00 : f32
    %12 = vector.broadcast %cst_10 : f32 to vector<40x64xf32>
    %13 = vector.extract_strided_slice %11 {offsets = [0, 0], sizes = [40, 32], strides = [1, 1]} : vector<640x32xf32> to vector<40x32xf32>
    %14 = arith.truncf %13 : vector<40x32xf32> to vector<40x32xbf16>
    %c0_11 = arith.constant 0 : index
    %c0_12 = arith.constant 0 : index
    %15 = vector.load %arg6[%c0_11, %c0_12] : memref<512x64xbf16, #tpu.memory_space<vmem>>, vector<32x64xbf16>
    %cst_13 = arith.constant dense<0.000000e+00> : vector<40x64xf32>
    %16 = tpu.matmul %14, %15, %cst_13 {dimension_numbers = #tpu.dot_dimension_numbers<[1], [0], [0], [1], [0, 0, 1, 1], [], []>} : vector<40x32xbf16>, vector<32x64xbf16>, vector<40x64xf32> -> vector<40x64xf32>
    %17 = arith.addf %12, %16 : vector<40x64xf32>
    %18 = vector.extract_strided_slice %11 {offsets = [40, 0], sizes = [40, 32], strides = [1, 1]} : vector<640x32xf32> to vector<40x32xf32>
    %19 = arith.truncf %18 : vector<40x32xf32> to vector<40x32xbf16>
    %c32 = arith.constant 32 : index
    %c0_14 = arith.constant 0 : index
    %20 = vector.load %arg6[%c32, %c0_14] : memref<512x64xbf16, #tpu.memory_space<vmem>>, vector<32x64xbf16>
    %cst_15 = arith.constant dense<0.000000e+00> : vector<40x64xf32>
    %21 = tpu.matmul %19, %20, %cst_15 {dimension_numbers = #tpu.dot_dimension_numbers<[1], [0], [0], [1], [0, 0, 1, 1], [], []>} : vector<40x32xbf16>, vector<32x64xbf16>, vector<40x64xf32> -> vector<40x64xf32>
    %22 = arith.addf %17, %21 : vector<40x64xf32>
    %23 = vector.extract_strided_slice %11 {offsets = [80, 0], sizes = [40, 32], strides = [1, 1]} : vector<640x32xf32> to vector<40x32xf32>
    %24 = arith.truncf %23 : vector<40x32xf32> to vector<40x32xbf16>
    %c64 = arith.constant 64 : index
    %c0_16 = arith.constant 0 : index
    %25 = vector.load %arg6[%c64, %c0_16] : memref<512x64xbf16, #tpu.memory_space<vmem>>, vector<32x64xbf16>
    %cst_17 = arith.constant dense<0.000000e+00> : vector<40x64xf32>
    %26 = tpu.matmul %24, %25, %cst_17 {dimension_numbers = #tpu.dot_dimension_numbers<[1], [0], [0], [1], [0, 0, 1, 1], [], []>} : vector<40x32xbf16>, vector<32x64xbf16>, vector<40x64xf32> -> vector<40x64xf32>
    %27 = arith.addf %22, %26 : vector<40x64xf32>
    %28 = vector.extract_strided_slice %11 {offsets = [120, 0], sizes = [40, 32], strides = [1, 1]} : vector<640x32xf32> to vector<40x32xf32>
    %29 = arith.truncf %28 : vector<40x32xf32> to vector<40x32xbf16>
    %c96 = arith.constant 96 : index
    %c0_18 = arith.constant 0 : index
    %30 = vector.load %arg6[%c96, %c0_18] : memref<512x64xbf16, #tpu.memory_space<vmem>>, vector<32x64xbf16>
    %cst_19 = arith.constant dense<0.000000e+00> : vector<40x64xf32>
    %31 = tpu.matmul %29, %30, %cst_19 {dimension_numbers = #tpu.dot_dimension_numbers<[1], [0], [0], [1], [0, 0, 1, 1], [], []>} : vector<40x32xbf16>, vector<32x64xbf16>, vector<40x64xf32> -> vector<40x64xf32>
    %32 = arith.addf %27, %31 : vector<40x64xf32>
    %33 = vector.extract_strided_slice %11 {offsets = [160, 0], sizes = [40, 32], strides = [1, 1]} : vector<640x32xf32> to vector<40x32xf32>
    %34 = arith.truncf %33 : vector<40x32xf32> to vector<40x32xbf16>
    %c128 = arith.constant 128 : index
    %c0_20 = arith.constant 0 : index
    %35 = vector.load %arg6[%c128, %c0_20] : memref<512x64xbf16, #tpu.memory_space<vmem>>, vector<32x64xbf16>
    %cst_21 = arith.constant dense<0.000000e+00> : vector<40x64xf32>
    %36 = tpu.matmul %34, %35, %cst_21 {dimension_numbers = #tpu.dot_dimension_numbers<[1], [0], [0], [1], [0, 0, 1, 1], [], []>} : vector<40x32xbf16>, vector<32x64xbf16>, vector<40x64xf32> -> vector<40x64xf32>
    %37 = arith.addf %32, %36 : vector<40x64xf32>
    %38 = vector.extract_strided_slice %11 {offsets = [200, 0], sizes = [40, 32], strides = [1, 1]} : vector<640x32xf32> to vector<40x32xf32>
    %39 = arith.truncf %38 : vector<40x32xf32> to vector<40x32xbf16>
    %c160 = arith.constant 160 : index
    %c0_22 = arith.constant 0 : index
    %40 = vector.load %arg6[%c160, %c0_22] : memref<512x64xbf16, #tpu.memory_space<vmem>>, vector<32x64xbf16>
    %cst_23 = arith.constant dense<0.000000e+00> : vector<40x64xf32>
    %41 = tpu.matmul %39, %40, %cst_23 {dimension_numbers = #tpu.dot_dimension_numbers<[1], [0], [0], [1], [0, 0, 1, 1], [], []>} : vector<40x32xbf16>, vector<32x64xbf16>, vector<40x64xf32> -> vector<40x64xf32>
    %42 = arith.addf %37, %41 : vector<40x64xf32>
    %43 = vector.extract_strided_slice %11 {offsets = [240, 0], sizes = [40, 32], strides = [1, 1]} : vector<640x32xf32> to vector<40x32xf32>
    %44 = arith.truncf %43 : vector<40x32xf32> to vector<40x32xbf16>
    %c192 = arith.constant 192 : index
    %c0_24 = arith.constant 0 : index
    %45 = vector.load %arg6[%c192, %c0_24] : memref<512x64xbf16, #tpu.memory_space<vmem>>, vector<32x64xbf16>
    %cst_25 = arith.constant dense<0.000000e+00> : vector<40x64xf32>
    %46 = tpu.matmul %44, %45, %cst_25 {dimension_numbers = #tpu.dot_dimension_numbers<[1], [0], [0], [1], [0, 0, 1, 1], [], []>} : vector<40x32xbf16>, vector<32x64xbf16>, vector<40x64xf32> -> vector<40x64xf32>
    %47 = arith.addf %42, %46 : vector<40x64xf32>
    %48 = vector.extract_strided_slice %11 {offsets = [280, 0], sizes = [40, 32], strides = [1, 1]} : vector<640x32xf32> to vector<40x32xf32>
    %49 = arith.truncf %48 : vector<40x32xf32> to vector<40x32xbf16>
    %c224 = arith.constant 224 : index
    %c0_26 = arith.constant 0 : index
    %50 = vector.load %arg6[%c224, %c0_26] : memref<512x64xbf16, #tpu.memory_space<vmem>>, vector<32x64xbf16>
    %cst_27 = arith.constant dense<0.000000e+00> : vector<40x64xf32>
    %51 = tpu.matmul %49, %50, %cst_27 {dimension_numbers = #tpu.dot_dimension_numbers<[1], [0], [0], [1], [0, 0, 1, 1], [], []>} : vector<40x32xbf16>, vector<32x64xbf16>, vector<40x64xf32> -> vector<40x64xf32>
    %52 = arith.addf %47, %51 : vector<40x64xf32>
    %53 = vector.extract_strided_slice %11 {offsets = [320, 0], sizes = [40, 32], strides = [1, 1]} : vector<640x32xf32> to vector<40x32xf32>
    %54 = arith.truncf %53 : vector<40x32xf32> to vector<40x32xbf16>
    %c256 = arith.constant 256 : index
    %c0_28 = arith.constant 0 : index
    %55 = vector.load %arg6[%c256, %c0_28] : memref<512x64xbf16, #tpu.memory_space<vmem>>, vector<32x64xbf16>
    %cst_29 = arith.constant dense<0.000000e+00> : vector<40x64xf32>
    %56 = tpu.matmul %54, %55, %cst_29 {dimension_numbers = #tpu.dot_dimension_numbers<[1], [0], [0], [1], [0, 0, 1, 1], [], []>} : vector<40x32xbf16>, vector<32x64xbf16>, vector<40x64xf32> -> vector<40x64xf32>
    %57 = arith.addf %52, %56 : vector<40x64xf32>
    %58 = vector.extract_strided_slice %11 {offsets = [360, 0], sizes = [40, 32], strides = [1, 1]} : vector<640x32xf32> to vector<40x32xf32>
    %59 = arith.truncf %58 : vector<40x32xf32> to vector<40x32xbf16>
    %c288 = arith.constant 288 : index
    %c0_30 = arith.constant 0 : index
    %60 = vector.load %arg6[%c288, %c0_30] : memref<512x64xbf16, #tpu.memory_space<vmem>>, vector<32x64xbf16>
    %cst_31 = arith.constant dense<0.000000e+00> : vector<40x64xf32>
    %61 = tpu.matmul %59, %60, %cst_31 {dimension_numbers = #tpu.dot_dimension_numbers<[1], [0], [0], [1], [0, 0, 1, 1], [], []>} : vector<40x32xbf16>, vector<32x64xbf16>, vector<40x64xf32> -> vector<40x64xf32>
    %62 = arith.addf %57, %61 : vector<40x64xf32>
    %63 = vector.extract_strided_slice %11 {offsets = [400, 0], sizes = [40, 32], strides = [1, 1]} : vector<640x32xf32> to vector<40x32xf32>
    %64 = arith.truncf %63 : vector<40x32xf32> to vector<40x32xbf16>
    %c320 = arith.constant 320 : index
    %c0_32 = arith.constant 0 : index
    %65 = vector.load %arg6[%c320, %c0_32] : memref<512x64xbf16, #tpu.memory_space<vmem>>, vector<32x64xbf16>
    %cst_33 = arith.constant dense<0.000000e+00> : vector<40x64xf32>
    %66 = tpu.matmul %64, %65, %cst_33 {dimension_numbers = #tpu.dot_dimension_numbers<[1], [0], [0], [1], [0, 0, 1, 1], [], []>} : vector<40x32xbf16>, vector<32x64xbf16>, vector<40x64xf32> -> vector<40x64xf32>
    %67 = arith.addf %62, %66 : vector<40x64xf32>
    %68 = vector.extract_strided_slice %11 {offsets = [440, 0], sizes = [40, 32], strides = [1, 1]} : vector<640x32xf32> to vector<40x32xf32>
    %69 = arith.truncf %68 : vector<40x32xf32> to vector<40x32xbf16>
    %c352 = arith.constant 352 : index
    %c0_34 = arith.constant 0 : index
    %70 = vector.load %arg6[%c352, %c0_34] : memref<512x64xbf16, #tpu.memory_space<vmem>>, vector<32x64xbf16>
    %cst_35 = arith.constant dense<0.000000e+00> : vector<40x64xf32>
    %71 = tpu.matmul %69, %70, %cst_35 {dimension_numbers = #tpu.dot_dimension_numbers<[1], [0], [0], [1], [0, 0, 1, 1], [], []>} : vector<40x32xbf16>, vector<32x64xbf16>, vector<40x64xf32> -> vector<40x64xf32>
    %72 = arith.addf %67, %71 : vector<40x64xf32>
    %73 = vector.extract_strided_slice %11 {offsets = [480, 0], sizes = [40, 32], strides = [1, 1]} : vector<640x32xf32> to vector<40x32xf32>
    %74 = arith.truncf %73 : vector<40x32xf32> to vector<40x32xbf16>
    %c384 = arith.constant 384 : index
    %c0_36 = arith.constant 0 : index
    %75 = vector.load %arg6[%c384, %c0_36] : memref<512x64xbf16, #tpu.memory_space<vmem>>, vector<32x64xbf16>
    %cst_37 = arith.constant dense<0.000000e+00> : vector<40x64xf32>
    %76 = tpu.matmul %74, %75, %cst_37 {dimension_numbers = #tpu.dot_dimension_numbers<[1], [0], [0], [1], [0, 0, 1, 1], [], []>} : vector<40x32xbf16>, vector<32x64xbf16>, vector<40x64xf32> -> vector<40x64xf32>
    %77 = arith.addf %72, %76 : vector<40x64xf32>
    %78 = vector.extract_strided_slice %11 {offsets = [520, 0], sizes = [40, 32], strides = [1, 1]} : vector<640x32xf32> to vector<40x32xf32>
    %79 = arith.truncf %78 : vector<40x32xf32> to vector<40x32xbf16>
    %c416 = arith.constant 416 : index
    %c0_38 = arith.constant 0 : index
    %80 = vector.load %arg6[%c416, %c0_38] : memref<512x64xbf16, #tpu.memory_space<vmem>>, vector<32x64xbf16>
    %cst_39 = arith.constant dense<0.000000e+00> : vector<40x64xf32>
    %81 = tpu.matmul %79, %80, %cst_39 {dimension_numbers = #tpu.dot_dimension_numbers<[1], [0], [0], [1], [0, 0, 1, 1], [], []>} : vector<40x32xbf16>, vector<32x64xbf16>, vector<40x64xf32> -> vector<40x64xf32>
    %82 = arith.addf %77, %81 : vector<40x64xf32>
    %83 = vector.extract_strided_slice %11 {offsets = [560, 0], sizes = [40, 32], strides = [1, 1]} : vector<640x32xf32> to vector<40x32xf32>
    %84 = arith.truncf %83 : vector<40x32xf32> to vector<40x32xbf16>
    %c448 = arith.constant 448 : index
    %c0_40 = arith.constant 0 : index
    %85 = vector.load %arg6[%c448, %c0_40] : memref<512x64xbf16, #tpu.memory_space<vmem>>, vector<32x64xbf16>
    %cst_41 = arith.constant dense<0.000000e+00> : vector<40x64xf32>
    %86 = tpu.matmul %84, %85, %cst_41 {dimension_numbers = #tpu.dot_dimension_numbers<[1], [0], [0], [1], [0, 0, 1, 1], [], []>} : vector<40x32xbf16>, vector<32x64xbf16>, vector<40x64xf32> -> vector<40x64xf32>
    %87 = arith.addf %82, %86 : vector<40x64xf32>
    %88 = vector.extract_strided_slice %11 {offsets = [600, 0], sizes = [40, 32], strides = [1, 1]} : vector<640x32xf32> to vector<40x32xf32>
    %89 = arith.truncf %88 : vector<40x32xf32> to vector<40x32xbf16>
    %c480 = arith.constant 480 : index
    %c0_42 = arith.constant 0 : index
    %90 = vector.load %arg6[%c480, %c0_42] : memref<512x64xbf16, #tpu.memory_space<vmem>>, vector<32x64xbf16>
    %cst_43 = arith.constant dense<0.000000e+00> : vector<40x64xf32>
    %91 = tpu.matmul %89, %90, %cst_43 {dimension_numbers = #tpu.dot_dimension_numbers<[1], [0], [0], [1], [0, 0, 1, 1], [], []>} : vector<40x32xbf16>, vector<32x64xbf16>, vector<40x64xf32> -> vector<40x64xf32>
    %92 = arith.addf %87, %91 : vector<40x64xf32>
    %c0_44 = arith.constant 0 : index
    %c0_45 = arith.constant 0 : index
    %93 = vector.load %arg7[%c0_44, %c0_45] : memref<1x64xf32, #tpu.memory_space<vmem>>, vector<1x64xf32>
    %94 = vector.broadcast %93 : vector<1x64xf32> to vector<40x64xf32>
    %95 = arith.addf %92, %94 : vector<40x64xf32>
    %cst_46 = arith.constant 0.000000e+00 : f32
    %96 = vector.broadcast %cst_46 : f32 to vector<40x64xf32>
    %97 = arith.maximumf %95, %96 : vector<40x64xf32>
    %98 = arith.truncf %97 : vector<40x64xf32> to vector<40x64xbf16>
    %c0_47 = arith.constant 0 : index
    %c0_48 = arith.constant 0 : index
    %99 = vector.load %arg8[%c0_47, %c0_48] : memref<144x40xbf16, #tpu.memory_space<vmem>>, vector<144x40xbf16>
    %cst_49 = arith.constant dense<0.000000e+00> : vector<144x64xf32>
    %100 = tpu.matmul %99, %98, %cst_49 {dimension_numbers = #tpu.dot_dimension_numbers<[1], [0], [0], [1], [0, 0, 1, 1], [], []>} : vector<144x40xbf16>, vector<40x64xbf16>, vector<144x64xf32> -> vector<144x64xf32>
    %cst_50 = arith.constant 0.000000e+00 : f32
    %101 = vector.broadcast %cst_50 : f32 to vector<16x64xf32>
    %102 = vector.extract_strided_slice %100 {offsets = [0, 0], sizes = [16, 64], strides = [1, 1]} : vector<144x64xf32> to vector<16x64xf32>
    %103 = arith.truncf %102 : vector<16x64xf32> to vector<16x64xbf16>
    %c0_51 = arith.constant 0 : index
    %c0_52 = arith.constant 0 : index
    %104 = vector.load %arg9[%c0_51, %c0_52] : memref<576x64xbf16, #tpu.memory_space<vmem>>, vector<64x64xbf16>
    %cst_53 = arith.constant dense<0.000000e+00> : vector<16x64xf32>
    %105 = tpu.matmul %103, %104, %cst_53 {dimension_numbers = #tpu.dot_dimension_numbers<[1], [0], [0], [1], [0, 0, 1, 1], [], []>} : vector<16x64xbf16>, vector<64x64xbf16>, vector<16x64xf32> -> vector<16x64xf32>
    %106 = arith.addf %101, %105 : vector<16x64xf32>
    %107 = vector.extract_strided_slice %100 {offsets = [16, 0], sizes = [16, 64], strides = [1, 1]} : vector<144x64xf32> to vector<16x64xf32>
    %108 = arith.truncf %107 : vector<16x64xf32> to vector<16x64xbf16>
    %c64_54 = arith.constant 64 : index
    %c0_55 = arith.constant 0 : index
    %109 = vector.load %arg9[%c64_54, %c0_55] : memref<576x64xbf16, #tpu.memory_space<vmem>>, vector<64x64xbf16>
    %cst_56 = arith.constant dense<0.000000e+00> : vector<16x64xf32>
    %110 = tpu.matmul %108, %109, %cst_56 {dimension_numbers = #tpu.dot_dimension_numbers<[1], [0], [0], [1], [0, 0, 1, 1], [], []>} : vector<16x64xbf16>, vector<64x64xbf16>, vector<16x64xf32> -> vector<16x64xf32>
    %111 = arith.addf %106, %110 : vector<16x64xf32>
    %112 = vector.extract_strided_slice %100 {offsets = [32, 0], sizes = [16, 64], strides = [1, 1]} : vector<144x64xf32> to vector<16x64xf32>
    %113 = arith.truncf %112 : vector<16x64xf32> to vector<16x64xbf16>
    %c128_57 = arith.constant 128 : index
    %c0_58 = arith.constant 0 : index
    %114 = vector.load %arg9[%c128_57, %c0_58] : memref<576x64xbf16, #tpu.memory_space<vmem>>, vector<64x64xbf16>
    %cst_59 = arith.constant dense<0.000000e+00> : vector<16x64xf32>
    %115 = tpu.matmul %113, %114, %cst_59 {dimension_numbers = #tpu.dot_dimension_numbers<[1], [0], [0], [1], [0, 0, 1, 1], [], []>} : vector<16x64xbf16>, vector<64x64xbf16>, vector<16x64xf32> -> vector<16x64xf32>
    %116 = arith.addf %111, %115 : vector<16x64xf32>
    %117 = vector.extract_strided_slice %100 {offsets = [48, 0], sizes = [16, 64], strides = [1, 1]} : vector<144x64xf32> to vector<16x64xf32>
    %118 = arith.truncf %117 : vector<16x64xf32> to vector<16x64xbf16>
    %c192_60 = arith.constant 192 : index
    %c0_61 = arith.constant 0 : index
    %119 = vector.load %arg9[%c192_60, %c0_61] : memref<576x64xbf16, #tpu.memory_space<vmem>>, vector<64x64xbf16>
    %cst_62 = arith.constant dense<0.000000e+00> : vector<16x64xf32>
    %120 = tpu.matmul %118, %119, %cst_62 {dimension_numbers = #tpu.dot_dimension_numbers<[1], [0], [0], [1], [0, 0, 1, 1], [], []>} : vector<16x64xbf16>, vector<64x64xbf16>, vector<16x64xf32> -> vector<16x64xf32>
    %121 = arith.addf %116, %120 : vector<16x64xf32>
    %122 = vector.extract_strided_slice %100 {offsets = [64, 0], sizes = [16, 64], strides = [1, 1]} : vector<144x64xf32> to vector<16x64xf32>
    %123 = arith.truncf %122 : vector<16x64xf32> to vector<16x64xbf16>
    %c256_63 = arith.constant 256 : index
    %c0_64 = arith.constant 0 : index
    %124 = vector.load %arg9[%c256_63, %c0_64] : memref<576x64xbf16, #tpu.memory_space<vmem>>, vector<64x64xbf16>
    %cst_65 = arith.constant dense<0.000000e+00> : vector<16x64xf32>
    %125 = tpu.matmul %123, %124, %cst_65 {dimension_numbers = #tpu.dot_dimension_numbers<[1], [0], [0], [1], [0, 0, 1, 1], [], []>} : vector<16x64xbf16>, vector<64x64xbf16>, vector<16x64xf32> -> vector<16x64xf32>
    %126 = arith.addf %121, %125 : vector<16x64xf32>
    %127 = vector.extract_strided_slice %100 {offsets = [80, 0], sizes = [16, 64], strides = [1, 1]} : vector<144x64xf32> to vector<16x64xf32>
    %128 = arith.truncf %127 : vector<16x64xf32> to vector<16x64xbf16>
    %c320_66 = arith.constant 320 : index
    %c0_67 = arith.constant 0 : index
    %129 = vector.load %arg9[%c320_66, %c0_67] : memref<576x64xbf16, #tpu.memory_space<vmem>>, vector<64x64xbf16>
    %cst_68 = arith.constant dense<0.000000e+00> : vector<16x64xf32>
    %130 = tpu.matmul %128, %129, %cst_68 {dimension_numbers = #tpu.dot_dimension_numbers<[1], [0], [0], [1], [0, 0, 1, 1], [], []>} : vector<16x64xbf16>, vector<64x64xbf16>, vector<16x64xf32> -> vector<16x64xf32>
    %131 = arith.addf %126, %130 : vector<16x64xf32>
    %132 = vector.extract_strided_slice %100 {offsets = [96, 0], sizes = [16, 64], strides = [1, 1]} : vector<144x64xf32> to vector<16x64xf32>
    %133 = arith.truncf %132 : vector<16x64xf32> to vector<16x64xbf16>
    %c384_69 = arith.constant 384 : index
    %c0_70 = arith.constant 0 : index
    %134 = vector.load %arg9[%c384_69, %c0_70] : memref<576x64xbf16, #tpu.memory_space<vmem>>, vector<64x64xbf16>
    %cst_71 = arith.constant dense<0.000000e+00> : vector<16x64xf32>
    %135 = tpu.matmul %133, %134, %cst_71 {dimension_numbers = #tpu.dot_dimension_numbers<[1], [0], [0], [1], [0, 0, 1, 1], [], []>} : vector<16x64xbf16>, vector<64x64xbf16>, vector<16x64xf32> -> vector<16x64xf32>
    %136 = arith.addf %131, %135 : vector<16x64xf32>
    %137 = vector.extract_strided_slice %100 {offsets = [112, 0], sizes = [16, 64], strides = [1, 1]} : vector<144x64xf32> to vector<16x64xf32>
    %138 = arith.truncf %137 : vector<16x64xf32> to vector<16x64xbf16>
    %c448_72 = arith.constant 448 : index
    %c0_73 = arith.constant 0 : index
    %139 = vector.load %arg9[%c448_72, %c0_73] : memref<576x64xbf16, #tpu.memory_space<vmem>>, vector<64x64xbf16>
    %cst_74 = arith.constant dense<0.000000e+00> : vector<16x64xf32>
    %140 = tpu.matmul %138, %139, %cst_74 {dimension_numbers = #tpu.dot_dimension_numbers<[1], [0], [0], [1], [0, 0, 1, 1], [], []>} : vector<16x64xbf16>, vector<64x64xbf16>, vector<16x64xf32> -> vector<16x64xf32>
    %141 = arith.addf %136, %140 : vector<16x64xf32>
    %142 = vector.extract_strided_slice %100 {offsets = [128, 0], sizes = [16, 64], strides = [1, 1]} : vector<144x64xf32> to vector<16x64xf32>
    %143 = arith.truncf %142 : vector<16x64xf32> to vector<16x64xbf16>
    %c512 = arith.constant 512 : index
    %c0_75 = arith.constant 0 : index
    %144 = vector.load %arg9[%c512, %c0_75] : memref<576x64xbf16, #tpu.memory_space<vmem>>, vector<64x64xbf16>
    %cst_76 = arith.constant dense<0.000000e+00> : vector<16x64xf32>
    %145 = tpu.matmul %143, %144, %cst_76 {dimension_numbers = #tpu.dot_dimension_numbers<[1], [0], [0], [1], [0, 0, 1, 1], [], []>} : vector<16x64xbf16>, vector<64x64xbf16>, vector<16x64xf32> -> vector<16x64xf32>
    %146 = arith.addf %141, %145 : vector<16x64xf32>
    %c0_77 = arith.constant 0 : index
    %c0_78 = arith.constant 0 : index
    %147 = vector.load %arg10[%c0_77, %c0_78] : memref<1x64xf32, #tpu.memory_space<vmem>>, vector<1x64xf32>
    %148 = vector.broadcast %147 : vector<1x64xf32> to vector<16x64xf32>
    %149 = arith.addf %146, %148 : vector<16x64xf32>
    %cst_79 = arith.constant 0.000000e+00 : f32
    %150 = vector.broadcast %cst_79 : f32 to vector<16x64xf32>
    %151 = arith.maximumf %149, %150 : vector<16x64xf32>
    %152 = arith.truncf %151 : vector<16x64xf32> to vector<16x64xbf16>
    %c0_80 = arith.constant 0 : index
    %c0_81 = arith.constant 0 : index
    %153 = vector.load %arg18[%c0_80, %c0_81] : memref<16x64xbf16, #tpu.memory_space<vmem>>, vector<16x64xbf16>
    tpu.vector_store %arg18[%c0_80, %c0_81], %152 {strides = array<i32>} : memref<16x64xbf16, #tpu.memory_space<vmem>>, vector<16x64xbf16>,
    %cst_82 = arith.constant 0.000000e+00 : f32
    %154 = vector.broadcast %cst_82 : f32 to vector<1x128xf32>
    %c0_83 = arith.constant 0 : index
    %c0_84 = arith.constant 0 : index
    %155 = vector.load %arg18[%c0_83, %c0_84] : memref<16x64xbf16, #tpu.memory_space<vmem>>, vector<1x64xbf16>
    %c0_85 = arith.constant 0 : index
    %c0_86 = arith.constant 0 : index
    %156 = vector.load %arg11[%c0_85, %c0_86] : memref<1024x128xbf16, #tpu.memory_space<vmem>>, vector<64x128xbf16>
    %cst_87 = arith.constant dense<0.000000e+00> : vector<1x128xf32>
    %157 = tpu.matmul %155, %156, %cst_87 {dimension_numbers = #tpu.dot_dimension_numbers<[1], [0], [0], [1], [0, 0, 1, 1], [], []>} : vector<1x64xbf16>, vector<64x128xbf16>, vector<1x128xf32> -> vector<1x128xf32>
    %158 = arith.addf %154, %157 : vector<1x128xf32>
    %c1 = arith.constant 1 : index
    %c0_88 = arith.constant 0 : index
    %159 = vector.load %arg18[%c1, %c0_88] : memref<16x64xbf16, #tpu.memory_space<vmem>>, vector<1x64xbf16>
    %c64_89 = arith.constant 64 : index
    %c0_90 = arith.constant 0 : index
    %160 = vector.load %arg11[%c64_89, %c0_90] : memref<1024x128xbf16, #tpu.memory_space<vmem>>, vector<64x128xbf16>
    %cst_91 = arith.constant dense<0.000000e+00> : vector<1x128xf32>
    %161 = tpu.matmul %159, %160, %cst_91 {dimension_numbers = #tpu.dot_dimension_numbers<[1], [0], [0], [1], [0, 0, 1, 1], [], []>} : vector<1x64xbf16>, vector<64x128xbf16>, vector<1x128xf32> -> vector<1x128xf32>
    %162 = arith.addf %158, %161 : vector<1x128xf32>
    %c2 = arith.constant 2 : index
    %c0_92 = arith.constant 0 : index
    %163 = vector.load %arg18[%c2, %c0_92] : memref<16x64xbf16, #tpu.memory_space<vmem>>, vector<1x64xbf16>
    %c128_93 = arith.constant 128 : index
    %c0_94 = arith.constant 0 : index
    %164 = vector.load %arg11[%c128_93, %c0_94] : memref<1024x128xbf16, #tpu.memory_space<vmem>>, vector<64x128xbf16>
    %cst_95 = arith.constant dense<0.000000e+00> : vector<1x128xf32>
    %165 = tpu.matmul %163, %164, %cst_95 {dimension_numbers = #tpu.dot_dimension_numbers<[1], [0], [0], [1], [0, 0, 1, 1], [], []>} : vector<1x64xbf16>, vector<64x128xbf16>, vector<1x128xf32> -> vector<1x128xf32>
    %166 = arith.addf %162, %165 : vector<1x128xf32>
    %c3 = arith.constant 3 : index
    %c0_96 = arith.constant 0 : index
    %167 = vector.load %arg18[%c3, %c0_96] : memref<16x64xbf16, #tpu.memory_space<vmem>>, vector<1x64xbf16>
    %c192_97 = arith.constant 192 : index
    %c0_98 = arith.constant 0 : index
    %168 = vector.load %arg11[%c192_97, %c0_98] : memref<1024x128xbf16, #tpu.memory_space<vmem>>, vector<64x128xbf16>
    %cst_99 = arith.constant dense<0.000000e+00> : vector<1x128xf32>
    %169 = tpu.matmul %167, %168, %cst_99 {dimension_numbers = #tpu.dot_dimension_numbers<[1], [0], [0], [1], [0, 0, 1, 1], [], []>} : vector<1x64xbf16>, vector<64x128xbf16>, vector<1x128xf32> -> vector<1x128xf32>
    %170 = arith.addf %166, %169 : vector<1x128xf32>
    %c4 = arith.constant 4 : index
    %c0_100 = arith.constant 0 : index
    %171 = vector.load %arg18[%c4, %c0_100] : memref<16x64xbf16, #tpu.memory_space<vmem>>, vector<1x64xbf16>
    %c256_101 = arith.constant 256 : index
    %c0_102 = arith.constant 0 : index
    %172 = vector.load %arg11[%c256_101, %c0_102] : memref<1024x128xbf16, #tpu.memory_space<vmem>>, vector<64x128xbf16>
    %cst_103 = arith.constant dense<0.000000e+00> : vector<1x128xf32>
    %173 = tpu.matmul %171, %172, %cst_103 {dimension_numbers = #tpu.dot_dimension_numbers<[1], [0], [0], [1], [0, 0, 1, 1], [], []>} : vector<1x64xbf16>, vector<64x128xbf16>, vector<1x128xf32> -> vector<1x128xf32>
    %174 = arith.addf %170, %173 : vector<1x128xf32>
    %c5 = arith.constant 5 : index
    %c0_104 = arith.constant 0 : index
    %175 = vector.load %arg18[%c5, %c0_104] : memref<16x64xbf16, #tpu.memory_space<vmem>>, vector<1x64xbf16>
    %c320_105 = arith.constant 320 : index
    %c0_106 = arith.constant 0 : index
    %176 = vector.load %arg11[%c320_105, %c0_106] : memref<1024x128xbf16, #tpu.memory_space<vmem>>, vector<64x128xbf16>
    %cst_107 = arith.constant dense<0.000000e+00> : vector<1x128xf32>
    %177 = tpu.matmul %175, %176, %cst_107 {dimension_numbers = #tpu.dot_dimension_numbers<[1], [0], [0], [1], [0, 0, 1, 1], [], []>} : vector<1x64xbf16>, vector<64x128xbf16>, vector<1x128xf32> -> vector<1x128xf32>
    %178 = arith.addf %174, %177 : vector<1x128xf32>
    %c6 = arith.constant 6 : index
    %c0_108 = arith.constant 0 : index
    %179 = vector.load %arg18[%c6, %c0_108] : memref<16x64xbf16, #tpu.memory_space<vmem>>, vector<1x64xbf16>
    %c384_109 = arith.constant 384 : index
    %c0_110 = arith.constant 0 : index
    %180 = vector.load %arg11[%c384_109, %c0_110] : memref<1024x128xbf16, #tpu.memory_space<vmem>>, vector<64x128xbf16>
    %cst_111 = arith.constant dense<0.000000e+00> : vector<1x128xf32>
    %181 = tpu.matmul %179, %180, %cst_111 {dimension_numbers = #tpu.dot_dimension_numbers<[1], [0], [0], [1], [0, 0, 1, 1], [], []>} : vector<1x64xbf16>, vector<64x128xbf16>, vector<1x128xf32> -> vector<1x128xf32>
    %182 = arith.addf %178, %181 : vector<1x128xf32>
    %c7 = arith.constant 7 : index
    %c0_112 = arith.constant 0 : index
    %183 = vector.load %arg18[%c7, %c0_112] : memref<16x64xbf16, #tpu.memory_space<vmem>>, vector<1x64xbf16>
    %c448_113 = arith.constant 448 : index
    %c0_114 = arith.constant 0 : index
    %184 = vector.load %arg11[%c448_113, %c0_114] : memref<1024x128xbf16, #tpu.memory_space<vmem>>, vector<64x128xbf16>
    %cst_115 = arith.constant dense<0.000000e+00> : vector<1x128xf32>
    %185 = tpu.matmul %183, %184, %cst_115 {dimension_numbers = #tpu.dot_dimension_numbers<[1], [0], [0], [1], [0, 0, 1, 1], [], []>} : vector<1x64xbf16>, vector<64x128xbf16>, vector<1x128xf32> -> vector<1x128xf32>
    %186 = arith.addf %182, %185 : vector<1x128xf32>
    %c8 = arith.constant 8 : index
    %c0_116 = arith.constant 0 : index
    %187 = vector.load %arg18[%c8, %c0_116] : memref<16x64xbf16, #tpu.memory_space<vmem>>, vector<1x64xbf16>
    %c512_117 = arith.constant 512 : index
    %c0_118 = arith.constant 0 : index
    %188 = vector.load %arg11[%c512_117, %c0_118] : memref<1024x128xbf16, #tpu.memory_space<vmem>>, vector<64x128xbf16>
    %cst_119 = arith.constant dense<0.000000e+00> : vector<1x128xf32>
    %189 = tpu.matmul %187, %188, %cst_119 {dimension_numbers = #tpu.dot_dimension_numbers<[1], [0], [0], [1], [0, 0, 1, 1], [], []>} : vector<1x64xbf16>, vector<64x128xbf16>, vector<1x128xf32> -> vector<1x128xf32>
    %190 = arith.addf %186, %189 : vector<1x128xf32>
    %c9 = arith.constant 9 : index
    %c0_120 = arith.constant 0 : index
    %191 = vector.load %arg18[%c9, %c0_120] : memref<16x64xbf16, #tpu.memory_space<vmem>>, vector<1x64xbf16>
    %c576 = arith.constant 576 : index
    %c0_121 = arith.constant 0 : index
    %192 = vector.load %arg11[%c576, %c0_121] : memref<1024x128xbf16, #tpu.memory_space<vmem>>, vector<64x128xbf16>
    %cst_122 = arith.constant dense<0.000000e+00> : vector<1x128xf32>
    %193 = tpu.matmul %191, %192, %cst_122 {dimension_numbers = #tpu.dot_dimension_numbers<[1], [0], [0], [1], [0, 0, 1, 1], [], []>} : vector<1x64xbf16>, vector<64x128xbf16>, vector<1x128xf32> -> vector<1x128xf32>
    %194 = arith.addf %190, %193 : vector<1x128xf32>
    %c10 = arith.constant 10 : index
    %c0_123 = arith.constant 0 : index
    %195 = vector.load %arg18[%c10, %c0_123] : memref<16x64xbf16, #tpu.memory_space<vmem>>, vector<1x64xbf16>
    %c640 = arith.constant 640 : index
    %c0_124 = arith.constant 0 : index
    %196 = vector.load %arg11[%c640, %c0_124] : memref<1024x128xbf16, #tpu.memory_space<vmem>>, vector<64x128xbf16>
    %cst_125 = arith.constant dense<0.000000e+00> : vector<1x128xf32>
    %197 = tpu.matmul %195, %196, %cst_125 {dimension_numbers = #tpu.dot_dimension_numbers<[1], [0], [0], [1], [0, 0, 1, 1], [], []>} : vector<1x64xbf16>, vector<64x128xbf16>, vector<1x128xf32> -> vector<1x128xf32>
    %198 = arith.addf %194, %197 : vector<1x128xf32>
    %c11 = arith.constant 11 : index
    %c0_126 = arith.constant 0 : index
    %199 = vector.load %arg18[%c11, %c0_126] : memref<16x64xbf16, #tpu.memory_space<vmem>>, vector<1x64xbf16>
    %c704 = arith.constant 704 : index
    %c0_127 = arith.constant 0 : index
    %200 = vector.load %arg11[%c704, %c0_127] : memref<1024x128xbf16, #tpu.memory_space<vmem>>, vector<64x128xbf16>
    %cst_128 = arith.constant dense<0.000000e+00> : vector<1x128xf32>
    %201 = tpu.matmul %199, %200, %cst_128 {dimension_numbers = #tpu.dot_dimension_numbers<[1], [0], [0], [1], [0, 0, 1, 1], [], []>} : vector<1x64xbf16>, vector<64x128xbf16>, vector<1x128xf32> -> vector<1x128xf32>
    %202 = arith.addf %198, %201 : vector<1x128xf32>
    %c12 = arith.constant 12 : index
    %c0_129 = arith.constant 0 : index
    %203 = vector.load %arg18[%c12, %c0_129] : memref<16x64xbf16, #tpu.memory_space<vmem>>, vector<1x64xbf16>
    %c768 = arith.constant 768 : index
    %c0_130 = arith.constant 0 : index
    %204 = vector.load %arg11[%c768, %c0_130] : memref<1024x128xbf16, #tpu.memory_space<vmem>>, vector<64x128xbf16>
    %cst_131 = arith.constant dense<0.000000e+00> : vector<1x128xf32>
    %205 = tpu.matmul %203, %204, %cst_131 {dimension_numbers = #tpu.dot_dimension_numbers<[1], [0], [0], [1], [0, 0, 1, 1], [], []>} : vector<1x64xbf16>, vector<64x128xbf16>, vector<1x128xf32> -> vector<1x128xf32>
    %206 = arith.addf %202, %205 : vector<1x128xf32>
    %c13 = arith.constant 13 : index
    %c0_132 = arith.constant 0 : index
    %207 = vector.load %arg18[%c13, %c0_132] : memref<16x64xbf16, #tpu.memory_space<vmem>>, vector<1x64xbf16>
    %c832 = arith.constant 832 : index
    %c0_133 = arith.constant 0 : index
    %208 = vector.load %arg11[%c832, %c0_133] : memref<1024x128xbf16, #tpu.memory_space<vmem>>, vector<64x128xbf16>
    %cst_134 = arith.constant dense<0.000000e+00> : vector<1x128xf32>
    %209 = tpu.matmul %207, %208, %cst_134 {dimension_numbers = #tpu.dot_dimension_numbers<[1], [0], [0], [1], [0, 0, 1, 1], [], []>} : vector<1x64xbf16>, vector<64x128xbf16>, vector<1x128xf32> -> vector<1x128xf32>
    %210 = arith.addf %206, %209 : vector<1x128xf32>
    %c14 = arith.constant 14 : index
    %c0_135 = arith.constant 0 : index
    %211 = vector.load %arg18[%c14, %c0_135] : memref<16x64xbf16, #tpu.memory_space<vmem>>, vector<1x64xbf16>
    %c896 = arith.constant 896 : index
    %c0_136 = arith.constant 0 : index
    %212 = vector.load %arg11[%c896, %c0_136] : memref<1024x128xbf16, #tpu.memory_space<vmem>>, vector<64x128xbf16>
    %cst_137 = arith.constant dense<0.000000e+00> : vector<1x128xf32>
    %213 = tpu.matmul %211, %212, %cst_137 {dimension_numbers = #tpu.dot_dimension_numbers<[1], [0], [0], [1], [0, 0, 1, 1], [], []>} : vector<1x64xbf16>, vector<64x128xbf16>, vector<1x128xf32> -> vector<1x128xf32>
    %214 = arith.addf %210, %213 : vector<1x128xf32>
    %c15 = arith.constant 15 : index
    %c0_138 = arith.constant 0 : index
    %215 = vector.load %arg18[%c15, %c0_138] : memref<16x64xbf16, #tpu.memory_space<vmem>>, vector<1x64xbf16>
    %c960 = arith.constant 960 : index
    %c0_139 = arith.constant 0 : index
    %216 = vector.load %arg11[%c960, %c0_139] : memref<1024x128xbf16, #tpu.memory_space<vmem>>, vector<64x128xbf16>
    %cst_140 = arith.constant dense<0.000000e+00> : vector<1x128xf32>
    %217 = tpu.matmul %215, %216, %cst_140 {dimension_numbers = #tpu.dot_dimension_numbers<[1], [0], [0], [1], [0, 0, 1, 1], [], []>} : vector<1x64xbf16>, vector<64x128xbf16>, vector<1x128xf32> -> vector<1x128xf32>
    %218 = arith.addf %214, %217 : vector<1x128xf32>
    %c0_141 = arith.constant 0 : index
    %c0_142 = arith.constant 0 : index
    %219 = vector.load %arg12[%c0_141, %c0_142] : memref<1x128xf32, #tpu.memory_space<vmem>>, vector<1x128xf32>
    %220 = arith.addf %218, %219 : vector<1x128xf32>
    %cst_143 = arith.constant 0.000000e+00 : f32
    %221 = vector.broadcast %cst_143 : f32 to vector<1x128xf32>
    %222 = arith.maximumf %220, %221 : vector<1x128xf32>
    %c0_144 = arith.constant 0 : index
    %c0_145 = arith.constant 0 : index
    %c0_146 = arith.constant 0 : index
    %223 = vector.load %arg2[%c0_144, %c0_145, %c0_146] : memref<1x1x16xf32, #tpu.memory_space<vmem>>, vector<1x1x16xf32>
    %224 = vector.shape_cast %223 : vector<1x1x16xf32> to vector<1x16xf32>
    %225 = arith.truncf %224 : vector<1x16xf32> to vector<1x16xbf16>
    %c0_147 = arith.constant 0 : index
    %c0_148 = arith.constant 0 : index
    %226 = vector.load %arg13[%c0_147, %c0_148] : memref<16x128xbf16, #tpu.memory_space<vmem>>, vector<16x128xbf16>
    %cst_149 = arith.constant dense<0.000000e+00> : vector<1x128xf32>
    %227 = tpu.matmul %225, %226, %cst_149 {dimension_numbers = #tpu.dot_dimension_numbers<[1], [0], [0], [1], [0, 0, 1, 1], [], []>} : vector<1x16xbf16>, vector<16x128xbf16>, vector<1x128xf32> -> vector<1x128xf32>
    %c0_150 = arith.constant 0 : index
    %c0_151 = arith.constant 0 : index
    %228 = vector.load %arg14[%c0_150, %c0_151] : memref<1x128xf32, #tpu.memory_space<vmem>>, vector<1x128xf32>
    %229 = arith.addf %227, %228 : vector<1x128xf32>
    %cst_152 = arith.constant 0.000000e+00 : f32
    %230 = vector.broadcast %cst_152 : f32 to vector<1x128xf32>
    %231 = arith.maximumf %229, %230 : vector<1x128xf32>
    %232 = arith.truncf %231 : vector<1x128xf32> to vector<1x128xbf16>
    %c0_153 = arith.constant 0 : index
    %c0_154 = arith.constant 0 : index
    %233 = vector.load %arg15[%c0_153, %c0_154] : memref<128x128xbf16, #tpu.memory_space<vmem>>, vector<128x128xbf16>
    %cst_155 = arith.constant dense<0.000000e+00> : vector<1x128xf32>
    %234 = tpu.matmul %232, %233, %cst_155 {dimension_numbers = #tpu.dot_dimension_numbers<[1], [0], [0], [1], [0, 0, 1, 1], [], []>} : vector<1x128xbf16>, vector<128x128xbf16>, vector<1x128xf32> -> vector<1x128xf32>
    %c0_156 = arith.constant 0 : index
    %c0_157 = arith.constant 0 : index
    %235 = vector.load %arg16[%c0_156, %c0_157] : memref<1x128xf32, #tpu.memory_space<vmem>>, vector<1x128xf32>
    %236 = arith.addf %234, %235 : vector<1x128xf32>
    %cst_158 = arith.constant 0.000000e+00 : f32
    %237 = vector.broadcast %cst_158 : f32 to vector<1x128xf32>
    %238 = arith.maximumf %236, %237 : vector<1x128xf32>
    %c0_159 = arith.constant 0 : index
    %c0_160 = arith.constant 0 : index
    %c0_161 = arith.constant 0 : index
    %239 = vector.load %arg17[%c0_159, %c0_160, %c0_161] : memref<1x1x256xf32, #tpu.memory_space<vmem>>, vector<1x1x128xf32>
    %240 = vector.shape_cast %239 : vector<1x1x128xf32> to vector<1x128xf32>
    %241 = vector.shape_cast %222 : vector<1x128xf32> to vector<1x1x128xf32>
    tpu.vector_store %arg17[%c0_159, %c0_160, %c0_161], %241 {strides = array<i32>} : memref<1x1x256xf32, #tpu.memory_space<vmem>>, vector<1x1x128xf32>,
    %c0_162 = arith.constant 0 : index
    %c0_163 = arith.constant 0 : index
    %c128_164 = arith.constant 128 : index
    %242 = vector.load %arg17[%c0_162, %c0_163, %c128_164] : memref<1x1x256xf32, #tpu.memory_space<vmem>>, vector<1x1x128xf32>
    %243 = vector.shape_cast %242 : vector<1x1x128xf32> to vector<1x128xf32>
    %244 = vector.shape_cast %238 : vector<1x128xf32> to vector<1x1x128xf32>
    tpu.vector_store %arg17[%c0_162, %c0_163, %c128_164], %244 {strides = array<i32>} : memref<1x1x256xf32, #tpu.memory_space<vmem>>, vector<1x1x128xf32>,
    return
  }
  func.func @transform_0(%arg0: i32) -> (i32, i32, i32) {
    %c0_i32 = arith.constant 0 : i32
    %c0_i32_0 = arith.constant 0 : i32
    %c0_i32_1 = arith.constant 0 : i32
    return %arg0, %c0_i32, %c0_i32_0 : i32, i32, i32
  }
  func.func @transform_1(%arg0: i32) -> (i32, i32, i32) {
    %c0_i32 = arith.constant 0 : i32
    %c0_i32_0 = arith.constant 0 : i32
    %c0_i32_1 = arith.constant 0 : i32
    return %arg0, %c0_i32, %c0_i32_0 : i32, i32, i32
  }
  func.func @transform_2(%arg0: i32) -> (i32, i32) {
    %c0_i32 = arith.constant 0 : i32
    %c0_i32_0 = arith.constant 0 : i32
    %c0_i32_1 = arith.constant 0 : i32
    return %c0_i32, %c0_i32_0 : i32, i32
  }
  func.func @transform_3(%arg0: i32) -> (i32, i32) {
    %c0_i32 = arith.constant 0 : i32
    %c0_i32_0 = arith.constant 0 : i32
    %c0_i32_1 = arith.constant 0 : i32
    return %c0_i32, %c0_i32_0 : i32, i32
  }
  func.func @transform_4(%arg0: i32) -> (i32, i32) {
    %c0_i32 = arith.constant 0 : i32
    %c0_i32_0 = arith.constant 0 : i32
    %c0_i32_1 = arith.constant 0 : i32
    return %c0_i32, %c0_i32_0 : i32, i32
  }
  func.func @transform_5(%arg0: i32) -> (i32, i32) {
    %c0_i32 = arith.constant 0 : i32
    %c0_i32_0 = arith.constant 0 : i32
    %c0_i32_1 = arith.constant 0 : i32
    return %c0_i32, %c0_i32_0 : i32, i32
  }
  func.func @transform_6(%arg0: i32) -> (i32, i32) {
    %c0_i32 = arith.constant 0 : i32
    %c0_i32_0 = arith.constant 0 : i32
    %c0_i32_1 = arith.constant 0 : i32
    return %c0_i32, %c0_i32_0 : i32, i32
  }
  func.func @transform_7(%arg0: i32) -> (i32, i32) {
    %c0_i32 = arith.constant 0 : i32
    %c0_i32_0 = arith.constant 0 : i32
    %c0_i32_1 = arith.constant 0 : i32
    return %c0_i32, %c0_i32_0 : i32, i32
  }
  func.func @transform_8(%arg0: i32) -> (i32, i32) {
    %c0_i32 = arith.constant 0 : i32
    %c0_i32_0 = arith.constant 0 : i32
    %c0_i32_1 = arith.constant 0 : i32
    return %c0_i32, %c0_i32_0 : i32, i32
  }
  func.func @transform_9(%arg0: i32) -> (i32, i32) {
    %c0_i32 = arith.constant 0 : i32
    %c0_i32_0 = arith.constant 0 : i32
    %c0_i32_1 = arith.constant 0 : i32
    return %c0_i32, %c0_i32_0 : i32, i32
  }
  func.func @transform_10(%arg0: i32) -> (i32, i32) {
    %c0_i32 = arith.constant 0 : i32
    %c0_i32_0 = arith.constant 0 : i32
    %c0_i32_1 = arith.constant 0 : i32
    return %c0_i32, %c0_i32_0 : i32, i32
  }
  func.func @transform_11(%arg0: i32) -> (i32, i32) {
    %c0_i32 = arith.constant 0 : i32
    %c0_i32_0 = arith.constant 0 : i32
    %c0_i32_1 = arith.constant 0 : i32
    return %c0_i32, %c0_i32_0 : i32, i32
  }
  func.func @transform_12(%arg0: i32) -> (i32, i32) {
    %c0_i32 = arith.constant 0 : i32
    %c0_i32_0 = arith.constant 0 : i32
    %c0_i32_1 = arith.constant 0 : i32
    return %c0_i32, %c0_i32_0 : i32, i32
  }
  func.func @transform_13(%arg0: i32) -> (i32, i32) {
    %c0_i32 = arith.constant 0 : i32
    %c0_i32_0 = arith.constant 0 : i32
    %c0_i32_1 = arith.constant 0 : i32
    return %c0_i32, %c0_i32_0 : i32, i32
  }
  func.func @transform_14(%arg0: i32) -> (i32, i32) {
    %c0_i32 = arith.constant 0 : i32
    %c0_i32_0 = arith.constant 0 : i32
    %c0_i32_1 = arith.constant 0 : i32
    return %c0_i32, %c0_i32_0 : i32, i32
  }
  func.func @transform_15(%arg0: i32) -> (i32, i32) {
    %c0_i32 = arith.constant 0 : i32
    %c0_i32_0 = arith.constant 0 : i32
    %c0_i32_1 = arith.constant 0 : i32
    return %c0_i32, %c0_i32_0 : i32, i32
  }
  func.func @transform_16(%arg0: i32) -> (i32, i32, i32) {
    %c0_i32 = arith.constant 0 : i32
    %c0_i32_0 = arith.constant 0 : i32
    %c0_i32_1 = arith.constant 0 : i32
    return %arg0, %c0_i32, %c0_i32_0 : i32, i32, i32
  }
}

</mosaic_0001>

<bundles_post_ra>
// kernel: _lambda_.1
= control target key start
LH: loop header
LB: loop body
LE: loop exit
PB: predicated region body
PF: predicated region fallthrough
CT: control target
= control target key end

     0   :  { %s7432_s21 = smov 0   ;;  %s8842_s0 = inlined_call_operand.vmem [shape: bf16[2,225,64], index: 0, kind: input, shape index: {}]   ;;  %s8843_s1 = inlined_call_operand.vmem [shape: f32[2,1,16], index: 1, kind: input, shape index: {}]   ;;  %s8844_s2 = inlined_call_operand.vmem [shape: bf16[64,32], index: 2, kind: input, shape index: {}]   ;;  %s8845_s3 = inlined_call_operand.vmem [shape: f32[1,32], index: 3, kind: input, shape index: {}]   ;;  %s8846_s4 = inlined_call_operand.vmem [shape: bf16[640,225], index: 4, kind: input, shape index: {}]   ;;  %s8847_s5 = inlined_call_operand.vmem [shape: bf16[512,64], index: 5, kind: input, shape index: {}]   ;;  %s8848_s6 = inlined_call_operand.vmem [shape: f32[1,64], index: 6, kind: input, shape index: {}]   ;;  %s8849_s7 = inlined_call_operand.vmem [shape: bf16[144,40], index: 7, kind: input, shape index: {}]   ;;  %s8850_s8 = inlined_call_operand.vmem [shape: bf16[576,64], index: 8, kind: input, shape index: {}]   ;;  %s8851_s9 = inlined_call_operand.vmem [shape: f32[1,64], index: 9, kind: input, shape index: {}]   ;;  %s8852_s10 = inlined_call_operand.vmem [shape: bf16[1024,128], index: 10, kind: input, shape index: {}]   ;;  %s8853_s11 = inlined_call_operand.vmem [shape: f32[1,128], index: 11, kind: input, shape index: {}]   ;;  %s8854_s12 = inlined_call_operand.vmem [shape: bf16[16,128], index: 12, kind: input, shape index: {}]   ;;  %s8855_s13 = inlined_call_operand.vmem [shape: f32[1,128], index: 13, kind: input, shape index: {}]   ;;  %s8856_s14 = inlined_call_operand.vmem [shape: bf16[128,128], index: 14, kind: input, shape index: {}]   ;;  %s8857_s15 = inlined_call_operand.vmem [shape: f32[1,128], index: 15, kind: input, shape index: {}]   ;;  %s8858_s16 = inlined_call_operand.vmem [shape: f32[2,1,256], index: 16, kind: output, shape index: {}]  }
   0x1   :  { %8859 = sst [smem:[#allocation3_spill]] %s8842_s0 }
   0x2 LB: > { %s5693_s22 = sadd.s32 4294967295, %s7342_s21   ;;  %p5697_p0 = scmp.ge.s32.totalorder %s7342_s21, 1  ;;  %s7342_s21 = sphi %s7432_s21, %s26_s21  }
   0x3   : > { %p470_p1 = scmp.lt.s32.totalorder %s7342_s21, 3 }
   0x5   : > { %p471_p2 = pnand %p5697_p0, %p470_p1 }
   0x6   : > { %v7047_v0 = vld [vmem:[%s8844_s2] sm:$0xff] (!%p471_p2)   ;;  %v7344_v1 = vmov (!%p471_p2), 0.0   ;;  %v7048_v2 = vld [vmem:[%s8844_s2 + $0x8] sm:$0xff] (!%p471_p2)   ;;  %vm7345_vm0 = vmmov (!%p471_p2), 0   ;;  %p522_p3 = scmp.lt.s32.totalorder (!%p471_p2), %s5693_s22, 1  ;;  %v7049_v3 = vld [vmem:[%s8844_s2 + $0x10] sm:$0xff] (!%p471_p2)  }
   0x7   : > { %474 = sbr.rel (%p471_p2) target bundleno = 2223 (0x8af), region = 84  ;;  %6339 = vmatprep.subr.bf16.mxu0 (!%p471_p2), %v7344_v1  ;;  %6347 = vmatprep.mubr.msk.bf16.mxu0 (!%p471_p2), %vm7345_vm0, %v7344_v1  ;;  %s8860_s17 = sld [smem:[#allocation3_spill]] (!%p471_p2)  ;;  %v7050_v4 = vld [vmem:[%s8844_s2 + $0x18] sm:$0xff] (!%p471_p2)   ;;  %vm676_vm1 = vcmask (!%p471_p2), 523264   ;;  %v7346_v18 = vmov (!%p471_p2), 0   ;;  %vm1358_vm2 = vcmask (!%p471_p2), 793600  }
   0x8   : > { %6340 = vmatpush3.bf16.msra.mxu0 (!%p471_p2), %v7047_v0  ;;  %1485 = vmatprep.subr.bf16.mxu1 (!%p471_p2), %v7346_v18  ;;  %v7068_v21 = vld [vmem:[%s8846_s4 + $0x4] ss:$8 sps:$4 sm:$0xff] (!%p471_p2)   ;;  %v7535_v22 = vld [vmem:[%s8845_s3] ss:$0 sm:$0xff] (!%p471_p2)  ;;  %vm1479_vm3 = vcmask (!%p471_p2), 1040384   ;;  %vm1864_vm4 = vcmask (!%p471_p2), 261120  }
   0x9   : > { %6341 = vmatprep.subr.bf16.mxu0 (!%p471_p2), %v7344_v1  ;;  %5815 = vmatprep.mubr.msk.bf16.mxu1 (!%p471_p2), %vm1358_vm2, %v7068_v21  ;;  %vm3364_vm5 = vcmask (!%p471_p2), 1043456   ;;  %vm3336_vm6 = vcmask (!%p471_p2), 326656   ;;  %vm5473_vm7 = vcmask (!%p471_p2), 130048  }
   0xc   : > { %6342 = vmatpush3.bf16.msra.mxu0 (!%p471_p2), %v7048_v2 }
   0xd   : > { %6343 = vmatprep.subr.bf16.mxu0 (!%p471_p2), %v7344_v1 }
   0xe   : > { %s8864_s22 = smov (!%p522_p3, %s5693_s22), 1 }
   0xf   : > { %s7035_s29 = smul.u32 116, %s8864_s22  ;;  %s5699_s26 = sshll.u32 %s8864_s22, 1 }
  0x10   : > { %6344 = vmatpush3.bf16.msra.mxu0 %v7049_v3  ;;  %s533_s0 = scalar_lea.vmem %s8858_s16, %s5699_s26 }
  0x11   : > { %s7460_s18 = scalar_lea.vmem %s8860_s17, %s7035_s29  ;;  %6345 = vmatprep.subr.bf16.mxu0 %v7344_v1 }
  0x12   : > { %v7051_v5 = vld [vmem:[%s7460_s18] sm:$0xff]   ;;  %v7052_v6 = vld [vmem:[%s7460_s18 + $0x8] sm:$0xff]   ;;  %v7053_v7 = vld [vmem:[%s7460_s18 + $0x10] sm:$0xff]  }
  0x13   : > { %v7054_v8 = vld [vmem:[%s7460_s18 + $0x18] sm:$0xff]   ;;  %v7055_v9 = vld [vmem:[%s7460_s18 + $0x20] sm:$0xff]   ;;  %v7056_v10 = vld [vmem:[%s7460_s18 + $0x28] sm:$0xff]  }
  0x14   : > { %6346 = vmatpush3.bf16.msra.mxu0 %v7050_v4  ;;  %v7057_v11 = vld [vmem:[%s7460_s18 + $0x30] sm:$0xff]   ;;  %v7058_v12 = vld [vmem:[%s7460_s18 + $0x38] sm:$0xff]   ;;  %v7059_v13 = vld [vmem:[%s7460_s18 + $0x40] sm:$0xff]  }
  0x15   : > { %6407 = vmatprep.subr.bf16.mxu0 %v7344_v1  ;;  %v7060_v14 = vld [vmem:[%s7460_s18 + $0x48] sm:$0xff]   ;;  %v7061_v15 = vld [vmem:[%s7460_s18 + $0x50] sm:$0xff]   ;;  %v7062_v16 = vld [vmem:[%s7460_s18 + $0x58] sm:$0xff]  }
  0x16   : > { %v7063_v17 = vld [vmem:[%s7460_s18 + $0x60] sm:$0xff]   ;;  %v7064_v19 = vld [vmem:[%s7460_s18 + $0x68] sm:$0xff]   ;;  %v7065_v20 = vld [vmem:[%s7460_s18 + $0x70] ss:$0 sps:$4 sm:$0x11]   ;;  %s529_s18 = scalar_lea.vmem %s8843_s1, %s8864_s22 }
  0x17   : > { %6348 = vmatmul.mubr.msk.bf16.vlgmr.msra.gmra.mrb[0].mxu0 %vm676_vm1, %v7051_v5 }
  0x18   : > { %6351 = vmatprep.mubr.msk.bf16.mxu0 %vm7345_vm0, %v7344_v1 }
  0x1f   : > { %6352 = vmatmul.mubr.msk.bf16.gmra.mrb[4].mxu0 %vm676_vm1, %v7052_v6 }
  0x20   : > { %6355 = vmatprep.mubr.msk.bf16.mxu0 %vm7345_vm0, %v7344_v1 }
  0x27   : > { %6356 = vmatmul.mubr.msk.bf16.gmra.mrb[8].mxu0 %vm676_vm1, %v7053_v7 }
  0x28   : > { %6359 = vmatprep.mubr.msk.bf16.mxu0 %vm7345_vm0, %v7344_v1 }
  0x2f   : > { %6360 = vmatmul.mubr.msk.bf16.gmra.mrb[12].mxu0 %vm676_vm1, %v7054_v8 }
  0x30   : > { %6363 = vmatprep.mubr.msk.bf16.mxu0 %vm7345_vm0, %v7344_v1 }
  0x37   : > { %6364 = vmatmul.mubr.msk.bf16.gmra.mrb[16].mxu0 %vm676_vm1, %v7055_v9 }
  0x38   : > { %6367 = vmatprep.mubr.msk.bf16.mxu0 %vm7345_vm0, %v7344_v1 }
  0x3f   : > { %6368 = vmatmul.mubr.msk.bf16.gmra.mrb[20].mxu0 %vm676_vm1, %v7056_v10 }
  0x40   : > { %6371 = vmatprep.mubr.msk.bf16.mxu0 %vm7345_vm0, %v7344_v1 }
  0x47   : > { %6372 = vmatmul.mubr.msk.bf16.gmra.mrb[24].mxu0 %vm676_vm1, %v7057_v11 }
  0x48   : > { %6375 = vmatprep.mubr.msk.bf16.mxu0 %vm7345_vm0, %v7344_v1 }
  0x4f   : > { %6376 = vmatmul.mubr.msk.bf16.gmra.mrb[28].mxu0 %vm676_vm1, %v7058_v12 }
  0x50   : > { %6379 = vmatprep.mubr.msk.bf16.mxu0 %vm7345_vm0, %v7344_v1 }
  0x57   : > { %6380 = vmatmul.mubr.msk.bf16.gmra.mrb[32].mxu0 %vm676_vm1, %v7059_v13 }
  0x58   : > { %6383 = vmatprep.mubr.msk.bf16.mxu0 %vm7345_vm0, %v7344_v1 }
  0x5f   : > { %6384 = vmatmul.mubr.msk.bf16.gmra.mrb[36].mxu0 %vm676_vm1, %v7060_v14 }
  0x60   : > { %6387 = vmatprep.mubr.msk.bf16.mxu0 %vm7345_vm0, %v7344_v1 }
  0x67   : > { %6388 = vmatmul.mubr.msk.bf16.gmra.mrb[40].mxu0 %vm676_vm1, %v7061_v15 }
  0x68   : > { %6391 = vmatprep.mubr.msk.bf16.mxu0 %vm7345_vm0, %v7344_v1 }
  0x6f   : > { %6392 = vmatmul.mubr.msk.bf16.gmra.mrb[44].mxu0 %vm676_vm1, %v7062_v16 }
  0x70   : > { %6395 = vmatprep.mubr.msk.bf16.mxu0 %vm7345_vm0, %v7344_v1 }
  0x77   : > { %6396 = vmatmul.mubr.msk.bf16.gmra.mrb[48].mxu0 %vm676_vm1, %v7063_v17 }
  0x78   : > { %6399 = vmatprep.mubr.msk.bf16.mxu0 %vm7345_vm0, %v7344_v1 }
  0x7f   : > { %6400 = vmatmul.mubr.msk.bf16.gmra.mrb[52].mxu0 %vm676_vm1, %v7064_v19 }
  0x80   : > { %6403 = vmatprep.mubr.msk.bf16.mxu0 %vm7345_vm0, %v7344_v1 }
  0x87   : > { %6404 = vmatmul.mubr.msk.bf16.gmra.mrb[56].mxu0 %vm676_vm1, %v7065_v20 }
  0x88   : > { %6411 = vmatprep.mubr.msk.bf16.mxu0 %vm7345_vm0, %v7344_v1 }
  0xea   : > { %v756_v23 = vpop.f32.mrb[0].mxu0 }
  0xeb   : > { %v757_v24 = vadd.f32 %v7535_v22, %v756_v23  ;;  %v6349_v25 = vpop.f32.mrb[1].mxu0 }
  0xec   : > { %v759_v26 = vpop.f32.mrb[2].mxu0 }
  0xed   : > { %v760_v27 = vadd.f32 %v7535_v22, %v759_v26  ;;  %v6350_v28 = vpop.f32.mrb[3].mxu0  ;;  %v874_v29 = vmax.f32 %v757_v24, 0.0 }
  0xef   : > { %v875_v30 = vmax.f32 %v760_v27, 0.0 }
  0xf1   : > { %v903_v31 = vpack.c.bf16 %v875_v30, %v874_v29 }
  0xf2   : > { %v764_v32 = vpop.f32.mrb[4].mxu0 }
  0xf3   : > { %v765_v33 = vadd.f32 %v7535_v22, %v764_v32  ;;  %v6353_v34 = vpop.f32.mrb[5].mxu0  ;;  %1486 = vmatpush1.bf16.msra.mxu1 %v903_v31 }
  0xf4   : > { %v767_v35 = vpop.f32.mrb[6].mxu0  ;;  %1487 = vmatprep.subr.bf16.mxu1 %v7346_v18 }
  0xf5   : > { %v768_v36 = vadd.f32 %v7535_v22, %v767_v35  ;;  %v6354_v37 = vpop.f32.mrb[7].mxu0  ;;  %v876_v38 = vmax.f32 %v765_v33, 0.0 }
  0xf7   : > { %v877_v39 = vmax.f32 %v768_v36, 0.0 }
  0xf9   : > { %v904_v40 = vpack.c.bf16 %v877_v39, %v876_v38 }
  0xfa   : > { %v772_v41 = vpop.f32.mrb[8].mxu0 }
  0xfb   : > { %v773_v42 = vadd.f32 %v7535_v22, %v772_v41  ;;  %v6357_v43 = vpop.f32.mrb[9].mxu0  ;;  %1488 = vmatpush1.bf16.msra.mxu1 %v904_v40 }
  0xfc   : > { %v775_v44 = vpop.f32.mrb[10].mxu0  ;;  %1489 = vmatprep.subr.bf16.mxu1 %v7346_v18 }
  0xfd   : > { %v776_v45 = vadd.f32 %v7535_v22, %v775_v44  ;;  %v6358_v46 = vpop.f32.mrb[11].mxu0  ;;  %v878_v47 = vmax.f32 %v773_v42, 0.0 }
  0xff   : > { %v879_v48 = vmax.f32 %v776_v45, 0.0 }
 0x101   : > { %v905_v49 = vpack.c.bf16 %v879_v48, %v878_v47 }
 0x102   : > { %v780_v50 = vpop.f32.mrb[12].mxu0 }
 0x103   : > { %v781_v51 = vadd.f32 %v7535_v22, %v780_v50  ;;  %v6361_v52 = vpop.f32.mrb[13].mxu0  ;;  %1490 = vmatpush1.bf16.msra.mxu1 %v905_v49 }
 0x104   : > { %v783_v53 = vpop.f32.mrb[14].mxu0  ;;  %1491 = vmatprep.subr.bf16.mxu1 %v7346_v18 }
 0x105   : > { %v784_v54 = vadd.f32 %v7535_v22, %v783_v53  ;;  %v6362_v55 = vpop.f32.mrb[15].mxu0  ;;  %v880_v56 = vmax.f32 %v781_v51, 0.0 }
 0x107   : > { %v881_v57 = vmax.f32 %v784_v54, 0.0 }
 0x109   : > { %v906_v58 = vpack.c.bf16 %v881_v57, %v880_v56 }
 0x10a   : > { %v788_v59 = vpop.f32.mrb[16].mxu0 }
 0x10b   : > { %v789_v60 = vadd.f32 %v7535_v22, %v788_v59  ;;  %v6365_v61 = vpop.f32.mrb[17].mxu0  ;;  %1492 = vmatpush1.bf16.msra.mxu1 %v906_v58 }
 0x10c   : > { %v791_v62 = vpop.f32.mrb[18].mxu0  ;;  %1493 = vmatprep.subr.bf16.mxu1 %v7346_v18 }
 0x10d   : > { %v792_v63 = vadd.f32 %v7535_v22, %v791_v62  ;;  %v6366_v0 = vpop.f32.mrb[19].mxu0  ;;  %v882_v2 = vmax.f32 %v789_v60, 0.0 }
 0x10f   : > { %v883_v3 = vmax.f32 %v792_v63, 0.0 }
 0x111   : > { %v907_v4 = vpack.c.bf16 %v883_v3, %v882_v2 }
 0x112   : > { %v796_v5 = vpop.f32.mrb[20].mxu0 }
 0x113   : > { %v797_v6 = vadd.f32 %v7535_v22, %v796_v5  ;;  %v6369_v7 = vpop.f32.mrb[21].mxu0  ;;  %1494 = vmatpush1.bf16.msra.mxu1 %v907_v4 }
 0x114   : > { %v799_v8 = vpop.f32.mrb[22].mxu0  ;;  %1495 = vmatprep.subr.bf16.mxu1 %v7346_v18 }
 0x115   : > { %v800_v9 = vadd.f32 %v7535_v22, %v799_v8  ;;  %v6370_v10 = vpop.f32.mrb[23].mxu0  ;;  %v884_v11 = vmax.f32 %v797_v6, 0.0 }
 0x117   : > { %v885_v12 = vmax.f32 %v800_v9, 0.0 }
 0x119   : > { %v908_v13 = vpack.c.bf16 %v885_v12, %v884_v11 }
 0x11a   : > { %v804_v14 = vpop.f32.mrb[24].mxu0 }
 0x11b   : > { %v805_v15 = vadd.f32 %v7535_v22, %v804_v14  ;;  %v6373_v16 = vpop.f32.mrb[25].mxu0  ;;  %1496 = vmatpush1.bf16.msra.mxu1 %v908_v13 }
 0x11c   : > { %v807_v17 = vpop.f32.mrb[26].mxu0  ;;  %1497 = vmatprep.subr.bf16.mxu1 %v7346_v18 }
 0x11d   : > { %v808_v19 = vadd.f32 %v7535_v22, %v807_v17  ;;  %v6374_v20 = vpop.f32.mrb[27].mxu0  ;;  %v886_v21 = vmax.f32 %v805_v15, 0.0 }
 0x11f   : > { %v887_v23 = vmax.f32 %v808_v19, 0.0 }
 0x121   : > { %v909_v24 = vpack.c.bf16 %v887_v23, %v886_v21 }
 0x122   : > { %v812_v25 = vpop.f32.mrb[28].mxu0 }
 0x123   : > { %v813_v26 = vadd.f32 %v7535_v22, %v812_v25  ;;  %v6377_v27 = vpop.f32.mrb[29].mxu0  ;;  %1498 = vmatpush1.bf16.msra.mxu1 %v909_v24 }
 0x124   : > { %v815_v28 = vpop.f32.mrb[30].mxu0  ;;  %1499 = vmatprep.subr.bf16.mxu1 %v7346_v18 }
 0x125   : > { %v816_v29 = vadd.f32 %v7535_v22, %v815_v28  ;;  %v6378_v30 = vpop.f32.mrb[31].mxu0  ;;  %v888_v31 = vmax.f32 %v813_v26, 0.0 }
 0x127   : > { %v889_v32 = vmax.f32 %v816_v29, 0.0 }
 0x129   : > { %v910_v33 = vpack.c.bf16 %v889_v32, %v888_v31 }
 0x12a   : > { %v820_v34 = vpop.f32.mrb[32].mxu0 }
 0x12b   : > { %v821_v35 = vadd.f32 %v7535_v22, %v820_v34  ;;  %v6381_v36 = vpop.f32.mrb[33].mxu0  ;;  %1500 = vmatpush1.bf16.msra.mxu1 %v910_v33  ;;  %v1481_v33 = vsel %vm1479_vm3, 65535, %v7346_v18 }
 0x12c   : > { %v823_v37 = vpop.f32.mrb[34].mxu0  ;;  %1501 = vmatprep.subr.bf16.mxu1 %v7346_v18  ;;  %v7066_v36 = vld [vmem:[%s8846_s4] ss:$8 sps:$4 sm:$0xff]  }
 0x12d   : > { %v824_v38 = vadd.f32 %v7535_v22, %v823_v37  ;;  %v6382_v39 = vpop.f32.mrb[35].mxu0  ;;  %v890_v40 = vmax.f32 %v821_v35, 0.0  ;;  %v7117_v37 = vld [vmem:[%s8847_s5 + $0x10] sm:$0xff]  }
 0x12e   : > { %6408 = vmatpush3.bf16.msra.mxu0 %v7117_v37  ;;  %v7074_v39 = vld [vmem:[%s8846_s4 + $0x20] ss:$8 sps:$4 sm:$0xff]  }
 0x12f   : > { %v891_v41 = vmax.f32 %v824_v38, 0.0  ;;  %6409 = vmatprep.subr.bf16.mxu0 %v7344_v1  ;;  %v7072_v38 = vld [vmem:[%s8846_s4 + $0x24] ss:$8 sps:$4 sm:$0xff]  }
 0x131   : > { %v911_v42 = vpack.c.bf16 %v891_v41, %v890_v40  ;;  %v7075_v40 = vld [vmem:[%s8846_s4 + $0x34] ss:$8 sps:$4 sm:$0xff]   ;;  %v7077_v41 = vld [vmem:[%s8846_s4 + $0x30] ss:$8 sps:$4 sm:$0xff]  }
 0x132   : > { %v828_v43 = vpop.f32.mrb[36].mxu0 }
 0x133   : > { %v829_v44 = vadd.f32 %v7535_v22, %v828_v43  ;;  %v6385_v45 = vpop.f32.mrb[37].mxu0  ;;  %1502 = vmatpush1.bf16.msra.mxu1 %v911_v42  ;;  %v7078_v42 = vld [vmem:[%s8846_s4 + $0x44] ss:$8 sps:$4 sm:$0xff]   ;;  %v7080_v43 = vld [vmem:[%s8846_s4 + $0x40] ss:$8 sps:$4 sm:$0xff]  }
 0x134   : > { %v831_v46 = vpop.f32.mrb[38].mxu0  ;;  %1503 = vmatprep.subr.bf16.mxu1 %v7346_v18  ;;  %v7083_v45 = vld [vmem:[%s8846_s4 + $0x50] ss:$8 sps:$4 sm:$0xff]  }
 0x135   : > { %v832_v47 = vadd.f32 %v7535_v22, %v831_v46  ;;  %v6386_v48 = vpop.f32.mrb[39].mxu0  ;;  %v892_v49 = vmax.f32 %v829_v44, 0.0  ;;  %v7081_v44 = vld [vmem:[%s8846_s4 + $0x54] ss:$8 sps:$4 sm:$0xff]   ;;  %v7084_v46 = vld [vmem:[%s8846_s4 + $0x64] ss:$8 sps:$4 sm:$0xff]  }
 0x136   : > { %v7087_v48 = vld [vmem:[%s8846_s4 + $0x74] ss:$8 sps:$4 sm:$0xff]  }
 0x137   : > { %v893_v50 = vmax.f32 %v832_v47, 0.0  ;;  %v7086_v47 = vld [vmem:[%s8846_s4 + $0x60] ss:$8 sps:$4 sm:$0xff]  }
 0x139   : > { %v912_v51 = vpack.c.bf16 %v893_v50, %v892_v49  ;;  %v7089_v49 = vld [vmem:[%s8846_s4 + $0x70] ss:$8 sps:$4 sm:$0xff]   ;;  %v7090_v50 = vld [vmem:[%s8846_s4 + $0x84] ss:$8 sps:$4 sm:$0xff]  }
 0x13a   : > { %v836_v52 = vpop.f32.mrb[40].mxu0 }
 0x13b   : > { %v837_v53 = vadd.f32 %v7535_v22, %v836_v52  ;;  %v6389_v54 = vpop.f32.mrb[41].mxu0  ;;  %1504 = vmatpush1.bf16.msra.mxu1 %v912_v51  ;;  %v7139_v51 = vld [vmem:[%s8847_s5 + $0x18] sm:$0xff]   ;;  %v7092_v52 = vld [vmem:[%s8846_s4 + $0x80] ss:$8 sps:$4 sm:$0xff]  }
 0x13c   : > { %v839_v55 = vpop.f32.mrb[42].mxu0  ;;  %1505 = vmatprep.subr.bf16.mxu1 %v7346_v18  ;;  %6410 = vmatpush3.bf16.msra.mxu0 %v7139_v51  ;;  %v7095_v54 = vld [vmem:[%s8846_s4 + $0x90] ss:$8 sps:$4 sm:$0xff]  }
 0x13d   : > { %v840_v56 = vadd.f32 %v7535_v22, %v839_v55  ;;  %v6390_v57 = vpop.f32.mrb[43].mxu0  ;;  %v894_v58 = vmax.f32 %v837_v53, 0.0  ;;  %6423 = vmatprep.subr.bf16.mxu0 %v7344_v1  ;;  %v7093_v53 = vld [vmem:[%s8846_s4 + $0x94] ss:$8 sps:$4 sm:$0xff]   ;;  %v7096_v55 = vld [vmem:[%s8846_s4 + $0xa4] ss:$8 sps:$4 sm:$0xff]  }
 0x13e   : > { %v7099_v57 = vld [vmem:[%s8846_s4 + $0xb4] ss:$8 sps:$4 sm:$0xff]  }
 0x13f   : > { %v895_v59 = vmax.f32 %v840_v56, 0.0  ;;  %v7098_v56 = vld [vmem:[%s8846_s4 + $0xa0] ss:$8 sps:$4 sm:$0xff]  }
 0x141   : > { %v913_v60 = vpack.c.bf16 %v895_v59, %v894_v58  ;;  %v7101_v58 = vld [vmem:[%s8846_s4 + $0xb0] ss:$8 sps:$4 sm:$0xff]   ;;  %v7102_v59 = vld [vmem:[%s8846_s4 + $0xc4] ss:$8 sps:$4 sm:$0xff]  }
 0x142   : > { %v844_v61 = vpop.f32.mrb[44].mxu0 }
 0x143   : > { %v845_v62 = vadd.f32 %v7535_v22, %v844_v61  ;;  %v6393_v63 = vpop.f32.mrb[45].mxu0  ;;  %1506 = vmatpush1.bf16.msra.mxu1 %v913_v60  ;;  %v7104_v60 = vld [vmem:[%s8846_s4 + $0xc0] ss:$8 sps:$4 sm:$0xff]   ;;  %v7105_v61 = vld [vmem:[%s8846_s4 + $0xd4] ss:$8 sps:$4 sm:$0xff]  }
 0x144   : > { %v847_v0 = vpop.f32.mrb[46].mxu0  ;;  %1507 = vmatprep.subr.bf16.mxu1 %v7346_v18  ;;  %v7108_v63 = vld [vmem:[%s8846_s4 + $0xe4] ss:$8 sps:$4 sm:$0xff]  }
 0x145   : > { %v848_v2 = vadd.f32 %v7535_v22, %v847_v0  ;;  %v6394_v3 = vpop.f32.mrb[47].mxu0  ;;  %v896_v4 = vmax.f32 %v845_v62, 0.0  ;;  %v7107_v62 = vld [vmem:[%s8846_s4 + $0xd0] ss:$8 sps:$4 sm:$0xff]   ;;  %v7110_v0 = vld [vmem:[%s8846_s4 + $0xe0] ss:$8 sps:$4 sm:$0xff]  }
 0x146   : > { %v7113_v3 = vld [vmem:[%s8846_s4 + $0xf0] ss:$8 sps:$4 sm:$0xff]  }
 0x147   : > { %v897_v5 = vmax.f32 %v848_v2, 0.0  ;;  %v7111_v2 = vld [vmem:[%s8846_s4 + $0xf4] ss:$8 sps:$4 sm:$0xff]  }
 0x149   : > { %v914_v6 = vpack.c.bf16 %v897_v5, %v896_v4  ;;  %v7114_v4 = vld [vmem:[%s8846_s4 + $0x104] ss:$8 sps:$4 sm:$0xff]   ;;  %v7116_v5 = vld [vmem:[%s8846_s4 + $0x100] ss:$8 sps:$4 sm:$0xff]  }
 0x14a   : > { %v852_v7 = vpop.f32.mrb[48].mxu0 }
 0x14b   : > { %v853_v8 = vadd.f32 %v7535_v22, %v852_v7  ;;  %v6397_v9 = vpop.f32.mrb[49].mxu0  ;;  %1508 = vmatpush1.bf16.msra.mxu1 %v914_v6  ;;  %v7118_v6 = vld [vmem:[%s8846_s4 + $0x114] ss:$8 sps:$4 sm:$0xff]   ;;  %v7120_v7 = vld [vmem:[%s8846_s4 + $0x110] ss:$8 sps:$4 sm:$0xff]  }
 0x14c   : > { %v855_v10 = vpop.f32.mrb[50].mxu0  ;;  %1509 = vmatprep.subr.bf16.mxu1 %v7346_v18  ;;  %v7123_v9 = vld [vmem:[%s8846_s4 + $0x120] ss:$8 sps:$4 sm:$0xff]  }
 0x14d   : > { %v856_v11 = vadd.f32 %v7535_v22, %v855_v10  ;;  %v6398_v12 = vpop.f32.mrb[51].mxu0  ;;  %v898_v13 = vmax.f32 %v853_v8, 0.0  ;;  %v7121_v8 = vld [vmem:[%s8846_s4 + $0x124] ss:$8 sps:$4 sm:$0xff]   ;;  %v7124_v10 = vld [vmem:[%s8846_s4 + $0x134] ss:$8 sps:$4 sm:$0xff]  }
 0x14e   : > { %v7127_v12 = vld [vmem:[%s8846_s4 + $0x144] ss:$8 sps:$4 sm:$0xff]  }
 0x14f   : > { %v899_v14 = vmax.f32 %v856_v11, 0.0  ;;  %v7126_v11 = vld [vmem:[%s8846_s4 + $0x130] ss:$8 sps:$4 sm:$0xff]  }
 0x151   : > { %v915_v15 = vpack.c.bf16 %v899_v14, %v898_v13  ;;  %v7129_v13 = vld [vmem:[%s8846_s4 + $0x140] ss:$8 sps:$4 sm:$0xff]   ;;  %v7130_v14 = vld [vmem:[%s8846_s4 + $0x154] ss:$8 sps:$4 sm:$0xff]  }
 0x152   : > { %v860_v16 = vpop.f32.mrb[52].mxu0 }
 0x153   : > { %v861_v17 = vadd.f32 %v7535_v22, %v860_v16  ;;  %v6401_v19 = vpop.f32.mrb[53].mxu0  ;;  %1510 = vmatpush1.bf16.msra.mxu1 %v915_v15  ;;  %v7132_v15 = vld [vmem:[%s8846_s4 + $0x150] ss:$8 sps:$4 sm:$0xff]   ;;  %v7133_v16 = vld [vmem:[%s8846_s4 + $0x164] ss:$8 sps:$4 sm:$0xff]  }
 0x154   : > { %v863_v20 = vpop.f32.mrb[54].mxu0  ;;  %1511 = vmatprep.subr.bf16.mxu1 %v7346_v18  ;;  %v7136_v19 = vld [vmem:[%s8846_s4 + $0x174] ss:$8 sps:$4 sm:$0xff]  }
 0x155   : > { %v864_v21 = vadd.f32 %v7535_v22, %v863_v20  ;;  %v6402_v23 = vpop.f32.mrb[55].mxu0  ;;  %v900_v24 = vmax.f32 %v861_v17, 0.0  ;;  %v7135_v17 = vld [vmem:[%s8846_s4 + $0x160] ss:$8 sps:$4 sm:$0xff]   ;;  %v7138_v20 = vld [vmem:[%s8846_s4 + $0x170] ss:$8 sps:$4 sm:$0xff]  }
 0x156   : > { %v7142_v23 = vld [vmem:[%s8846_s4 + $0x180] ss:$8 sps:$4 sm:$0xff]  }
 0x157   : > { %v901_v25 = vmax.f32 %v864_v21, 0.0  ;;  %v7140_v21 = vld [vmem:[%s8846_s4 + $0x184] ss:$8 sps:$4 sm:$0xff]  }
 0x159   : > { %v916_v26 = vpack.c.bf16 %v901_v25, %v900_v24  ;;  %v7143_v24 = vld [vmem:[%s8846_s4 + $0x194] ss:$8 sps:$4 sm:$0xff]   ;;  %v7145_v25 = vld [vmem:[%s8846_s4 + $0x190] ss:$8 sps:$4 sm:$0xff]  }
 0x15a   : > { %v868_v27 = vpop.f32.mrb[56].mxu0 }
 0x15b   : > { %v869_v28 = vadd.f32 %v7535_v22, %v868_v27  ;;  %v6405_v29 = vpop.f32.mrb[57].mxu0  ;;  %1512 = vmatpush1.bf16.msra.mxu1 %v916_v26  ;;  %v7069_v22 = vld [vmem:[%s8846_s4 + $0x14] ss:$8 sps:$4 sm:$0xff]   ;;  %v7146_v26 = vld [vmem:[%s8846_s4 + $0x1a4] ss:$8 sps:$4 sm:$0xff]  }
 0x15c   : > { %v871_v30 = vpop.f32.mrb[58].mxu0  ;;  %1513 = vmatprep.subr.bf16.mxu1 %v7346_v18  ;;  %v7071_v18 = vld [vmem:[%s8846_s4 + $0x10] ss:$8 sps:$4 sm:$0xff]   ;;  %v7148_v27 = vld [vmem:[%s8846_s4 + $0x1a0] ss:$8 sps:$4 sm:$0xff]  }
 0x15d   : > { %v902_v31 = vmax.f32 %v869_v28, 0.0  ;;  %v6406_v32 = vpop.f32.mrb[59].mxu0  ;;  %v7149_v28 = vld [vmem:[%s8846_s4 + $0x1b4] ss:$8 sps:$4 sm:$0xff]  }
 0x15f   : > { %v917_v34 = vpack.c.bf16 %v902_v31, %v902_v31  ;;  %v7151_v31 = vld [vmem:[%s8846_s4 + $0x1b0] ss:$8 sps:$4 sm:$0xff]  }
 0x161   : > { %v1483_v35 = vand.u32 %v1481_v33, %v917_v34  ;;  %v7152_v33 = vld [vmem:[%s8846_s4 + $0x1c4] ss:$8 sps:$4 sm:$0xff]  }
 0x163   : > { %1514 = vmatpush1.bf16.msra.mxu1 %v1483_v35 }
 0x164   : > { %7031 = vmatprep.subr.bf16.mxu1 %v7344_v1 }
 0x166   : > { %1518 = vmatmul.mubr.bf16.vlgmr.msra.gmra.mrb[0].mxu1 %v7066_v36 }
 0x167   : > { %5816 = vmatprep.mubr.msk.bf16.mxu1 %vm1358_vm2, %v7069_v22  ;;  %7033 = vmatpush3.bf16.msra.mxu1 %v7117_v37  ;;  %v7154_v37 = vld [vmem:[%s8846_s4 + $0x1c0] ss:$8 sps:$4 sm:$0xff]  }
 0x168   : > { %7032 = vmatprep.subr.bf16.mxu1 %v7344_v1 }
 0x16b   : > { %7034 = vmatpush3.bf16.msra.mxu1 %v7139_v51  ;;  %v7161_v51 = vld [vmem:[%s8846_s4 + $0x1e0] ss:$8 sps:$4 sm:$0xff]  }
 0x16c   : > { %6583 = vmatprep.subr.bf16.mxu1 %v7344_v1 }
 0x16e   : > { %1526 = vmatmul.mubr.bf16.gmra.mrb[4].mxu1 %v7071_v18 }
 0x16f   : > { %5817 = vmatprep.mubr.msk.bf16.mxu1 %vm1358_vm2, %v7072_v38  ;;  %v7155_v38 = vld [vmem:[%s8846_s4 + $0x1d4] ss:$8 sps:$4 sm:$0xff]  }
 0x176   : > { %1534 = vmatmul.mubr.bf16.gmra.mrb[8].mxu1 %v7074_v39 }
 0x177   : > { %5818 = vmatprep.mubr.msk.bf16.mxu1 %vm1358_vm2, %v7075_v40 }
 0x17e   : > { %1542 = vmatmul.mubr.bf16.gmra.mrb[12].mxu1 %v7077_v41 }
 0x17f   : > { %5819 = vmatprep.mubr.msk.bf16.mxu1 %vm1358_vm2, %v7078_v42 }
 0x186   : > { %1550 = vmatmul.mubr.bf16.gmra.mrb[16].mxu1 %v7080_v43  ;;  %v7157_v43 = vld [vmem:[%s8846_s4 + $0x1d0] ss:$8 sps:$4 sm:$0xff]  }
 0x187   : > { %5820 = vmatprep.mubr.msk.bf16.mxu1 %vm1358_vm2, %v7081_v44 }
 0x18e   : > { %1558 = vmatmul.mubr.bf16.gmra.mrb[20].mxu1 %v7083_v45  ;;  %v7158_v45 = vld [vmem:[%s8846_s4 + $0x1e4] ss:$8 sps:$4 sm:$0xff]  }
 0x18f   : > { %5821 = vmatprep.mubr.msk.bf16.mxu1 %vm1358_vm2, %v7084_v46 }
 0x196   : > { %1566 = vmatmul.mubr.bf16.gmra.mrb[24].mxu1 %v7086_v47 }
 0x197   : > { %5822 = vmatprep.mubr.msk.bf16.mxu1 %vm1358_vm2, %v7087_v48  ;;  %v7160_v48 = vld [vmem:[%s8847_s5] sm:$0xff]  }
 0x19e   : > { %1574 = vmatmul.mubr.bf16.gmra.mrb[28].mxu1 %v7089_v49 }
 0x19f   : > { %5823 = vmatprep.mubr.msk.bf16.mxu1 %vm1358_vm2, %v7090_v50 }
 0x1a6   : > { %1582 = vmatmul.mubr.bf16.gmra.mrb[32].mxu1 %v7092_v52 }
 0x1a7   : > { %5824 = vmatprep.mubr.msk.bf16.mxu1 %vm1358_vm2, %v7093_v53  ;;  %v7163_v53 = vld [vmem:[%s8846_s4 + $0x1f4] ss:$8 sps:$4 sm:$0xff]  }
 0x1ae   : > { %1590 = vmatmul.mubr.bf16.gmra.mrb[36].mxu1 %v7095_v54 }
 0x1af   : > { %5825 = vmatprep.mubr.msk.bf16.mxu1 %vm1358_vm2, %v7096_v55  ;;  %v7162_v55 = vld [vmem:[%s8847_s5 + $0x8] sm:$0xff]  }
 0x1b6   : > { %1598 = vmatmul.mubr.bf16.gmra.mrb[40].mxu1 %v7098_v56 }
 0x1b7   : > { %5826 = vmatprep.mubr.msk.bf16.mxu1 %vm1358_vm2, %v7099_v57  ;;  %v7169_v57 = vld [vmem:[%s8847_s5 + $0x20] sm:$0xff]  }
 0x1be   : > { %1606 = vmatmul.mubr.bf16.gmra.mrb[44].mxu1 %v7101_v58 }
 0x1bf   : > { %5827 = vmatprep.mubr.msk.bf16.mxu1 %vm1358_vm2, %v7102_v59 }
 0x1c6   : > { %1614 = vmatmul.mubr.bf16.gmra.mrb[48].mxu1 %v7104_v60  ;;  %v7165_v60 = vld [vmem:[%s8846_s4 + $0x1f0] ss:$8 sps:$4 sm:$0xff]  }
 0x1c7   : > { %5828 = vmatprep.mubr.msk.bf16.mxu1 %vm1358_vm2, %v7105_v61 }
 0x1ce   : > { %1622 = vmatmul.mubr.bf16.gmra.mrb[52].mxu1 %v7107_v62  ;;  %v7166_v62 = vld [vmem:[%s8846_s4 + $0x204] ss:$8 sps:$4 sm:$0xff]  }
 0x1cf   : > { %5829 = vmatprep.mubr.msk.bf16.mxu1 %vm1358_vm2, %v7108_v63 }
 0x1d6   : > { %1630 = vmatmul.mubr.bf16.gmra.mrb[56].mxu1 %v7110_v0  ;;  %v7173_v0 = vld [vmem:[%s8847_s5 + $0x28] sm:$0xff]  }
 0x1d7   : > { %5830 = vmatprep.mubr.msk.bf16.mxu1 %vm1358_vm2, %v7111_v2 }
 0x1de   : > { %1638 = vmatmul.mubr.bf16.gmra.mrb[60].mxu1 %v7113_v3 }
 0x1df   : > { %5831 = vmatprep.mubr.msk.bf16.mxu1 %vm1358_vm2, %v7114_v4  ;;  %v7168_v4 = vld [vmem:[%s8846_s4 + $0x200] ss:$8 sps:$4 sm:$0xff]  }
 0x1e6   : > { %1646 = vmatmul.mubr.bf16.gmra.mrb[64].mxu1 %v7116_v5 }
 0x1e7   : > { %5832 = vmatprep.mubr.msk.bf16.mxu1 %vm1358_vm2, %v7118_v6  ;;  %v7170_v6 = vld [vmem:[%s8846_s4 + $0x214] ss:$8 sps:$4 sm:$0xff]  }
 0x1ee   : > { %1654 = vmatmul.mubr.bf16.gmra.mrb[68].mxu1 %v7120_v7 }
 0x1ef   : > { %5833 = vmatprep.mubr.msk.bf16.mxu1 %vm1358_vm2, %v7121_v8 }
 0x1f6   : > { %1662 = vmatmul.mubr.bf16.gmra.mrb[72].mxu1 %v7123_v9 }
 0x1f7   : > { %5834 = vmatprep.mubr.msk.bf16.mxu1 %vm1358_vm2, %v7124_v10 }
 0x1fe   : > { %1670 = vmatmul.mubr.bf16.gmra.mrb[76].mxu1 %v7126_v11 }
 0x1ff   : > { %5835 = vmatprep.mubr.msk.bf16.mxu1 %vm1358_vm2, %v7127_v12  ;;  %v7172_v12 = vld [vmem:[%s8846_s4 + $0x210] ss:$8 sps:$4 sm:$0xff]  }
 0x206   : > { %1678 = vmatmul.mubr.bf16.gmra.mrb[80].mxu1 %v7129_v13 }
 0x207   : > { %5836 = vmatprep.mubr.msk.bf16.mxu1 %vm1358_vm2, %v7130_v14  ;;  %v7174_v14 = vld [vmem:[%s8846_s4 + $0x224] ss:$8 sps:$4 sm:$0xff]  }
 0x20e   : > { %1686 = vmatmul.mubr.bf16.gmra.mrb[84].mxu1 %v7132_v15 }
 0x20f   : > { %5837 = vmatprep.mubr.msk.bf16.mxu1 %vm1358_vm2, %v7133_v16 }
 0x216   : > { %1694 = vmatmul.mubr.bf16.gmra.mrb[88].mxu1 %v7135_v17 }
 0x217   : > { %5838 = vmatprep.mubr.msk.bf16.mxu1 %vm1358_vm2, %v7136_v19  ;;  %v7180_v19 = vld [vmem:[%s8847_s5 + $0x30] sm:$0xff]  }
 0x21e   : > { %1702 = vmatmul.mubr.bf16.gmra.mrb[92].mxu1 %v7138_v20 }
 0x21f   : > { %5839 = vmatprep.mubr.msk.bf16.mxu1 %vm1358_vm2, %v7140_v21  ;;  %v7176_v21 = vld [vmem:[%s8846_s4 + $0x220] ss:$8 sps:$4 sm:$0xff]  }
 0x226   : > { %1710 = vmatmul.mubr.bf16.gmra.mrb[96].mxu1 %v7142_v23 }
 0x227   : > { %5840 = vmatprep.mubr.msk.bf16.mxu1 %vm1358_vm2, %v7143_v24  ;;  %v7177_v24 = vld [vmem:[%s8846_s4 + $0x234] ss:$8 sps:$4 sm:$0xff]  }
 0x22e   : > { %1718 = vmatmul.mubr.bf16.gmra.mrb[100].mxu1 %v7145_v25 }
 0x22f   : > { %5841 = vmatprep.mubr.msk.bf16.mxu1 %vm1358_vm2, %v7146_v26  ;;  %v7184_v26 = vld [vmem:[%s8847_s5 + $0x38] sm:$0xff]  }
 0x236   : > { %1726 = vmatmul.mubr.bf16.gmra.mrb[104].mxu1 %v7148_v27 }
 0x237   : > { %5842 = vmatprep.mubr.msk.bf16.mxu1 %vm1358_vm2, %v7149_v28 }
 0x239   : > { %v1519_v29 = vpop.f32.mrb[0].mxu1 }
 0x23a   : > { %v1521_v30 = vpop.f32.mrb[1].mxu1 }
 0x23b   : > { %v1522_v32 = vpop.f32.mrb[2].mxu1  ;;  %v7179_v30 = vld [vmem:[%s8846_s4 + $0x230] ss:$8 sps:$4 sm:$0xff]  }
 0x23c   : > { %v1838_v34 = vpack.c.bf16 %v1522_v32, %v1519_v29  ;;  %v1524_v35 = vpop.f32.mrb[3].mxu1  ;;  %v7181_v32 = vld [vmem:[%s8846_s4 + $0x244] ss:$8 sps:$4 sm:$0xff]  }
 0x23e   : > { %1734 = vmatmul.mubr.bf16.gmra.mrb[108].mxu1 %v7151_v31 }
 0x23f   : > { %5843 = vmatprep.mubr.msk.bf16.mxu1 %vm1358_vm2, %v7152_v33 }
 0x241   : > { %v1527_v36 = vpop.f32.mrb[4].mxu1 }
 0x242   : > { %v1529_v22 = vpop.f32.mrb[5].mxu1 }
 0x243   : > { %v1530_v18 = vpop.f32.mrb[6].mxu1 }
 0x244   : > { %v1839_v39 = vpack.c.bf16 %v1530_v18, %v1527_v36  ;;  %v1532_v40 = vpop.f32.mrb[7].mxu1 }
 0x246   : > { %1742 = vmatmul.mubr.bf16.gmra.mrb[112].mxu1 %v7154_v37  ;;  %v7183_v37 = vld [vmem:[%s8846_s4 + $0x240] ss:$8 sps:$4 sm:$0xff]  }
 0x247   : > { %5844 = vmatprep.mubr.msk.bf16.mxu1 %vm1358_vm2, %v7155_v38  ;;  %v7185_v38 = vld [vmem:[%s8846_s4 + $0x254] ss:$8 sps:$4 sm:$0xff]  }
 0x249   : > { %v7795_v41 = vpop.f32.mrb[8].mxu1 }
 0x24a   : > { %v1537_v42 = vpop.f32.mrb[9].mxu1  ;;  %v1840_v10 = vpack.c.bf16 %v7795_v41, %v7795_v41  ;;  %v7191_v41 = vld [vmem:[%s8847_s5 + $0x40] sm:$0xff]  }
 0x24b   : > { %v1538_v44 = vpop.f32.mrb[10].mxu1 }
 0x24c   : > { %v1540_v46 = vpop.f32.mrb[11].mxu1 }
 0x24e   : > { %1750 = vmatmul.mubr.bf16.gmra.mrb[116].mxu1 %v7157_v43  ;;  %v7187_v43 = vld [vmem:[%s8846_s4 + $0x250] ss:$8 sps:$4 sm:$0xff]  }
 0x24f   : > { %5845 = vmatprep.mubr.msk.bf16.mxu1 %vm1358_vm2, %v7158_v45  ;;  %v7188_v45 = vld [vmem:[%s8846_s4 + $0x264] ss:$8 sps:$4 sm:$0xff]  }
 0x251   : > { %v1543_v47 = vpop.f32.mrb[12].mxu1 }
 0x252   : > { %v1845_v49 = vpack.c.bf16 %v1543_v47, %v1538_v44  ;;  %v1545_v50 = vpop.f32.mrb[13].mxu1 }
 0x253   : > { %v7810_v52 = vpop.f32.mrb[14].mxu1 }
 0x254   : > { %v1548_v54 = vpop.f32.mrb[15].mxu1  ;;  %6412 = vmatmul.mubr.msk.bf16.vlgmr.msra.gmra.mrb[60].mxu0 %vm1864_vm4, %v1845_v49 }
 0x255   : > { %6424 = vmatpush3.bf16.msra.mxu0 %v7160_v48  ;;  %6427 = vmatprep.mubr.msk.bf16.mxu0 %vm7345_vm0, %v7344_v1  ;;  %v7195_v48 = vld [vmem:[%s8847_s5 + $0x48] sm:$0xff]   ;;  %v7192_v54 = vld [vmem:[%s8846_s4 + $0x274] ss:$8 sps:$4 sm:$0xff]  }
 0x256   : > { %1758 = vmatmul.mubr.bf16.gmra.mrb[120].mxu1 %v7161_v51  ;;  %6425 = vmatprep.subr.bf16.mxu0 %v7344_v1  ;;  %v7190_v51 = vld [vmem:[%s8846_s4 + $0x260] ss:$8 sps:$4 sm:$0xff]  }
 0x257   : > { %5846 = vmatprep.mubr.msk.bf16.mxu1 %vm1358_vm2, %v7163_v53 }
 0x259   : > { %v7823_v56 = vpop.f32.mrb[16].mxu1  ;;  %6426 = vmatpush3.bf16.msra.mxu0 %v7162_v55 }
 0x25a   : > { %v1846_v58 = vpack.c.bf16 %v7823_v56, %v7810_v52  ;;  %v1553_v59 = vpop.f32.mrb[17].mxu1  ;;  %6439 = vmatprep.subr.bf16.mxu0 %v7344_v1 }
 0x25b   : > { %v7834_v61 = vpop.f32.mrb[18].mxu1 }
 0x25c   : > { %v1556_v63 = vpop.f32.mrb[19].mxu1  ;;  %6428 = vmatmul.mubr.msk.bf16.vlgmr.msra.gmra.mrb[64].mxu0 %vm1864_vm4, %v1838_v34  ;;  %v1847_v56 = vpack.c.bf16 %v7834_v61, %v7834_v61 }
 0x25d   : > { %6431 = vmatprep.mubr.msk.bf16.mxu0 %vm7345_vm0, %v7344_v1  ;;  %6440 = vmatpush3.bf16.msra.mxu0 %v7169_v57  ;;  %v7194_v63 = vld [vmem:[%s8846_s4 + $0x270] ss:$8 sps:$4 sm:$0xff]  }
 0x25e   : > { %1766 = vmatmul.mubr.bf16.gmra.mrb[124].mxu1 %v7165_v60  ;;  %6441 = vmatprep.subr.bf16.mxu0 %v7344_v1 }
 0x25f   : > { %5847 = vmatprep.mubr.msk.bf16.mxu1 %vm1358_vm2, %v7166_v62 }
 0x261   : > { %v1559_v2 = vpop.f32.mrb[20].mxu1  ;;  %6442 = vmatpush3.bf16.msra.mxu0 %v7173_v0 }
 0x262   : > { %v1561_v3 = vpop.f32.mrb[21].mxu1  ;;  %6455 = vmatprep.subr.bf16.mxu0 %v7344_v1 }
 0x263   : > { %v1562_v5 = vpop.f32.mrb[22].mxu1 }
 0x264   : > { %v2007_v7 = vpack.c.bf16 %v1562_v5, %v1559_v2  ;;  %v1564_v8 = vpop.f32.mrb[23].mxu1  ;;  %6432 = vmatmul.mubr.msk.bf16.gmra.mrb[68].mxu0 %vm1864_vm4, %v1839_v39 }
 0x265   : > { %6435 = vmatprep.mubr.msk.bf16.mxu0 %vm7345_vm0, %v7344_v1  ;;  %v7205_v8 = vld [vmem:[%s8847_s5 + $0xb0] sm:$0xff]  }
 0x266   : > { %1774 = vmatmul.mubr.bf16.gmra.mrb[128].mxu1 %v7168_v4  ;;  %v7196_v4 = vld [vmem:[%s8847_s5 + $0x50] sm:$0xff]  }
 0x267   : > { %5848 = vmatprep.mubr.msk.bf16.mxu1 %vm1358_vm2, %v7170_v6 }
 0x269   : > { %v1567_v9 = vpop.f32.mrb[24].mxu1 }
 0x26a   : > { %v1569_v11 = vpop.f32.mrb[25].mxu1 }
 0x26b   : > { %v1570_v13 = vpop.f32.mrb[26].mxu1  ;;  %v7207_v11 = vld [vmem:[%s8847_s5 + $0xb8] sm:$0xff]  }
 0x26c   : > { %v2008_v15 = vpack.c.bf16 %v1570_v13, %v1567_v9  ;;  %v1572_v16 = vpop.f32.mrb[27].mxu1  ;;  %6436 = vmatmul.mubr.msk.bf16.gmra.mrb[72].mxu0 %vm1864_vm4, %v1840_v10  ;;  %v7197_v10 = vld [vmem:[%s8847_s5 + $0x58] sm:$0xff]  }
 0x26d   : > { %6443 = vmatprep.mubr.msk.bf16.mxu0 %vm7345_vm0, %v7344_v1 }
 0x26e   : > { %1782 = vmatmul.mubr.bf16.gmra.mrb[132].mxu1 %v7172_v12 }
 0x26f   : > { %5849 = vmatprep.mubr.msk.bf16.mxu1 %vm1358_vm2, %v7174_v14 }
 0x271   : > { %v1575_v17 = vpop.f32.mrb[28].mxu1 }
 0x272   : > { %v1577_v20 = vpop.f32.mrb[29].mxu1  ;;  %v2009_v35 = vpack.c.bf16 %v1575_v17, %v1575_v17 }
 0x273   : > { %v1578_v23 = vpop.f32.mrb[30].mxu1 }
 0x274   : > { %v1580_v25 = vpop.f32.mrb[31].mxu1  ;;  %6444 = vmatmul.mubr.msk.bf16.vlgmr.msra.gmra.mrb[76].mxu0 %vm1864_vm4, %v2007_v7 }
 0x275   : > { %6447 = vmatprep.mubr.msk.bf16.mxu0 %vm7345_vm0, %v7344_v1  ;;  %6456 = vmatpush3.bf16.msra.mxu0 %v7180_v19 }
 0x276   : > { %1790 = vmatmul.mubr.bf16.gmra.mrb[136].mxu1 %v7176_v21  ;;  %6457 = vmatprep.subr.bf16.mxu0 %v7344_v1 }
 0x277   : > { %5850 = vmatprep.mubr.msk.bf16.mxu1 %vm1358_vm2, %v7177_v24 }
 0x279   : > { %v1583_v27 = vpop.f32.mrb[32].mxu1  ;;  %6458 = vmatpush3.bf16.msra.mxu0 %v7184_v26 }
 0x27a   : > { %v2096_v28 = vpack.c.bf16 %v1583_v27, %v1578_v23  ;;  %v1585_v29 = vpop.f32.mrb[33].mxu1  ;;  %6471 = vmatprep.subr.bf16.mxu0 %v7344_v1  ;;  %v7198_v23 = vld [vmem:[%s8847_s5 + $0x60] sm:$0xff]  }
 0x27b   : > { %v1586_v31 = vpop.f32.mrb[34].mxu1 }
 0x27c   : > { %v1588_v33 = vpop.f32.mrb[35].mxu1  ;;  %6448 = vmatmul.mubr.msk.bf16.gmra.mrb[80].mxu0 %vm1864_vm4, %v2008_v15 }
 0x27d   : > { %6451 = vmatprep.mubr.msk.bf16.mxu0 %vm7345_vm0, %v7344_v1 }
 0x27e   : > { %1798 = vmatmul.mubr.bf16.gmra.mrb[140].mxu1 %v7179_v30 }
 0x27f   : > { %5851 = vmatprep.mubr.msk.bf16.mxu1 %vm1358_vm2, %v7181_v32 }
 0x281   : > { %v1591_v34 = vpop.f32.mrb[36].mxu1 }
 0x282   : > { %v2097_v36 = vpack.c.bf16 %v1591_v34, %v1586_v31  ;;  %v1593_v22 = vpop.f32.mrb[37].mxu1 }
 0x283   : > { %v1594_v18 = vpop.f32.mrb[38].mxu1 }
 0x284   : > { %v1596_v39 = vpop.f32.mrb[39].mxu1  ;;  %6452 = vmatmul.mubr.msk.bf16.gmra.mrb[84].mxu0 %vm1864_vm4, %v2009_v35  ;;  %v2098_v60 = vpack.c.bf16 %v1594_v18, %v1594_v18 }
 0x285   : > { %6459 = vmatprep.mubr.msk.bf16.mxu0 %vm7345_vm0, %v7344_v1 }
 0x286   : > { %1806 = vmatmul.mubr.bf16.gmra.mrb[144].mxu1 %v7183_v37 }
 0x287   : > { %5852 = vmatprep.mubr.msk.bf16.mxu1 %vm1358_vm2, %v7185_v38  ;;  %v7200_v38 = vld [vmem:[%s8847_s5 + $0x70] sm:$0xff]  }
 0x289   : > { %v1599_v40 = vpop.f32.mrb[40].mxu1 }
 0x28a   : > { %v1601_v42 = vpop.f32.mrb[41].mxu1 }
 0x28b   : > { %v1602_v44 = vpop.f32.mrb[42].mxu1 }
 0x28c   : > { %v2185_v46 = vpack.c.bf16 %v1602_v44, %v1599_v40  ;;  %v1604_v47 = vpop.f32.mrb[43].mxu1  ;;  %6460 = vmatmul.mubr.msk.bf16.vlgmr.msra.gmra.mrb[88].mxu0 %vm1864_vm4, %v2096_v28  ;;  %v7199_v28 = vld [vmem:[%s8847_s5 + $0x68] sm:$0xff]  }
 0x28d   : > { %6463 = vmatprep.mubr.msk.bf16.mxu0 %vm7345_vm0, %v7344_v1  ;;  %6472 = vmatpush3.bf16.msra.mxu0 %v7191_v41 }
 0x28e   : > { %1814 = vmatmul.mubr.bf16.gmra.mrb[148].mxu1 %v7187_v43  ;;  %6473 = vmatprep.subr.bf16.mxu0 %v7344_v1  ;;  %v7201_v43 = vld [vmem:[%s8847_s5 + $0x78] sm:$0xff]  }
 0x28f   : > { %5853 = vmatprep.mubr.msk.bf16.mxu1 %vm1358_vm2, %v7188_v45 }
 0x291   : > { %v1607_v49 = vpop.f32.mrb[44].mxu1  ;;  %6474 = vmatpush3.bf16.msra.mxu0 %v7195_v48 }
 0x292   : > { %v1609_v50 = vpop.f32.mrb[45].mxu1  ;;  %6487 = vmatprep.subr.bf16.mxu0 %v7344_v1 }
 0x293   : > { %v1610_v53 = vpop.f32.mrb[46].mxu1 }
 0x294   : > { %v2186_v55 = vpack.c.bf16 %v1610_v53, %v1607_v49  ;;  %v1612_v57 = vpop.f32.mrb[47].mxu1  ;;  %6464 = vmatmul.mubr.msk.bf16.gmra.mrb[92].mxu0 %vm1864_vm4, %v2097_v36 }
 0x295   : > { %6467 = vmatprep.mubr.msk.bf16.mxu0 %vm7345_vm0, %v7344_v1 }
 0x296   : > { %1822 = vmatmul.mubr.bf16.gmra.mrb[152].mxu1 %v7190_v51 }
 0x297   : > { %5854 = vmatprep.mubr.msk.bf16.mxu1 %vm1358_vm2, %v7192_v54 }
 0x299   : > { %v1615_v59 = vpop.f32.mrb[48].mxu1 }
 0x29a   : > { %v1617_v62 = vpop.f32.mrb[49].mxu1  ;;  %v2187_v16 = vpack.c.bf16 %v1615_v59, %v1615_v59  ;;  %v7202_v59 = vld [vmem:[%s8847_s5 + $0x80] sm:$0xff]  }
 0x29b   : > { %v1618_v0 = vpop.f32.mrb[50].mxu1 }
 0x29c   : > { %v1620_v2 = vpop.f32.mrb[51].mxu1  ;;  %6468 = vmatmul.mubr.msk.bf16.gmra.mrb[96].mxu0 %vm1864_vm4, %v2098_v60 }
 0x29d   : > { %6475 = vmatprep.mubr.msk.bf16.mxu0 %vm7345_vm0, %v7344_v1 }
 0x29e   : > { %1830 = vmatmul.mubr.bf16.gmra.mrb[156].mxu1 %v7194_v63 }
 0x29f   : > { %6415 = vmatprep.mubr.msk.bf16.mxu1 %vm7345_vm0, %v7344_v1 }
 0x2a1   : > { %v1623_v3 = vpop.f32.mrb[52].mxu1 }
 0x2a2   : > { %v2274_v5 = vpack.c.bf16 %v1623_v3, %v1618_v0  ;;  %v1625_v6 = vpop.f32.mrb[53].mxu1  ;;  %v7203_v0 = vld [vmem:[%s8847_s5 + $0x88] sm:$0xff]  }
 0x2a3   : > { %v1626_v7 = vpop.f32.mrb[54].mxu1 }
 0x2a4   : > { %v1628_v9 = vpop.f32.mrb[55].mxu1  ;;  %6476 = vmatmul.mubr.msk.bf16.vlgmr.msra.gmra.mrb[100].mxu0 %vm1864_vm4, %v2185_v46 }
 0x2a5   : > { %6479 = vmatprep.mubr.msk.bf16.mxu0 %vm7345_vm0, %v7344_v1  ;;  %6488 = vmatpush3.bf16.msra.mxu0 %v7196_v4 }
 0x2a6   : > { %6416 = vmatmul.mubr.msk.bf16.vlgmr.msra.gmra.mrb[160].mxu1 %vm1864_vm4, %v1846_v58  ;;  %6489 = vmatprep.subr.bf16.mxu0 %v7344_v1 }
 0x2a7   : > { %6419 = vmatprep.mubr.msk.bf16.mxu1 %vm7345_vm0, %v7344_v1  ;;  %6584 = vmatpush3.bf16.msra.mxu1 %v7205_v8 }
 0x2a8   : > { %6585 = vmatprep.subr.bf16.mxu1 %v7344_v1 }
 0x2a9   : > { %v1631_v12 = vpop.f32.mrb[56].mxu1  ;;  %6490 = vmatpush3.bf16.msra.mxu0 %v7197_v10 }
 0x2aa   : > { %v2275_v13 = vpack.c.bf16 %v1631_v12, %v1626_v7  ;;  %v1633_v14 = vpop.f32.mrb[57].mxu1  ;;  %6503 = vmatprep.subr.bf16.mxu0 %v7344_v1 }
 0x2ab   : > { %v1634_v52 = vpop.f32.mrb[58].mxu1  ;;  %6586 = vmatpush3.bf16.msra.mxu1 %v7207_v11  ;;  %v7204_v14 = vld [vmem:[%s8847_s5 + $0x90] sm:$0xff]  }
 0x2ac   : > { %v1636_v58 = vpop.f32.mrb[59].mxu1  ;;  %6480 = vmatmul.mubr.msk.bf16.gmra.mrb[104].mxu0 %vm1864_vm4, %v2186_v55  ;;  %6615 = vmatprep.subr.bf16.mxu1 %v7344_v1  ;;  %v2276_v34 = vpack.c.bf16 %v1634_v52, %v1634_v52 }
 0x2ad   : > { %6483 = vmatprep.mubr.msk.bf16.mxu0 %vm7345_vm0, %v7344_v1 }
 0x2ae   : > { %6420 = vmatmul.mubr.msk.bf16.gmra.mrb[164].mxu1 %vm1864_vm4, %v1847_v56 }
 0x2af   : > { %6587 = vmatprep.mubr.msk.bf16.mxu1 %vm7345_vm0, %v7344_v1 }
 0x2b1   : > { %v1639_v15 = vpop.f32.mrb[60].mxu1 }
 0x2b2   : > { %v1641_v17 = vpop.f32.mrb[61].mxu1 }
 0x2b3   : > { %v1642_v19 = vpop.f32.mrb[62].mxu1 }
 0x2b4   : > { %v2363_v20 = vpack.c.bf16 %v1642_v19, %v1639_v15  ;;  %v1644_v21 = vpop.f32.mrb[63].mxu1  ;;  %6484 = vmatmul.mubr.msk.bf16.gmra.mrb[108].mxu0 %vm1864_vm4, %v2187_v16  ;;  %v7206_v16 = vld [vmem:[%s8847_s5 + $0x98] sm:$0xff]  }
 0x2b5   : > { %6491 = vmatprep.mubr.msk.bf16.mxu0 %vm7345_vm0, %v7344_v1 }
 0x2b9   : > { %v1647_v61 = vpop.f32.mrb[64].mxu1 }
 0x2ba   : > { %v1649_v24 = vpop.f32.mrb[65].mxu1 }
 0x2bb   : > { %v1650_v25 = vpop.f32.mrb[66].mxu1 }
 0x2bc   : > { %v2364_v26 = vpack.c.bf16 %v1650_v25, %v1647_v61  ;;  %v1652_v27 = vpop.f32.mrb[67].mxu1  ;;  %6492 = vmatmul.mubr.msk.bf16.vlgmr.msra.gmra.mrb[112].mxu0 %vm1864_vm4, %v2274_v5 }
 0x2bd   : > { %6495 = vmatprep.mubr.msk.bf16.mxu0 %vm7345_vm0, %v7344_v1  ;;  %6504 = vmatpush3.bf16.msra.mxu0 %v7198_v23 }
 0x2be   : > { %6505 = vmatprep.subr.bf16.mxu0 %v7344_v1 }
 0x2c1   : > { %v1655_v29 = vpop.f32.mrb[68].mxu1  ;;  %6506 = vmatpush3.bf16.msra.mxu0 %v7199_v28 }
 0x2c2   : > { %v1657_v30 = vpop.f32.mrb[69].mxu1  ;;  %6519 = vmatprep.subr.bf16.mxu0 %v7344_v1  ;;  %v2365_v50 = vpack.c.bf16 %v1655_v29, %v1655_v29 }
 0x2c3   : > { %v1658_v31 = vpop.f32.mrb[70].mxu1 }
 0x2c4   : > { %v1660_v32 = vpop.f32.mrb[71].mxu1  ;;  %6496 = vmatmul.mubr.msk.bf16.gmra.mrb[116].mxu0 %vm1864_vm4, %v2275_v13 }
 0x2c5   : > { %6499 = vmatprep.mubr.msk.bf16.mxu0 %vm7345_vm0, %v7344_v1  ;;  %v7210_v32 = vld [vmem:[%s8847_s5 + $0xd0] sm:$0xff]  }
 0x2c9   : > { %v1663_v33 = vpop.f32.mrb[72].mxu1 }
 0x2ca   : > { %v2452_v35 = vpack.c.bf16 %v1663_v33, %v1658_v31  ;;  %v1665_v36 = vpop.f32.mrb[73].mxu1  ;;  %v7208_v31 = vld [vmem:[%s8847_s5 + $0xa0] sm:$0xff]  }
 0x2cb   : > { %v1666_v22 = vpop.f32.mrb[74].mxu1  ;;  %v7212_v36 = vld [vmem:[%s8847_s5 + $0xd8] sm:$0xff]  }
 0x2cc   : > { %v1668_v37 = vpop.f32.mrb[75].mxu1  ;;  %6500 = vmatmul.mubr.msk.bf16.gmra.mrb[120].mxu0 %vm1864_vm4, %v2276_v34 }
 0x2cd   : > { %6507 = vmatprep.mubr.msk.bf16.mxu0 %vm7345_vm0, %v7344_v1 }
 0x2d1   : > { %v1671_v18 = vpop.f32.mrb[76].mxu1 }
 0x2d2   : > { %v2453_v39 = vpack.c.bf16 %v1671_v18, %v1666_v22  ;;  %v1673_v40 = vpop.f32.mrb[77].mxu1 }
 0x2d3   : > { %v1674_v41 = vpop.f32.mrb[78].mxu1 }
 0x2d4   : > { %v1676_v42 = vpop.f32.mrb[79].mxu1  ;;  %6508 = vmatmul.mubr.msk.bf16.vlgmr.msra.gmra.mrb[124].mxu0 %vm1864_vm4, %v2363_v20  ;;  %v2454_v8 = vpack.c.bf16 %v1674_v41, %v1674_v41 }
 0x2d5   : > { %6511 = vmatprep.mubr.msk.bf16.mxu0 %vm7345_vm0, %v7344_v1  ;;  %6520 = vmatpush3.bf16.msra.mxu0 %v7200_v38 }
 0x2d6   : > { %6521 = vmatprep.subr.bf16.mxu0 %v7344_v1 }
 0x2d9   : > { %v1679_v44 = vpop.f32.mrb[80].mxu1  ;;  %6522 = vmatpush3.bf16.msra.mxu0 %v7201_v43 }
 0x2da   : > { %v1681_v45 = vpop.f32.mrb[81].mxu1  ;;  %6535 = vmatprep.subr.bf16.mxu0 %v7344_v1 }
 0x2db   : > { %v1682_v46 = vpop.f32.mrb[82].mxu1 }
 0x2dc   : > { %v2541_v47 = vpack.c.bf16 %v1682_v46, %v1679_v44  ;;  %v1684_v48 = vpop.f32.mrb[83].mxu1  ;;  %6512 = vmatmul.mubr.msk.bf16.gmra.mrb[128].mxu0 %vm1864_vm4, %v2364_v26 }
 0x2dd   : > { %6515 = vmatprep.mubr.msk.bf16.mxu0 %vm7345_vm0, %v7344_v1 }
 0x2e1   : > { %v1687_v49 = vpop.f32.mrb[84].mxu1 }
 0x2e2   : > { %v1689_v51 = vpop.f32.mrb[85].mxu1 }
 0x2e3   : > { %v1690_v53 = vpop.f32.mrb[86].mxu1 }
 0x2e4   : > { %v2542_v54 = vpack.c.bf16 %v1690_v53, %v1687_v49  ;;  %v1692_v55 = vpop.f32.mrb[87].mxu1  ;;  %6516 = vmatmul.mubr.msk.bf16.gmra.mrb[132].mxu0 %vm1864_vm4, %v2365_v50 }
 0x2e5   : > { %6523 = vmatprep.mubr.msk.bf16.mxu0 %vm7345_vm0, %v7344_v1 }
 0x2e9   : > { %v1695_v57 = vpop.f32.mrb[88].mxu1 }
 0x2ea   : > { %v1697_v60 = vpop.f32.mrb[89].mxu1  ;;  %v2543_v24 = vpack.c.bf16 %v1695_v57, %v1695_v57 }
 0x2eb   : > { %v1698_v62 = vpop.f32.mrb[90].mxu1 }
 0x2ec   : > { %v1700_v63 = vpop.f32.mrb[91].mxu1  ;;  %6524 = vmatmul.mubr.msk.bf16.vlgmr.msra.gmra.mrb[136].mxu0 %vm1864_vm4, %v2452_v35  ;;  %v7209_v35 = vld [vmem:[%s8847_s5 + $0xa8] sm:$0xff]  }
 0x2ed   : > { %6527 = vmatprep.mubr.msk.bf16.mxu0 %vm7345_vm0, %v7344_v1  ;;  %6536 = vmatpush3.bf16.msra.mxu0 %v7202_v59  ;;  %v7211_v59 = vld [vmem:[%s8847_s5 + $0xc0] sm:$0xff]  }
 0x2ee   : > { %6537 = vmatprep.subr.bf16.mxu0 %v7344_v1 }
 0x2f1   : > { %v1703_v2 = vpop.f32.mrb[92].mxu1  ;;  %6538 = vmatpush3.bf16.msra.mxu0 %v7203_v0 }
 0x2f2   : > { %v2630_v3 = vpack.c.bf16 %v1703_v2, %v1698_v62  ;;  %v1705_v4 = vpop.f32.mrb[93].mxu1  ;;  %6551 = vmatprep.subr.bf16.mxu0 %v7344_v1 }
 0x2f3   : > { %v8025_v5 = vpop.f32.mrb[94].mxu1  ;;  %v7213_v4 = vld [vmem:[%s8847_s5 + $0xc8] sm:$0xff]  }
 0x2f4   : > { %v1708_v6 = vpop.f32.mrb[95].mxu1  ;;  %6528 = vmatmul.mubr.msk.bf16.gmra.mrb[140].mxu0 %vm1864_vm4, %v2453_v39 }
 0x2f5   : > { %6531 = vmatprep.mubr.msk.bf16.mxu0 %vm7345_vm0, %v7344_v1 }
 0x2f9   : > { %v1711_v7 = vpop.f32.mrb[96].mxu1 }
 0x2fa   : > { %v2631_v9 = vpack.c.bf16 %v1711_v7, %v8025_v5  ;;  %v1713_v10 = vpop.f32.mrb[97].mxu1 }
 0x2fb   : > { %v8031_v11 = vpop.f32.mrb[98].mxu1 }
 0x2fc   : > { %v1716_v12 = vpop.f32.mrb[99].mxu1  ;;  %6532 = vmatmul.mubr.msk.bf16.gmra.mrb[144].mxu0 %vm1864_vm4, %v2454_v8  ;;  %v2632_v44 = vpack.c.bf16 %v8031_v11, %v8031_v11 }
 0x2fd   : > { %6539 = vmatprep.mubr.msk.bf16.mxu0 %vm7345_vm0, %v7344_v1 }
 0x301   : > { %v8036_v13 = vpop.f32.mrb[100].mxu1 }
 0x302   : > { %v1721_v52 = vpop.f32.mrb[101].mxu1 }
 0x303   : > { %v8041_v56 = vpop.f32.mrb[102].mxu1 }
 0x304   : > { %v2719_v58 = vpack.c.bf16 %v8041_v56, %v8036_v13  ;;  %v1724_v15 = vpop.f32.mrb[103].mxu1  ;;  %6540 = vmatmul.mubr.msk.bf16.vlgmr.msra.gmra.mrb[148].mxu0 %vm1864_vm4, %v2541_v47 }
 0x305   : > { %6543 = vmatprep.mubr.msk.bf16.mxu0 %vm7345_vm0, %v7344_v1  ;;  %6552 = vmatpush3.bf16.msra.mxu0 %v7204_v14 }
 0x306   : > { %6553 = vmatprep.subr.bf16.mxu0 %v7344_v1 }
 0x309   : > { %v8052_v17 = vpop.f32.mrb[104].mxu1  ;;  %6554 = vmatpush3.bf16.msra.mxu0 %v7206_v16 }
 0x30a   : > { %v1729_v19 = vpop.f32.mrb[105].mxu1  ;;  %6567 = vmatprep.subr.bf16.mxu0 %v7344_v1 }
 0x30b   : > { %v8055_v20 = vpop.f32.mrb[106].mxu1 }
 0x30c   : > { %v2720_v21 = vpack.c.bf16 %v8055_v20, %v8052_v17  ;;  %v1732_v61 = vpop.f32.mrb[107].mxu1  ;;  %6544 = vmatmul.mubr.msk.bf16.gmra.mrb[152].mxu0 %vm1864_vm4, %v2542_v54  ;;  %v7215_v17 = vld [vmem:[%s8847_s5 + $0xf0] sm:$0xff]  }
 0x30d   : > { %6547 = vmatprep.mubr.msk.bf16.mxu0 %vm7345_vm0, %v7344_v1  ;;  %v7217_v61 = vld [vmem:[%s8847_s5 + $0xf8] sm:$0xff]  }
 0x311   : > { %v8062_v23 = vpop.f32.mrb[108].mxu1 }
 0x312   : > { %v1737_v25 = vpop.f32.mrb[109].mxu1 }
 0x313   : > { %v1738_v26 = vpop.f32.mrb[110].mxu1 }
 0x314   : > { %v1740_v27 = vpop.f32.mrb[111].mxu1  ;;  %6548 = vmatmul.mubr.msk.bf16.gmra.mrb[156].mxu0 %vm1864_vm4, %v2543_v24 }
 0x315   : > { %6555 = vmatprep.mubr.msk.bf16.mxu0 %vm7345_vm0, %v7344_v1 }
 0x319   : > { %v1743_v28 = vpop.f32.mrb[112].mxu1 }
 0x31a   : > { %v2808_v29 = vpack.c.bf16 %v1743_v28, %v1738_v26  ;;  %v1745_v30 = vpop.f32.mrb[113].mxu1 }
 0x31b   : > { %v1746_v33 = vpop.f32.mrb[114].mxu1 }
 0x31c   : > { %v1748_v34 = vpop.f32.mrb[115].mxu1  ;;  %6556 = vmatmul.mubr.msk.bf16.vlgmr.msra.gmra.mrb[160].mxu0 %vm1864_vm4, %v2630_v3  ;;  %6588 = vmatmul.mubr.msk.bf16.vlgmr.msra.gmra.mrb[168].mxu1 %vm1864_vm4, %v2808_v29 }
 0x31d   : > { %6559 = vmatprep.mubr.msk.bf16.mxu0 %vm7345_vm0, %v7344_v1  ;;  %6591 = vmatprep.mubr.msk.bf16.mxu1 %vm7345_vm0, %v7344_v1 }
 0x31e   : > { %6568 = vmatpush3.bf16.msra.mxu0 %v7208_v31  ;;  %6616 = vmatpush3.bf16.msra.mxu1 %v7210_v32  ;;  %v7214_v32 = vld [vmem:[%s8847_s5 + $0xe0] sm:$0xff]  }
 0x31f   : > { %6569 = vmatprep.subr.bf16.mxu0 %v7344_v1  ;;  %6617 = vmatprep.subr.bf16.mxu1 %v7344_v1 }
 0x321   : > { %v1751_v22 = vpop.f32.mrb[116].mxu1 }
 0x322   : > { %v2809_v37 = vpack.c.bf16 %v1751_v22, %v1746_v33  ;;  %v1753_v18 = vpop.f32.mrb[117].mxu1  ;;  %6570 = vmatpush3.bf16.msra.mxu0 %v7209_v35  ;;  %6618 = vmatpush3.bf16.msra.mxu1 %v7212_v36  ;;  %v7216_v35 = vld [vmem:[%s8847_s5 + $0xe8] sm:$0xff]  }
 0x323   : > { %v1754_v38 = vpop.f32.mrb[118].mxu1  ;;  %6599 = vmatprep.subr.bf16.mxu0 %v7344_v1  ;;  %6647 = vmatprep.subr.bf16.mxu1 %v7344_v1 }
 0x324   : > { %v1756_v39 = vpop.f32.mrb[119].mxu1  ;;  %6560 = vmatmul.mubr.msk.bf16.gmra.mrb[164].mxu0 %vm1864_vm4, %v2631_v9  ;;  %6592 = vmatmul.mubr.msk.bf16.gmra.mrb[172].mxu1 %vm1864_vm4, %v2809_v37  ;;  %v2810_v45 = vpack.c.bf16 %v1754_v38, %v1754_v38 }
 0x325   : > { %6563 = vmatprep.mubr.msk.bf16.mxu0 %vm7345_vm0, %v7344_v1  ;;  %6595 = vmatprep.mubr.msk.bf16.mxu1 %vm7345_vm0, %v7344_v1 }
 0x327   : > { %v1908_v40 = vpop.f32.mrb[60].mxu0 }
 0x328   : > { %v6413_v41 = vpop.f32.mrb[61].mxu0 }
 0x329   : > { %v8095_v42 = vpop.f32.mrb[120].mxu1  ;;  %v1911_v43 = vpop.f32.mrb[62].mxu0 }
 0x32a   : > { %v1761_v46 = vpop.f32.mrb[121].mxu1  ;;  %v6414_v47 = vpop.f32.mrb[63].mxu0 }
 0x32b   : > { %v8099_v48 = vpop.f32.mrb[122].mxu1 }
 0x32c   : > { %v2897_v49 = vpack.c.bf16 %v8099_v48, %v8095_v42  ;;  %v1764_v50 = vpop.f32.mrb[123].mxu1  ;;  %6564 = vmatmul.mubr.msk.bf16.gmra.mrb[168].mxu0 %vm1864_vm4, %v2632_v44  ;;  %6596 = vmatmul.mubr.msk.bf16.gmra.mrb[176].mxu1 %vm1864_vm4, %v2810_v45 }
 0x32d   : > { %6571 = vmatprep.mubr.msk.bf16.mxu0 %vm7345_vm0, %v7344_v1  ;;  %6619 = vmatprep.mubr.msk.bf16.mxu1 %vm7345_vm0, %v7344_v1 }
 0x32f   : > { %v1985_v51 = vpop.f32.mrb[64].mxu0 }
 0x330   : > { %v1986_v53 = vadd.f32 %v1985_v51, %v1908_v40  ;;  %v6429_v54 = vpop.f32.mrb[65].mxu0 }
 0x331   : > { %v8109_v55 = vpop.f32.mrb[124].mxu1  ;;  %v1988_v57 = vpop.f32.mrb[66].mxu0 }
 0x332   : > { %v1989_v60 = vadd.f32 %v1988_v57, %v1911_v43  ;;  %v1769_v62 = vpop.f32.mrb[125].mxu1  ;;  %v6430_v63 = vpop.f32.mrb[67].mxu0 }
 0x333   : > { %v8114_v0 = vpop.f32.mrb[126].mxu1 }
 0x334   : > { %v2898_v2 = vpack.c.bf16 %v8114_v0, %v8109_v55  ;;  %v1772_v3 = vpop.f32.mrb[127].mxu1  ;;  %6572 = vmatmul.mubr.msk.bf16.vlgmr.msra.gmra.mrb[172].mxu0 %vm1864_vm4, %v2719_v58  ;;  %v2721_v58 = vpack.c.bf16 %v8062_v23, %v8062_v23 }
 0x335   : > { %6575 = vmatprep.mubr.msk.bf16.mxu0 %vm7345_vm0, %v7344_v1  ;;  %6600 = vmatpush3.bf16.msra.mxu0 %v7211_v59 }
 0x336   : > { %6601 = vmatprep.subr.bf16.mxu0 %v7344_v1 }
 0x337   : > { %v8128_v5 = vpop.f32.mrb[68].mxu0 }
 0x338   : > { %v6433_v6 = vpop.f32.mrb[69].mxu0 }
 0x339   : > { %v8130_v7 = vpop.f32.mrb[128].mxu1  ;;  %v8132_v8 = vpop.f32.mrb[70].mxu0  ;;  %6602 = vmatpush3.bf16.msra.mxu0 %v7213_v4 }
 0x33a   : > { %v1777_v9 = vpop.f32.mrb[129].mxu1  ;;  %v6434_v10 = vpop.f32.mrb[71].mxu0  ;;  %6631 = vmatprep.subr.bf16.mxu0 %v7344_v1  ;;  %v2899_v48 = vpack.c.bf16 %v8130_v7, %v8130_v7 }
 0x33b   : > { %v1778_v11 = vpop.f32.mrb[130].mxu1 }
 0x33c   : > { %v1780_v12 = vpop.f32.mrb[131].mxu1  ;;  %6576 = vmatmul.mubr.msk.bf16.gmra.mrb[176].mxu0 %vm1864_vm4, %v2720_v21 }
 0x33d   : > { %6579 = vmatprep.mubr.msk.bf16.mxu0 %vm7345_vm0, %v7344_v1 }
 0x33f   : > { %v8141_v13 = vpop.f32.mrb[72].mxu0 }
 0x340   : > { %v6437_v14 = vpop.f32.mrb[73].mxu0 }
 0x341   : > { %v1783_v52 = vpop.f32.mrb[132].mxu1  ;;  %v2004_v56 = vpop.f32.mrb[74].mxu0 }
 0x342   : > { %v2986_v15 = vpack.c.bf16 %v1783_v52, %v1778_v11  ;;  %v1785_v16 = vpop.f32.mrb[133].mxu1  ;;  %v6438_v19 = vpop.f32.mrb[75].mxu0 }
 0x343   : > { %v1786_v20 = vpop.f32.mrb[134].mxu1 }
 0x344   : > { %v1788_v21 = vpop.f32.mrb[135].mxu1  ;;  %6580 = vmatmul.mubr.msk.bf16.gmra.mrb[180].mxu0 %vm1864_vm4, %v2721_v58  ;;  %6620 = vmatmul.mubr.msk.bf16.vlgmr.msra.gmra.mrb[180].mxu1 %vm1864_vm4, %v2986_v15 }
 0x345   : > { %6603 = vmatprep.mubr.msk.bf16.mxu0 %vm7345_vm0, %v7344_v1  ;;  %6623 = vmatprep.mubr.msk.bf16.mxu1 %vm7345_vm0, %v7344_v1 }
 0x346   : > { %6648 = vmatpush3.bf16.msra.mxu1 %v7215_v17 }
 0x347   : > { %v2069_v23 = vpop.f32.mrb[76].mxu0  ;;  %6649 = vmatprep.subr.bf16.mxu1 %v7344_v1 }
 0x348   : > { %v2091_v24 = vadd.f32 %v2069_v23, %v1986_v53  ;;  %v6445_v25 = vpop.f32.mrb[77].mxu0 }
 0x349   : > { %v1791_v26 = vpop.f32.mrb[136].mxu1  ;;  %v2072_v27 = vpop.f32.mrb[78].mxu0 }
 0x34a   : > { %v2987_v28 = vpack.c.bf16 %v1791_v26, %v1786_v20  ;;  %v2092_v29 = vadd.f32 %v2072_v27, %v1989_v60  ;;  %v1793_v30 = vpop.f32.mrb[137].mxu1  ;;  %v6446_v31 = vpop.f32.mrb[79].mxu0  ;;  %6650 = vmatpush3.bf16.msra.mxu1 %v7217_v61 }
 0x34b   : > { %v1794_v33 = vpop.f32.mrb[138].mxu1  ;;  %6705 = vmatprep.subr.bf16.mxu1 %v7344_v1 }
 0x34c   : > { %v1796_v34 = vpop.f32.mrb[139].mxu1  ;;  %6604 = vmatmul.mubr.msk.bf16.vlgmr.msra.gmra.mrb[184].mxu0 %vm1864_vm4, %v2897_v49  ;;  %6624 = vmatmul.mubr.msk.bf16.gmra.mrb[184].mxu1 %vm1864_vm4, %v2987_v28  ;;  %v2988_v38 = vpack.c.bf16 %v1794_v33, %v1794_v33 }
 0x34d   : > { %6607 = vmatprep.mubr.msk.bf16.mxu0 %vm7345_vm0, %v7344_v1  ;;  %6627 = vmatprep.mubr.msk.bf16.mxu1 %vm7345_vm0, %v7344_v1 }
 0x34e   : > { %6632 = vmatpush3.bf16.msra.mxu0 %v7214_v32 }
 0x34f   : > { %v8174_v36 = vpop.f32.mrb[80].mxu0  ;;  %6633 = vmatprep.subr.bf16.mxu0 %v7344_v1 }
 0x350   : > { %v6449_v22 = vpop.f32.mrb[81].mxu0 }
 0x351   : > { %v1799_v37 = vpop.f32.mrb[140].mxu1  ;;  %v8177_v18 = vpop.f32.mrb[82].mxu0 }
 0x352   : > { %v1801_v39 = vpop.f32.mrb[141].mxu1  ;;  %v6450_v40 = vpop.f32.mrb[83].mxu0  ;;  %6634 = vmatpush3.bf16.msra.mxu0 %v7216_v35 }
 0x353   : > { %v1802_v41 = vpop.f32.mrb[142].mxu1  ;;  %6663 = vmatprep.subr.bf16.mxu0 %v7344_v1 }
 0x354   : > { %v3075_v42 = vpack.c.bf16 %v1802_v41, %v1799_v37  ;;  %v1804_v43 = vpop.f32.mrb[143].mxu1  ;;  %6608 = vmatmul.mubr.msk.bf16.gmra.mrb[188].mxu0 %vm1864_vm4, %v2898_v2  ;;  %6628 = vmatmul.mubr.msk.bf16.gmra.mrb[188].mxu1 %vm1864_vm4, %v2988_v38 }
 0x355   : > { %6611 = vmatprep.mubr.msk.bf16.mxu0 %vm7345_vm0, %v7344_v1  ;;  %6651 = vmatprep.mubr.msk.bf16.mxu1 %vm7345_vm0, %v7344_v1 }
 0x357   : > { %v8189_v44 = vpop.f32.mrb[84].mxu0 }
 0x358   : > { %v6453_v45 = vpop.f32.mrb[85].mxu0 }
 0x359   : > { %v1807_v46 = vpop.f32.mrb[144].mxu1  ;;  %v2088_v47 = vpop.f32.mrb[86].mxu0 }
 0x35a   : > { %v1809_v49 = vpop.f32.mrb[145].mxu1  ;;  %v6454_v50 = vpop.f32.mrb[87].mxu0 }
 0x35b   : > { %v1810_v51 = vpop.f32.mrb[146].mxu1 }
 0x35c   : > { %v3076_v53 = vpack.c.bf16 %v1810_v51, %v1807_v46  ;;  %v1812_v54 = vpop.f32.mrb[147].mxu1  ;;  %6612 = vmatmul.mubr.msk.bf16.gmra.mrb[192].mxu0 %vm1864_vm4, %v2899_v48 }
 0x35d   : > { %6635 = vmatprep.mubr.msk.bf16.mxu0 %vm7345_vm0, %v7344_v1 }
 0x35f   : > { %v2158_v55 = vpop.f32.mrb[88].mxu0 }
 0x360   : > { %v2180_v57 = vadd.f32 %v2158_v55, %v2091_v24  ;;  %v6461_v59 = vpop.f32.mrb[89].mxu0 }
 0x361   : > { %v1815_v60 = vpop.f32.mrb[148].mxu1  ;;  %v2161_v62 = vpop.f32.mrb[90].mxu0 }
 0x362   : > { %v2181_v63 = vadd.f32 %v2161_v62, %v2092_v29  ;;  %v1817_v0 = vpop.f32.mrb[149].mxu1  ;;  %v6462_v2 = vpop.f32.mrb[91].mxu0  ;;  %v3077_v17 = vpack.c.bf16 %v1815_v60, %v1815_v60 }
 0x363   : > { %v1818_v3 = vpop.f32.mrb[150].mxu1 }
 0x364   : > { %v1820_v4 = vpop.f32.mrb[151].mxu1  ;;  %6636 = vmatmul.mubr.msk.bf16.vlgmr.msra.gmra.mrb[196].mxu0 %vm1864_vm4, %v3075_v42 }
 0x365   : > { %6639 = vmatprep.mubr.msk.bf16.mxu0 %vm7345_vm0, %v7344_v1 }
 0x367   : > { %v2166_v6 = vpop.f32.mrb[92].mxu0 }
 0x368   : > { %v6465_v7 = vpop.f32.mrb[93].mxu0 }
 0x369   : > { %v1823_v9 = vpop.f32.mrb[152].mxu1  ;;  %v2169_v10 = vpop.f32.mrb[94].mxu0 }
 0x36a   : > { %v3164_v11 = vpack.c.bf16 %v1823_v9, %v1818_v3  ;;  %v1825_v12 = vpop.f32.mrb[153].mxu1  ;;  %v6466_v14 = vpop.f32.mrb[95].mxu0 }
 0x36b   : > { %v1826_v52 = vpop.f32.mrb[154].mxu1 }
 0x36c   : > { %v1828_v56 = vpop.f32.mrb[155].mxu1  ;;  %6640 = vmatmul.mubr.msk.bf16.gmra.mrb[200].mxu0 %vm1864_vm4, %v3076_v53  ;;  %6652 = vmatmul.mubr.msk.bf16.vlgmr.msra.gmra.mrb[192].mxu1 %vm1864_vm4, %v3164_v11 }
 0x36d   : > { %6643 = vmatprep.mubr.msk.bf16.mxu0 %vm7345_vm0, %v7344_v1  ;;  %6655 = vmatprep.mubr.msk.bf16.mxu1 %vm7345_vm0, %v7344_v1 }
 0x36f   : > { %v2174_v58 = vpop.f32.mrb[96].mxu0 }
 0x370   : > { %v6469_v15 = vpop.f32.mrb[97].mxu0 }
 0x371   : > { %v1831_v16 = vpop.f32.mrb[156].mxu1  ;;  %v2177_v19 = vpop.f32.mrb[98].mxu0 }
 0x372   : > { %v3165_v20 = vpack.c.bf16 %v1831_v16, %v1826_v52  ;;  %v1833_v21 = vpop.f32.mrb[157].mxu1  ;;  %v6470_v61 = vpop.f32.mrb[99].mxu0 }
 0x373   : > { %v1834_v23 = vpop.f32.mrb[158].mxu1 }
 0x374   : > { %v1836_v24 = vpop.f32.mrb[159].mxu1  ;;  %6644 = vmatmul.mubr.msk.bf16.gmra.mrb[204].mxu0 %vm1864_vm4, %v3077_v17  ;;  %6656 = vmatmul.mubr.msk.bf16.gmra.mrb[196].mxu1 %vm1864_vm4, %v3165_v20  ;;  %v3166_v30 = vpack.c.bf16 %v1834_v23, %v1834_v23 }
 0x375   : > { %6659 = vmatprep.mubr.msk.bf16.mxu1 %vm7345_vm0, %v7344_v1  ;;  %6669 = vmatprep.mubr.msk.bf16.mxu0 %vm7345_vm0, %v7344_v1 }
 0x377   : > { %v2247_v25 = vpop.f32.mrb[100].mxu0 }
 0x378   : > { %v2269_v26 = vadd.f32 %v2247_v25, %v2180_v57  ;;  %v6477_v27 = vpop.f32.mrb[101].mxu0 }
 0x379   : > { %v1916_v28 = vpop.f32.mrb[160].mxu1  ;;  %v2250_v29 = vpop.f32.mrb[102].mxu0 }
 0x37a   : > { %v1994_v31 = vadd.f32 %v8128_v5, %v1916_v28  ;;  %v2270_v32 = vadd.f32 %v2250_v29, %v2181_v63  ;;  %v6417_v33 = vpop.f32.mrb[161].mxu1  ;;  %v6478_v34 = vpop.f32.mrb[103].mxu0 }
 0x37b   : > { %v1919_v35 = vpop.f32.mrb[162].mxu1 }
 0x37c   : > { %v2093_v22 = vadd.f32 %v8174_v36, %v1994_v31  ;;  %v1997_v37 = vadd.f32 %v8132_v8, %v1919_v35  ;;  %v6418_v38 = vpop.f32.mrb[163].mxu1  ;;  %6660 = vmatmul.mubr.msk.bf16.gmra.mrb[200].mxu1 %vm1864_vm4, %v3166_v30 }
 0x37d   : > { %6713 = vmatprep.mubr.msk.bf16.mxu1 %vm7345_vm0, %v7344_v1 }
 0x37e   : > { %v2094_v39 = vadd.f32 %v8177_v18, %v1997_v37  ;;  %v2182_v40 = vadd.f32 %v2166_v6, %v2093_v22 }
 0x37f   : > { %v2255_v41 = vpop.f32.mrb[104].mxu0 }
 0x380   : > { %v2271_v42 = vadd.f32 %v2255_v41, %v2182_v40  ;;  %v6481_v5 = vpop.f32.mrb[105].mxu0  ;;  %v2183_v43 = vadd.f32 %v2169_v10, %v2094_v39 }
 0x381   : > { %v1924_v45 = vpop.f32.mrb[164].mxu1  ;;  %v2258_v46 = vpop.f32.mrb[106].mxu0 }
 0x382   : > { %v2002_v47 = vadd.f32 %v8141_v13, %v1924_v45  ;;  %v2272_v36 = vadd.f32 %v2258_v46, %v2183_v43  ;;  %v6421_v48 = vpop.f32.mrb[165].mxu1  ;;  %v6482_v8 = vpop.f32.mrb[107].mxu0 }
 0x383   : > { %v1927_v49 = vpop.f32.mrb[166].mxu1 }
 0x384   : > { %v2095_v50 = vadd.f32 %v8189_v44, %v2002_v47  ;;  %v6422_v51 = vpop.f32.mrb[167].mxu1 }
 0x386   : > { %v2184_v53 = vadd.f32 %v2174_v58, %v2095_v50 }
 0x387   : > { %v2263_v54 = vpop.f32.mrb[108].mxu0 }
 0x388   : > { %v2273_v55 = vadd.f32 %v2263_v54, %v2184_v53  ;;  %v6485_v18 = vpop.f32.mrb[109].mxu0 }
 0x389   : > { %v2266_v57 = vpop.f32.mrb[110].mxu0 }
 0x38a   : > { %v6486_v59 = vpop.f32.mrb[111].mxu0 }
 0x38f   : > { %v2336_v60 = vpop.f32.mrb[112].mxu0 }
 0x390   : > { %v2358_v62 = vadd.f32 %v2336_v60, %v2269_v26  ;;  %v6493_v63 = vpop.f32.mrb[113].mxu0 }
 0x391   : > { %v2339_v0 = vpop.f32.mrb[114].mxu0 }
 0x392   : > { %v2359_v2 = vadd.f32 %v2339_v0, %v2270_v32  ;;  %v6494_v3 = vpop.f32.mrb[115].mxu0 }
 0x397   : > { %v2344_v13 = vpop.f32.mrb[116].mxu0 }
 0x398   : > { %v2360_v4 = vadd.f32 %v2344_v13, %v2271_v42  ;;  %v6497_v6 = vpop.f32.mrb[117].mxu0 }
 0x399   : > { %v2347_v7 = vpop.f32.mrb[118].mxu0 }
 0x39a   : > { %v2361_v9 = vadd.f32 %v2347_v7, %v2272_v36  ;;  %v6498_v10 = vpop.f32.mrb[119].mxu0 }
 0x39f   : > { %v2352_v44 = vpop.f32.mrb[120].mxu0 }
 0x3a0   : > { %v2362_v11 = vadd.f32 %v2352_v44, %v2273_v55  ;;  %v6501_v12 = vpop.f32.mrb[121].mxu0 }
 0x3a1   : > { %v2355_v14 = vpop.f32.mrb[122].mxu0 }
 0x3a2   : > { %v6502_v52 = vpop.f32.mrb[123].mxu0 }
 0x3a7   : > { %v2425_v56 = vpop.f32.mrb[124].mxu0 }
 0x3a8   : > { %v2447_v58 = vadd.f32 %v2425_v56, %v2358_v62  ;;  %v6509_v15 = vpop.f32.mrb[125].mxu0 }
 0x3a9   : > { %v2428_v16 = vpop.f32.mrb[126].mxu0 }
 0x3aa   : > { %v2448_v19 = vadd.f32 %v2428_v16, %v2359_v2  ;;  %v6510_v17 = vpop.f32.mrb[127].mxu0 }
 0x3af   : > { %v2433_v20 = vpop.f32.mrb[128].mxu0 }
 0x3b0   : > { %v2449_v21 = vadd.f32 %v2433_v20, %v2360_v4  ;;  %v6513_v61 = vpop.f32.mrb[129].mxu0 }
 0x3b1   : > { %v2436_v23 = vpop.f32.mrb[130].mxu0 }
 0x3b2   : > { %v2450_v24 = vadd.f32 %v2436_v23, %v2361_v9  ;;  %v6514_v25 = vpop.f32.mrb[131].mxu0 }
 0x3b7   : > { %v2441_v26 = vpop.f32.mrb[132].mxu0 }
 0x3b8   : > { %v2451_v27 = vadd.f32 %v2441_v26, %v2362_v11  ;;  %v6517_v28 = vpop.f32.mrb[133].mxu0 }
 0x3b9   : > { %v2444_v29 = vpop.f32.mrb[134].mxu0 }
 0x3ba   : > { %v6518_v30 = vpop.f32.mrb[135].mxu0 }
 0x3bf   : > { %v2514_v31 = vpop.f32.mrb[136].mxu0 }
 0x3c0   : > { %v2536_v32 = vadd.f32 %v2514_v31, %v2447_v58  ;;  %v6525_v33 = vpop.f32.mrb[137].mxu0 }
 0x3c1   : > { %v2517_v34 = vpop.f32.mrb[138].mxu0 }
 0x3c2   : > { %v2537_v35 = vadd.f32 %v2517_v34, %v2448_v19  ;;  %v6526_v22 = vpop.f32.mrb[139].mxu0 }
 0x3c7   : > { %v2522_v37 = vpop.f32.mrb[140].mxu0 }
 0x3c8   : > { %v2538_v38 = vadd.f32 %v2522_v37, %v2449_v21  ;;  %v6529_v39 = vpop.f32.mrb[141].mxu0 }
 0x3c9   : > { %v2525_v40 = vpop.f32.mrb[142].mxu0 }
 0x3ca   : > { %v2539_v41 = vadd.f32 %v2525_v40, %v2450_v24  ;;  %v6530_v42 = vpop.f32.mrb[143].mxu0 }
 0x3cf   : > { %v2530_v5 = vpop.f32.mrb[144].mxu0 }
 0x3d0   : > { %v2540_v43 = vadd.f32 %v2530_v5, %v2451_v27  ;;  %v6533_v45 = vpop.f32.mrb[145].mxu0 }
 0x3d1   : > { %v2533_v46 = vpop.f32.mrb[146].mxu0 }
 0x3d2   : > { %v6534_v47 = vpop.f32.mrb[147].mxu0 }
 0x3d7   : > { %v2603_v36 = vpop.f32.mrb[148].mxu0 }
 0x3d8   : > { %v2625_v48 = vadd.f32 %v2603_v36, %v2536_v32  ;;  %v6541_v8 = vpop.f32.mrb[149].mxu0 }
 0x3d9   : > { %v2606_v49 = vpop.f32.mrb[150].mxu0 }
 0x3da   : > { %v2626_v50 = vadd.f32 %v2606_v49, %v2537_v35  ;;  %v6542_v51 = vpop.f32.mrb[151].mxu0 }
 0x3df   : > { %v2611_v53 = vpop.f32.mrb[152].mxu0 }
 0x3e0   : > { %v2627_v54 = vadd.f32 %v2611_v53, %v2538_v38  ;;  %v6545_v55 = vpop.f32.mrb[153].mxu0 }
 0x3e1   : > { %v2614_v18 = vpop.f32.mrb[154].mxu0 }
 0x3e2   : > { %v2628_v57 = vadd.f32 %v2614_v18, %v2539_v41  ;;  %v6546_v59 = vpop.f32.mrb[155].mxu0  ;;  %v7227_v18 = vld [vmem:[%s8850_s8 + $0x20] sm:$0xff]  }
 0x3e3   : > { %6706 = vmatpush3.bf16.msra.mxu1 %v7227_v18 }
 0x3e4   : > { %6707 = vmatprep.subr.bf16.mxu1 %v7344_v1 }
 0x3e7   : > { %v2619_v60 = vpop.f32.mrb[156].mxu0 }
 0x3e8   : > { %v2629_v62 = vadd.f32 %v2619_v60, %v2540_v43  ;;  %v6549_v63 = vpop.f32.mrb[157].mxu0 }
 0x3e9   : > { %v2622_v0 = vpop.f32.mrb[158].mxu0 }
 0x3ea   : > { %v6550_v2 = vpop.f32.mrb[159].mxu0 }
 0x3ef   : > { %v2692_v3 = vpop.f32.mrb[160].mxu0  ;;  %v2870_v13 = vpop.f32.mrb[168].mxu1 }
 0x3f0   : > { %v2714_v4 = vadd.f32 %v2692_v3, %v2625_v48  ;;  %v6557_v6 = vpop.f32.mrb[161].mxu0  ;;  %v6589_v7 = vpop.f32.mrb[169].mxu1 }
 0x3f1   : > { %v2695_v9 = vpop.f32.mrb[162].mxu0  ;;  %v2873_v10 = vpop.f32.mrb[170].mxu1 }
 0x3f2   : > { %v2715_v44 = vadd.f32 %v2695_v9, %v2626_v50  ;;  %v6558_v11 = vpop.f32.mrb[163].mxu0  ;;  %v6590_v12 = vpop.f32.mrb[171].mxu1 }
 0x3f7   : > { %v2700_v14 = vpop.f32.mrb[164].mxu0  ;;  %v2878_v52 = vpop.f32.mrb[172].mxu1 }
 0x3f8   : > { %v2716_v56 = vadd.f32 %v2700_v14, %v2627_v54  ;;  %v6561_v58 = vpop.f32.mrb[165].mxu0  ;;  %v6593_v15 = vpop.f32.mrb[173].mxu1 }
 0x3f9   : > { %v2703_v16 = vpop.f32.mrb[166].mxu0  ;;  %v2881_v19 = vpop.f32.mrb[174].mxu1 }
 0x3fa   : > { %v2717_v17 = vadd.f32 %v2703_v16, %v2628_v57  ;;  %v6562_v20 = vpop.f32.mrb[167].mxu0  ;;  %v6594_v21 = vpop.f32.mrb[175].mxu1  ;;  %v7228_v57 = vld [vmem:[%s8850_s8 + $0x28] sm:$0xff]  }
 0x3fb   : > { %6708 = vmatpush3.bf16.msra.mxu1 %v7228_v57 }
 0x3fc   : > { %6709 = vmatprep.subr.bf16.mxu1 %v7344_v1 }
 0x3ff   : > { %v2708_v61 = vpop.f32.mrb[168].mxu0  ;;  %v2886_v23 = vpop.f32.mrb[176].mxu1 }
 0x400   : > { %v2718_v24 = vadd.f32 %v2708_v61, %v2629_v62  ;;  %v6565_v25 = vpop.f32.mrb[169].mxu0  ;;  %v6597_v26 = vpop.f32.mrb[177].mxu1 }
 0x401   : > { %v2711_v27 = vpop.f32.mrb[170].mxu0  ;;  %v2889_v28 = vpop.f32.mrb[178].mxu1 }
 0x402   : > { %v6566_v29 = vpop.f32.mrb[171].mxu0  ;;  %v6598_v30 = vpop.f32.mrb[179].mxu1 }
 0x407   : > { %v2781_v31 = vpop.f32.mrb[172].mxu0 }
 0x408   : > { %v2803_v32 = vadd.f32 %v2781_v31, %v2714_v4  ;;  %v6573_v33 = vpop.f32.mrb[173].mxu0 }
 0x409   : > { %v2784_v34 = vpop.f32.mrb[174].mxu0 }
 0x40a   : > { %v2804_v35 = vadd.f32 %v2784_v34, %v2715_v44  ;;  %v6574_v22 = vpop.f32.mrb[175].mxu0  ;;  %v2892_v37 = vadd.f32 %v2870_v13, %v2803_v32  ;;  %v5935_v34 = vld [vmem:[%s8848_s6] ss:$0 sm:$0xff] }
 0x40c   : > { %v2893_v38 = vadd.f32 %v2873_v10, %v2804_v35 }
 0x40f   : > { %v2789_v39 = vpop.f32.mrb[176].mxu0 }
 0x410   : > { %v2805_v40 = vadd.f32 %v2789_v39, %v2716_v56  ;;  %v6577_v41 = vpop.f32.mrb[177].mxu0 }
 0x411   : > { %v2792_v42 = vpop.f32.mrb[178].mxu0 }
 0x412   : > { %v2806_v5 = vadd.f32 %v2792_v42, %v2717_v17  ;;  %v6578_v43 = vpop.f32.mrb[179].mxu0  ;;  %v2894_v45 = vadd.f32 %v2878_v52, %v2805_v40 }
 0x414   : > { %v2895_v46 = vadd.f32 %v2881_v19, %v2806_v5 }
 0x417   : > { %v2797_v47 = vpop.f32.mrb[180].mxu0  ;;  %v3048_v36 = vpop.f32.mrb[180].mxu1 }
 0x418   : > { %v2807_v48 = vadd.f32 %v2797_v47, %v2718_v24  ;;  %v6581_v8 = vpop.f32.mrb[181].mxu0  ;;  %v6621_v49 = vpop.f32.mrb[181].mxu1 }
 0x419   : > { %v2800_v50 = vpop.f32.mrb[182].mxu0  ;;  %v3051_v51 = vpop.f32.mrb[182].mxu1 }
 0x41a   : > { %v6582_v53 = vpop.f32.mrb[183].mxu0  ;;  %v6622_v54 = vpop.f32.mrb[183].mxu1  ;;  %v2896_v55 = vadd.f32 %v2886_v23, %v2807_v48 }
 0x41f   : > { %v2959_v59 = vpop.f32.mrb[184].mxu0  ;;  %v3056_v60 = vpop.f32.mrb[184].mxu1 }
 0x420   : > { %v2981_v62 = vadd.f32 %v2959_v59, %v2892_v37  ;;  %v6605_v63 = vpop.f32.mrb[185].mxu0  ;;  %v6625_v0 = vpop.f32.mrb[185].mxu1 }
 0x421   : > { %v2962_v2 = vpop.f32.mrb[186].mxu0  ;;  %v3059_v3 = vpop.f32.mrb[186].mxu1 }
 0x422   : > { %v2982_v13 = vadd.f32 %v2962_v2, %v2893_v38  ;;  %v6606_v4 = vpop.f32.mrb[187].mxu0  ;;  %v6626_v6 = vpop.f32.mrb[187].mxu1  ;;  %v3070_v7 = vadd.f32 %v3048_v36, %v2981_v62 }
 0x424   : > { %v3071_v9 = vadd.f32 %v3051_v51, %v2982_v13 }
 0x427   : > { %v2967_v10 = vpop.f32.mrb[188].mxu0  ;;  %v3064_v44 = vpop.f32.mrb[188].mxu1 }
 0x428   : > { %v2983_v11 = vadd.f32 %v2967_v10, %v2894_v45  ;;  %v6609_v12 = vpop.f32.mrb[189].mxu0  ;;  %v6629_v14 = vpop.f32.mrb[189].mxu1 }
 0x429   : > { %v2970_v52 = vpop.f32.mrb[190].mxu0  ;;  %v3067_v56 = vpop.f32.mrb[190].mxu1  ;;  %v7218_v14 = vld [vmem:[%s8849_s7] sm:$0xff]  }
 0x42a   : > { %v2984_v58 = vadd.f32 %v2970_v52, %v2895_v46  ;;  %v6610_v15 = vpop.f32.mrb[191].mxu0  ;;  %v6630_v16 = vpop.f32.mrb[191].mxu1  ;;  %v3072_v19 = vadd.f32 %v3056_v60, %v2983_v11  ;;  %v7219_v52 = vld [vmem:[%s8849_s7 + $0x8] sm:$0xff]   ;;  %v7220_v56 = vld [vmem:[%s8849_s7 + $0x10] sm:$0xff]  }
 0x42b   : > { %v7222_v15 = vld [vmem:[%s8849_s7 + $0x20] sm:$0xff]   ;;  %v7223_v16 = vld [vmem:[%s8849_s7 + $0x28] sm:$0xff]  }
 0x42c   : > { %v3073_v17 = vadd.f32 %v3059_v3, %v2984_v58  ;;  %v7221_v58 = vld [vmem:[%s8849_s7 + $0x18] sm:$0xff]  }
 0x42f   : > { %v2975_v20 = vpop.f32.mrb[192].mxu0 }
 0x430   : > { %v2985_v21 = vadd.f32 %v2975_v20, %v2896_v55  ;;  %v6613_v61 = vpop.f32.mrb[193].mxu0  ;;  %v7226_v20 = vld [vmem:[%s8849_s7 + $0x40] sm:$0xff]  }
 0x431   : > { %v2978_v23 = vpop.f32.mrb[194].mxu0  ;;  %v7230_v61 = vld [vmem:[%s8850_s8 + $0x38] sm:$0xff]  }
 0x432   : > { %v6614_v24 = vpop.f32.mrb[195].mxu0  ;;  %v3074_v25 = vadd.f32 %v3064_v44, %v2985_v21  ;;  %v7229_v21 = vld [vmem:[%s8850_s8 + $0x30] sm:$0xff]   ;;  %v7235_v23 = vld [vmem:[%s8850_s8 + $0xa0] sm:$0xff]  }
 0x433   : > { %6710 = vmatpush3.bf16.msra.mxu1 %v7229_v21  ;;  %v7240_v24 = vld [vmem:[%s8850_s8 + $0xa8] sm:$0xff]  }
 0x434   : > { %6711 = vmatprep.subr.bf16.mxu1 %v7344_v1  ;;  %v7247_v21 = vld [vmem:[%s8850_s8 + $0x88] sm:$0xff]  }
 0x437   : > { %v3137_v26 = vpop.f32.mrb[196].mxu0  ;;  %6712 = vmatpush3.bf16.msra.mxu1 %v7230_v61 }
 0x438   : > { %v3159_v27 = vadd.f32 %v3137_v26, %v3070_v7  ;;  %v6637_v28 = vpop.f32.mrb[197].mxu0  ;;  %6717 = vmatprep.subr.bf16.mxu1 %v7344_v1  ;;  %v7250_v26 = vld [vmem:[%s8850_s8 + $0xb8] sm:$0xff]  }
 0x439   : > { %v3140_v29 = vpop.f32.mrb[198].mxu0 }
 0x43a   : > { %v3160_v30 = vadd.f32 %v3140_v29, %v3071_v9  ;;  %v6638_v31 = vpop.f32.mrb[199].mxu0 }
 0x43f   : > { %v3145_v32 = vpop.f32.mrb[200].mxu0  ;;  %v3226_v33 = vpop.f32.mrb[192].mxu1 }
 0x440   : > { %v3161_v35 = vadd.f32 %v3145_v32, %v3072_v19  ;;  %v3248_v22 = vadd.f32 %v3226_v33, %v3159_v27  ;;  %v6641_v37 = vpop.f32.mrb[201].mxu0  ;;  %v6653_v38 = vpop.f32.mrb[193].mxu1  ;;  %v7224_v19 = vld [vmem:[%s8849_s7 + $0x30] sm:$0xff]  }
 0x441   : > { %v3148_v39 = vpop.f32.mrb[202].mxu0  ;;  %v3229_v40 = vpop.f32.mrb[194].mxu1  ;;  %v7232_v38 = vld [vmem:[%s8850_s8 + $0x8] sm:$0xff]  }
 0x442   : > { %v3260_v41 = vadd.f32 %v5935_v34, %v3248_v22  ;;  %v3162_v42 = vadd.f32 %v3148_v39, %v3073_v17  ;;  %v3249_v5 = vadd.f32 %v3229_v40, %v3160_v30  ;;  %v6642_v43 = vpop.f32.mrb[203].mxu0  ;;  %v6654_v45 = vpop.f32.mrb[195].mxu1  ;;  %v7225_v17 = vld [vmem:[%s8849_s7 + $0x38] sm:$0xff]  }
 0x443   : > { %v7234_v45 = vld [vmem:[%s8850_s8 + $0x18] sm:$0xff]  }
 0x444   : > { %v3261_v46 = vadd.f32 %v5935_v34, %v3249_v5  ;;  %v3265_v47 = vmax.f32 %v3260_v41, 0.0  ;;  %v7233_v41 = vld [vmem:[%s8850_s8 + $0x10] sm:$0xff]  }
 0x446   : > { %v3266_v36 = vmax.f32 %v3261_v46, 0.0 }
 0x447   : > { %v3153_v48 = vpop.f32.mrb[204].mxu0  ;;  %v3234_v8 = vpop.f32.mrb[196].mxu1 }
 0x448   : > { %v3270_v49 = vpack.c.bf16 %v3266_v36, %v3265_v47  ;;  %v3163_v50 = vadd.f32 %v3153_v48, %v3074_v25  ;;  %v3250_v51 = vadd.f32 %v3234_v8, %v3161_v35  ;;  %v6645_v53 = vpop.f32.mrb[205].mxu0  ;;  %v6657_v54 = vpop.f32.mrb[197].mxu1  ;;  %v7246_v25 = vld [vmem:[%s8850_s8 + $0xb0] sm:$0xff]   ;;  %v7231_v35 = vld [vmem:[%s8850_s8] sm:$0xff]  }
 0x449   : > { %v3156_v55 = vpop.f32.mrb[206].mxu0  ;;  %v3237_v18 = vpop.f32.mrb[198].mxu1  ;;  %v7236_v36 = vld [vmem:[%s8850_s8 + $0x40] sm:$0xff]   ;;  %v7238_v54 = vld [vmem:[%s8850_s8 + $0x50] sm:$0xff]  }
 0x44a   : > { %v3262_v57 = vadd.f32 %v5935_v34, %v3250_v51  ;;  %v3251_v59 = vadd.f32 %v3237_v18, %v3162_v42  ;;  %v6646_v60 = vpop.f32.mrb[207].mxu0  ;;  %v6658_v62 = vpop.f32.mrb[199].mxu1  ;;  %6664 = vmatpush3.bf16.msra.mxu0 %v3270_v49 }
 0x44b   : > { %6665 = vmatprep.subr.bf16.mxu0 %v7344_v1 }
 0x44c   : > { %v3263_v63 = vadd.f32 %v5935_v34, %v3251_v59  ;;  %v3267_v0 = vmax.f32 %v3262_v57, 0.0  ;;  %v7239_v59 = vld [vmem:[%s8850_s8 + $0x58] sm:$0xff]  }
 0x44e   : > { %v3268_v2 = vmax.f32 %v3263_v63, 0.0  ;;  %v7241_v63 = vld [vmem:[%s8850_s8 + $0x60] sm:$0xff]  }
 0x44f   : > { %v3242_v3 = vpop.f32.mrb[200].mxu1 }
 0x450   : > { %v3271_v13 = vpack.c.bf16 %v3268_v2, %v3267_v0  ;;  %v3252_v4 = vadd.f32 %v3242_v3, %v3163_v50  ;;  %v6661_v6 = vpop.f32.mrb[201].mxu1  ;;  %v7237_v50 = vld [vmem:[%s8850_s8 + $0x48] sm:$0xff]   ;;  %v7252_v3 = vld [vmem:[%s8850_s8 + $0xe0] sm:$0xff]  }
 0x451   : > { %v3245_v7 = vpop.f32.mrb[202].mxu1  ;;  %v7254_v6 = vld [vmem:[%s8850_s8 + $0xe8] sm:$0xff]  }
 0x452   : > { %v3264_v9 = vadd.f32 %v5935_v34, %v3252_v4  ;;  %v6662_v10 = vpop.f32.mrb[203].mxu1  ;;  %6666 = vmatpush3.bf16.msra.mxu0 %v3271_v13  ;;  %v7242_v4 = vld [vmem:[%s8850_s8 + $0x68] sm:$0xff]  }
 0x453   : > { %6667 = vmatprep.subr.bf16.mxu0 %v7344_v1  ;;  %v7243_v10 = vld [vmem:[%s8850_s8 + $0x70] sm:$0xff]  }
 0x454   : > { %v3269_v44 = vmax.f32 %v3264_v9, 0.0 }
 0x456   : > { %v3272_v11 = vpack.c.bf16 %v3269_v44, %v3269_v44 }
 0x458   : > { %v3366_v12 = vsel %vm3364_vm5, %v3272_v11, 0 }
 0x459   : > { %6668 = vmatpush3.bf16.msra.mxu0 %v3366_v12  ;;  %v7256_v12 = vld [vmem:[%s8850_s8 + $0xf0] sm:$0xff]  }
 0x45a   : > { %6765 = vmatprep.subr.bf16.mxu0 %v7344_v1 }
 0x45c   : > { %6670 = vmatmul.mubr.msk.bf16.vlgmr.msra.gmra.mrb[208].mxu0 %vm3336_vm6, %v7218_v14 }
 0x45d   : > { %6673 = vmatprep.mubr.msk.bf16.mxu0 %vm7345_vm0, %v7344_v1  ;;  %6766 = vmatpush3.bf16.msra.mxu0 %v7235_v23 }
 0x45e   : > { %6767 = vmatprep.subr.bf16.mxu0 %v7344_v1 }
 0x461   : > { %6768 = vmatpush3.bf16.msra.mxu0 %v7240_v24  ;;  %v7248_v24 = vld [vmem:[%s8850_s8 + $0x90] sm:$0xff]  }
 0x462   : > { %6769 = vmatprep.subr.bf16.mxu0 %v7344_v1 }
 0x464   : > { %6674 = vmatmul.mubr.msk.bf16.gmra.mrb[212].mxu0 %vm3336_vm6, %v7219_v52  ;;  %v7244_v52 = vld [vmem:[%s8850_s8 + $0x78] sm:$0xff]  }
 0x465   : > { %6677 = vmatprep.mubr.msk.bf16.mxu0 %vm7345_vm0, %v7344_v1  ;;  %6770 = vmatpush3.bf16.msra.mxu0 %v7246_v25 }
 0x466   : > { %6771 = vmatprep.subr.bf16.mxu0 %v7344_v1 }
 0x469   : > { %6772 = vmatpush3.bf16.msra.mxu0 %v7250_v26 }
 0x46a   : > { %6789 = vmatprep.subr.bf16.mxu0 %v7344_v1 }
 0x46c   : > { %6678 = vmatmul.mubr.msk.bf16.gmra.mrb[216].mxu0 %vm3336_vm6, %v7220_v56  ;;  %v7258_v56 = vld [vmem:[%s8850_s8 + $0xf8] sm:$0xff]  }
 0x46d   : > { %6681 = vmatprep.mubr.msk.bf16.mxu0 %vm7345_vm0, %v7344_v1 }
 0x474   : > { %6682 = vmatmul.mubr.msk.bf16.gmra.mrb[220].mxu0 %vm3336_vm6, %v7221_v58 }
 0x475   : > { %6685 = vmatprep.mubr.msk.bf16.mxu0 %vm7345_vm0, %v7344_v1 }
 0x47c   : > { %6686 = vmatmul.mubr.msk.bf16.gmra.mrb[224].mxu0 %vm3336_vm6, %v7222_v15 }
 0x47d   : > { %6689 = vmatprep.mubr.msk.bf16.mxu0 %vm7345_vm0, %v7344_v1 }
 0x484   : > { %6690 = vmatmul.mubr.msk.bf16.gmra.mrb[228].mxu0 %vm3336_vm6, %v7223_v16  ;;  %v7245_v16 = vld [vmem:[%s8850_s8 + $0x80] sm:$0xff]  }
 0x485   : > { %6693 = vmatprep.mubr.msk.bf16.mxu0 %vm7345_vm0, %v7344_v1 }
 0x48c   : > { %6694 = vmatmul.mubr.msk.bf16.gmra.mrb[232].mxu0 %vm3336_vm6, %v7224_v19 }
 0x48d   : > { %6697 = vmatprep.mubr.msk.bf16.mxu0 %vm7345_vm0, %v7344_v1 }
 0x494   : > { %6698 = vmatmul.mubr.msk.bf16.gmra.mrb[236].mxu0 %vm3336_vm6, %v7225_v17 }
 0x495   : > { %6701 = vmatprep.mubr.msk.bf16.mxu0 %vm7345_vm0, %v7344_v1 }
 0x49c   : > { %6702 = vmatmul.mubr.msk.bf16.gmra.mrb[240].mxu0 %vm3336_vm6, %v7226_v20 }
 0x49d   : > { %6773 = vmatprep.mubr.msk.bf16.mxu0 %vm7345_vm0, %v7344_v1 }
 0x52f   : > { %v3402_v27 = vpop.f32.mrb[208].mxu0 }
 0x530   : > { %v6671_v28 = vpop.f32.mrb[209].mxu0 }
 0x531   : > { %v3405_v29 = vpop.f32.mrb[210].mxu0  ;;  %v7249_v28 = vld [vmem:[%s8850_s8 + $0x98] sm:$0xff]  }
 0x532   : > { %v3473_v30 = vpack.c.bf16 %v3405_v29, %v3402_v27  ;;  %v6672_v31 = vpop.f32.mrb[211].mxu0  ;;  %v7251_v29 = vld [vmem:[%s8850_s8 + $0xc0] sm:$0xff]  }
 0x533   : > { %v7255_v31 = vld [vmem:[%s8850_s8 + $0xd0] sm:$0xff]  }
 0x537   : > { %v3410_v32 = vpop.f32.mrb[212].mxu0 }
 0x538   : > { %v6675_v33 = vpop.f32.mrb[213].mxu0 }
 0x539   : > { %v3413_v34 = vpop.f32.mrb[214].mxu0  ;;  %v7259_v33 = vld [vmem:[%s8850_s8 + $0x100] sm:$0xff]  }
 0x53a   : > { %v3482_v22 = vpack.c.bf16 %v3413_v34, %v3410_v32  ;;  %v6676_v37 = vpop.f32.mrb[215].mxu0  ;;  %v7257_v32 = vld [vmem:[%s8850_s8 + $0xd8] sm:$0xff]   ;;  %v7260_v34 = vld [vmem:[%s8850_s8 + $0x108] sm:$0xff]  }
 0x53b   : > { %v7263_v37 = vld [vmem:[%s8852_s10] sm:$0xff]  }
 0x53c   : > { %6714 = vmatmul.mubr.msk.bf16.vlgmr.msra.gmra.mrb[204].mxu1 %vm676_vm1, %v3482_v22  ;;  %v7262_v22 = vld [vmem:[%s8850_s8 + $0x118] sm:$0xff]  }
 0x53d   : > { %6718 = vmatpush3.bf16.msra.mxu1 %v7231_v35  ;;  %6725 = vmatprep.mubr.msk.bf16.mxu1 %vm7345_vm0, %v7344_v1  ;;  %v7261_v35 = vld [vmem:[%s8850_s8 + $0x110] sm:$0xff]  }
 0x53e   : > { %6719 = vmatprep.subr.bf16.mxu1 %v7344_v1 }
 0x53f   : > { %v3418_v39 = vpop.f32.mrb[216].mxu0 }
 0x540   : > { %v6679_v40 = vpop.f32.mrb[217].mxu0 }
 0x541   : > { %6720 = vmatpush3.bf16.msra.mxu1 %v7232_v38  ;;  %v3421_v42 = vpop.f32.mrb[218].mxu0  ;;  %v7264_v38 = vld [vmem:[%s8852_s10 + $0x20] sm:$0xff]   ;;  %v7266_v40 = vld [vmem:[%s8852_s10 + $0x28] sm:$0xff]  }
 0x542   : > { %6721 = vmatprep.subr.bf16.mxu1 %v7344_v1  ;;  %v3627_v5 = vpack.c.bf16 %v3421_v42, %v3418_v39  ;;  %v6680_v43 = vpop.f32.mrb[219].mxu0  ;;  %v7265_v39 = vld [vmem:[%s8852_s10 + $0x8] sm:$0xff]   ;;  %v7268_v42 = vld [vmem:[%s8852_s10 + $0x30] sm:$0xff]  }
 0x543   : > { %v7270_v43 = vld [vmem:[%s8852_s10 + $0x38] sm:$0xff]  }
 0x545   : > { %6722 = vmatpush3.bf16.msra.mxu1 %v7233_v41  ;;  %v7267_v41 = vld [vmem:[%s8852_s10 + $0x10] sm:$0xff]  }
 0x546   : > { %6723 = vmatprep.subr.bf16.mxu1 %v7344_v1 }
 0x547   : > { %v8330_v46 = vpop.f32.mrb[220].mxu0 }
 0x548   : > { %v6683_v47 = vpop.f32.mrb[221].mxu0 }
 0x549   : > { %6724 = vmatpush3.bf16.msra.mxu1 %v7234_v45  ;;  %v8335_v48 = vpop.f32.mrb[222].mxu0 }
 0x54a   : > { %6729 = vmatprep.subr.bf16.mxu1 %v7344_v1  ;;  %v3706_v8 = vpack.c.bf16 %v8335_v48, %v8330_v46  ;;  %v6684_v49 = vpop.f32.mrb[223].mxu0 }
 0x54c   : > { %6726 = vmatmul.mubr.msk.bf16.vlgmr.msra.gmra.mrb[208].mxu1 %vm676_vm1, %v3473_v30  ;;  %v7253_v30 = vld [vmem:[%s8850_s8 + $0xc8] sm:$0xff]  }
 0x54d   : > { %6730 = vmatpush3.bf16.msra.mxu1 %v7236_v36  ;;  %6737 = vmatprep.mubr.msk.bf16.mxu1 %vm7345_vm0, %v7344_v1 }
 0x54e   : > { %6731 = vmatprep.subr.bf16.mxu1 %v7344_v1 }
 0x54f   : > { %v8347_v51 = vpop.f32.mrb[224].mxu0 }
 0x550   : > { %v6687_v53 = vpop.f32.mrb[225].mxu0 }
 0x551   : > { %6732 = vmatpush3.bf16.msra.mxu1 %v7237_v50  ;;  %v8352_v55 = vpop.f32.mrb[226].mxu0 }
 0x552   : > { %6733 = vmatprep.subr.bf16.mxu1 %v7344_v1  ;;  %v3785_v18 = vpack.c.bf16 %v8352_v55, %v8347_v51  ;;  %v6688_v57 = vpop.f32.mrb[227].mxu0 }
 0x555   : > { %6734 = vmatpush3.bf16.msra.mxu1 %v7238_v54 }
 0x556   : > { %6735 = vmatprep.subr.bf16.mxu1 %v7344_v1 }
 0x557   : > { %v3442_v60 = vpop.f32.mrb[228].mxu0 }
 0x558   : > { %v6691_v62 = vpop.f32.mrb[229].mxu0 }
 0x559   : > { %6736 = vmatpush3.bf16.msra.mxu1 %v7239_v59  ;;  %v3445_v0 = vpop.f32.mrb[230].mxu0 }
 0x55a   : > { %6741 = vmatprep.subr.bf16.mxu1 %v7344_v1  ;;  %v3864_v2 = vpack.c.bf16 %v3445_v0, %v3442_v60  ;;  %v6692_v13 = vpop.f32.mrb[231].mxu0 }
 0x55c   : > { %6738 = vmatmul.mubr.msk.bf16.vlgmr.msra.gmra.mrb[212].mxu1 %vm676_vm1, %v3627_v5  ;;  %6774 = vmatmul.mubr.msk.bf16.vlgmr.msra.gmra.mrb[244].mxu0 %vm676_vm1, %v3864_v2  ;;  %v7269_v5 = vld [vmem:[%s8852_s10 + $0x18] sm:$0xff]  }
 0x55d   : > { %6742 = vmatpush3.bf16.msra.mxu1 %v7241_v63  ;;  %6749 = vmatprep.mubr.msk.bf16.mxu1 %vm7345_vm0, %v7344_v1 }
 0x55e   : > { %6743 = vmatprep.subr.bf16.mxu1 %v7344_v1  ;;  %6790 = vmatpush3.bf16.msra.mxu0 %v7252_v3 }
 0x55f   : > { %6791 = vmatprep.subr.bf16.mxu0 %v7344_v1  ;;  %v8380_v7 = vpop.f32.mrb[232].mxu0  ;;  %6797 = vmatprep.mubr.msk.bf16.mxu0 %vm7345_vm0, %v7344_v1 }
 0x560   : > { %v6695_v9 = vpop.f32.mrb[233].mxu0 }
 0x561   : > { %6744 = vmatpush3.bf16.msra.mxu1 %v7242_v4  ;;  %v3453_v44 = vpop.f32.mrb[234].mxu0 }
 0x562   : > { %6745 = vmatprep.subr.bf16.mxu1 %v7344_v1  ;;  %6792 = vmatpush3.bf16.msra.mxu0 %v7254_v6  ;;  %v3943_v11 = vpack.c.bf16 %v3453_v44, %v8380_v7  ;;  %v6696_v14 = vpop.f32.mrb[235].mxu0 }
 0x563   : > { %6793 = vmatprep.subr.bf16.mxu0 %v7344_v1 }
 0x565   : > { %6746 = vmatpush3.bf16.msra.mxu1 %v7243_v10 }
 0x566   : > { %6747 = vmatprep.subr.bf16.mxu1 %v7344_v1  ;;  %6794 = vmatpush3.bf16.msra.mxu0 %v7256_v12 }
 0x567   : > { %v3458_v58 = vpop.f32.mrb[236].mxu0  ;;  %6795 = vmatprep.subr.bf16.mxu0 %v7344_v1 }
 0x568   : > { %v6699_v15 = vpop.f32.mrb[237].mxu0 }
 0x569   : > { %6748 = vmatpush3.bf16.msra.mxu1 %v7244_v52  ;;  %v3461_v19 = vpop.f32.mrb[238].mxu0 }
 0x56a   : > { %6753 = vmatprep.subr.bf16.mxu1 %v7344_v1  ;;  %v4022_v17 = vpack.c.bf16 %v3461_v19, %v3458_v58  ;;  %6796 = vmatpush3.bf16.msra.mxu0 %v7258_v56  ;;  %v6700_v20 = vpop.f32.mrb[239].mxu0 }
 0x56b   : > { %6813 = vmatprep.subr.bf16.mxu0 %v7344_v1 }
 0x56c   : > { %6750 = vmatmul.mubr.msk.bf16.vlgmr.msra.gmra.mrb[216].mxu1 %vm676_vm1, %v3706_v8 }
 0x56d   : > { %6754 = vmatpush3.bf16.msra.mxu1 %v7245_v16  ;;  %6761 = vmatprep.mubr.msk.bf16.mxu1 %vm7345_vm0, %v7344_v1 }
 0x56e   : > { %6755 = vmatprep.subr.bf16.mxu1 %v7344_v1  ;;  %6798 = vmatmul.mubr.msk.bf16.vlgmr.msra.gmra.mrb[248].mxu0 %vm676_vm1, %v4022_v17 }
 0x56f   : > { %v3466_v61 = vpop.f32.mrb[240].mxu0  ;;  %6821 = vmatprep.mubr.msk.bf16.mxu0 %vm7345_vm0, %v7344_v1  ;;  %6814 = vmatpush3.bf16.msra.mxu0 %v7264_v38 }
 0x570   : > { %v6703_v23 = vpop.f32.mrb[241].mxu0  ;;  %6815 = vmatprep.subr.bf16.mxu0 %v7344_v1 }
 0x571   : > { %6756 = vmatpush3.bf16.msra.mxu1 %v7247_v21  ;;  %v3469_v25 = vpop.f32.mrb[242].mxu0 }
 0x572   : > { %6757 = vmatprep.subr.bf16.mxu1 %v7344_v1  ;;  %v4101_v26 = vpack.c.bf16 %v3469_v25, %v3466_v61  ;;  %v6704_v27 = vpop.f32.mrb[243].mxu0 }
 0x573   : > { %6816 = vmatpush3.bf16.msra.mxu0 %v7266_v40  ;;  %v7271_v40 = vld [vmem:[%s8852_s10 + $0x60] sm:$0xff]  }
 0x574   : > { %6817 = vmatprep.subr.bf16.mxu0 %v7344_v1 }
 0x575   : > { %6758 = vmatpush3.bf16.msra.mxu1 %v7248_v24 }
 0x576   : > { %6759 = vmatprep.subr.bf16.mxu1 %v7344_v1 }
 0x577   : > { %6818 = vmatpush3.bf16.msra.mxu0 %v7268_v42  ;;  %v7272_v42 = vld [vmem:[%s8852_s10 + $0x40] sm:$0xff]  }
 0x578   : > { %6819 = vmatprep.subr.bf16.mxu0 %v7344_v1 }
 0x579   : > { %6760 = vmatpush3.bf16.msra.mxu1 %v7249_v28 }
 0x57a   : > { %6777 = vmatprep.subr.bf16.mxu1 %v7344_v1 }
 0x57b   : > { %6820 = vmatpush3.bf16.msra.mxu0 %v7270_v43  ;;  %v7273_v43 = vld [vmem:[%s8852_s10 + $0x68] sm:$0xff]  }
 0x57c   : > { %6762 = vmatmul.mubr.msk.bf16.vlgmr.msra.gmra.mrb[220].mxu1 %vm676_vm1, %v3785_v18  ;;  %6837 = vmatprep.subr.bf16.mxu0 %v7344_v1 }
 0x57d   : > { %6778 = vmatpush3.bf16.msra.mxu1 %v7251_v29  ;;  %6785 = vmatprep.mubr.msk.bf16.mxu1 %vm7345_vm0, %v7344_v1  ;;  %v5999_v29 = vld [vmem:[%s8851_s9] ss:$0 sm:$0xff] }
 0x57e   : > { %6779 = vmatprep.subr.bf16.mxu1 %v7344_v1 }
 0x581   : > { %6780 = vmatpush3.bf16.msra.mxu1 %v7253_v30 }
 0x582   : > { %6781 = vmatprep.subr.bf16.mxu1 %v7344_v1 }
 0x585   : > { %6782 = vmatpush3.bf16.msra.mxu1 %v7255_v31 }
 0x586   : > { %6783 = vmatprep.subr.bf16.mxu1 %v7344_v1 }
 0x589   : > { %6784 = vmatpush3.bf16.msra.mxu1 %v7257_v32 }
 0x58a   : > { %6801 = vmatprep.subr.bf16.mxu1 %v7344_v1 }
 0x58c   : > { %6786 = vmatmul.mubr.msk.bf16.vlgmr.msra.gmra.mrb[224].mxu1 %vm676_vm1, %v3943_v11 }
 0x58d   : > { %6802 = vmatpush3.bf16.msra.mxu1 %v7259_v33  ;;  %6809 = vmatprep.mubr.msk.bf16.mxu1 %vm7345_vm0, %v7344_v1 }
 0x58e   : > { %6803 = vmatprep.subr.bf16.mxu1 %v7344_v1 }
 0x591   : > { %6804 = vmatpush3.bf16.msra.mxu1 %v7260_v34 }
 0x592   : > { %6805 = vmatprep.subr.bf16.mxu1 %v7344_v1 }
 0x595   : > { %6806 = vmatpush3.bf16.msra.mxu1 %v7261_v35 }
 0x596   : > { %6807 = vmatprep.subr.bf16.mxu1 %v7344_v1 }
 0x599   : > { %6808 = vmatpush3.bf16.msra.mxu1 %v7262_v22 }
 0x59a   : > { %6825 = vmatprep.subr.bf16.mxu1 %v7344_v1 }
 0x59c   : > { %6810 = vmatmul.mubr.msk.bf16.vlgmr.msra.gmra.mrb[228].mxu1 %vm676_vm1, %v4101_v26 }
 0x59d   : > { %6833 = vmatprep.mubr.msk.bf16.mxu1 %vm7345_vm0, %v7344_v1  ;;  %6826 = vmatpush3.bf16.msra.mxu1 %v7263_v37 }
 0x59e   : > { %6827 = vmatprep.subr.bf16.mxu1 %v7344_v1 }
 0x5a1   : > { %6828 = vmatpush3.bf16.msra.mxu1 %v7265_v39 }
 0x5a2   : > { %6829 = vmatprep.subr.bf16.mxu1 %v7344_v1 }
 0x5a5   : > { %6830 = vmatpush3.bf16.msra.mxu1 %v7267_v41 }
 0x5a6   : > { %6831 = vmatprep.subr.bf16.mxu1 %v7344_v1 }
 0x5a9   : > { %6832 = vmatpush3.bf16.msra.mxu1 %v7269_v5 }
 0x5aa   : > { %6849 = vmatprep.subr.bf16.mxu1 %v7344_v1 }
 0x60f   : > { %v3552_v45 = vpop.f32.mrb[204].mxu1 }
 0x610   : > { %v6715_v46 = vpop.f32.mrb[205].mxu1 }
 0x611   : > { %v3555_v47 = vpop.f32.mrb[206].mxu1  ;;  %v7275_v46 = vld [vmem:[%s8852_s10 + $0x70] sm:$0xff]  }
 0x612   : > { %v6716_v36 = vpop.f32.mrb[207].mxu1 }
 0x61f   : > { %v3620_v48 = vpop.f32.mrb[208].mxu1 }
 0x620   : > { %v3621_v8 = vadd.f32 %v3620_v48, %v3552_v45  ;;  %v6727_v49 = vpop.f32.mrb[209].mxu1  ;;  %v7274_v45 = vld [vmem:[%s8852_s10 + $0x48] sm:$0xff]   ;;  %v7277_v48 = vld [vmem:[%s8852_s10 + $0x78] sm:$0xff]  }
 0x621   : > { %v3623_v50 = vpop.f32.mrb[210].mxu1  ;;  %v7278_v49 = vld [vmem:[%s8852_s10 + $0x58] sm:$0xff]  }
 0x622   : > { %v3624_v51 = vadd.f32 %v3623_v50, %v3555_v47  ;;  %v6728_v53 = vpop.f32.mrb[211].mxu1  ;;  %v7276_v47 = vld [vmem:[%s8852_s10 + $0x50] sm:$0xff]   ;;  %v7279_v50 = vld [vmem:[%s8852_s10 + $0xa0] sm:$0xff]  }
 0x623   : > { %v7280_v53 = vld [vmem:[%s8852_s10 + $0x80] sm:$0xff]  }
 0x62f   : > { %v3697_v54 = vpop.f32.mrb[212].mxu1  ;;  %v3934_v55 = vpop.f32.mrb[244].mxu0 }
 0x630   : > { %v3704_v18 = vadd.f32 %v3697_v54, %v3621_v8  ;;  %v6739_v57 = vpop.f32.mrb[213].mxu1  ;;  %v6775_v59 = vpop.f32.mrb[245].mxu0 }
 0x631   : > { %v3700_v60 = vpop.f32.mrb[214].mxu1  ;;  %v3937_v62 = vpop.f32.mrb[246].mxu0  ;;  %v7283_v57 = vld [vmem:[%s8852_s10 + $0xb0] sm:$0xff]  }
 0x632   : > { %v3705_v63 = vadd.f32 %v3700_v60, %v3624_v51  ;;  %v6740_v0 = vpop.f32.mrb[215].mxu1  ;;  %v6776_v2 = vpop.f32.mrb[247].mxu0  ;;  %v7284_v59 = vld [vmem:[%s8852_s10 + $0x90] sm:$0xff]  }
 0x633   : > { %v7286_v0 = vld [vmem:[%s8852_s10 + $0x98] sm:$0xff]   ;;  %v7287_v2 = vld [vmem:[%s8852_s10 + $0xe0] sm:$0xff]  }
 0x63f   : > { %v3776_v3 = vpop.f32.mrb[216].mxu1 }
 0x640   : > { %v3783_v13 = vadd.f32 %v3776_v3, %v3704_v18  ;;  %v6751_v4 = vpop.f32.mrb[217].mxu1  ;;  %v7282_v18 = vld [vmem:[%s8852_s10 + $0x88] sm:$0xff]  }
 0x641   : > { %v3779_v6 = vpop.f32.mrb[218].mxu1  ;;  %v4092_v7 = vpop.f32.mrb[248].mxu0 }
 0x642   : > { %v3784_v9 = vadd.f32 %v3779_v6, %v3705_v63  ;;  %v6752_v10 = vpop.f32.mrb[219].mxu1  ;;  %v6799_v44 = vpop.f32.mrb[249].mxu0  ;;  %v7289_v6 = vld [vmem:[%s8852_s10 + $0xe8] sm:$0xff]  }
 0x643   : > { %v4095_v11 = vpop.f32.mrb[250].mxu0  ;;  %v7292_v10 = vld [vmem:[%s8852_s10 + $0xd0] sm:$0xff]  }
 0x644   : > { %v6800_v12 = vpop.f32.mrb[251].mxu0 }
 0x64f   : > { %v3855_v14 = vpop.f32.mrb[220].mxu1 }
 0x650   : > { %v3862_v52 = vadd.f32 %v3855_v14, %v3783_v13  ;;  %v6763_v56 = vpop.f32.mrb[221].mxu1  ;;  %v7288_v13 = vld [vmem:[%s8852_s10 + $0xc0] sm:$0xff]   ;;  %v7294_v14 = vld [vmem:[%s8852_s10 + $0xd8] sm:$0xff]  }
 0x651   : > { %v3858_v58 = vpop.f32.mrb[222].mxu1 }
 0x652   : > { %v3863_v15 = vadd.f32 %v3858_v58, %v3784_v9  ;;  %v3941_v16 = vadd.f32 %v3934_v55, %v3862_v52  ;;  %v6764_v19 = vpop.f32.mrb[223].mxu1  ;;  %v7281_v55 = vld [vmem:[%s8852_s10 + $0xa8] sm:$0xff]   ;;  %v7291_v9 = vld [vmem:[%s8852_s10 + $0xf0] sm:$0xff]   ;;  %v7295_v52 = vld [vmem:[%s8852_s10 + $0x120] sm:$0xff]  }
 0x653   : > { %v7296_v58 = vld [vmem:[%s8852_s10 + $0x100] sm:$0xff]   ;;  %v7298_v19 = vld [vmem:[%s8852_s10 + $0x108] sm:$0xff]  }
 0x654   : > { %v3942_v17 = vadd.f32 %v3937_v62, %v3863_v15  ;;  %v7285_v62 = vld [vmem:[%s8852_s10 + $0xb8] sm:$0xff]  }
 0x65f   : > { %v4013_v20 = vpop.f32.mrb[224].mxu1 }
 0x660   : > { %v4020_v21 = vadd.f32 %v4013_v20, %v3941_v16  ;;  %v6787_v61 = vpop.f32.mrb[225].mxu1  ;;  %v7297_v16 = vld [vmem:[%s8852_s10 + $0x128] sm:$0xff]   ;;  %v7300_v20 = vld [vmem:[%s8852_s10 + $0x110] sm:$0xff]  }
 0x661   : > { %v4016_v23 = vpop.f32.mrb[226].mxu1  ;;  %v7301_v61 = vld [vmem:[%s8852_s10 + $0x138] sm:$0xff]  }
 0x662   : > { %v4021_v24 = vadd.f32 %v4016_v23, %v3942_v17  ;;  %v4099_v25 = vadd.f32 %v4092_v7, %v4020_v21  ;;  %v6788_v26 = vpop.f32.mrb[227].mxu1  ;;  %v7290_v7 = vld [vmem:[%s8852_s10 + $0xc8] sm:$0xff]   ;;  %v7299_v17 = vld [vmem:[%s8852_s10 + $0x130] sm:$0xff]  }
 0x664   : > { %v4100_v27 = vadd.f32 %v4095_v11, %v4021_v24  ;;  %v7293_v11 = vld [vmem:[%s8852_s10 + $0xf8] sm:$0xff]  }
 0x665   : > { %v7302_v24 = vld [vmem:[%s8852_s10 + $0x118] sm:$0xff]  }
 0x66f   : > { %v4171_v28 = vpop.f32.mrb[228].mxu1 }
 0x670   : > { %v4178_v30 = vadd.f32 %v4171_v28, %v4099_v25  ;;  %v6811_v31 = vpop.f32.mrb[229].mxu1  ;;  %v7303_v25 = vld [vmem:[%s8852_s10 + $0x160] sm:$0xff]  }
 0x671   : > { %v4174_v32 = vpop.f32.mrb[230].mxu1  ;;  %v7307_v31 = vld [vmem:[%s8852_s10 + $0x170] sm:$0xff]  }
 0x672   : > { %v4187_v33 = vadd.f32 %v5999_v29, %v4178_v30  ;;  %v4179_v34 = vadd.f32 %v4174_v32, %v4100_v27  ;;  %v6812_v35 = vpop.f32.mrb[231].mxu1  ;;  %v7304_v27 = vld [vmem:[%s8852_s10 + $0x140] sm:$0xff]   ;;  %v7306_v30 = vld [vmem:[%s8852_s10 + $0x148] sm:$0xff]   ;;  %v7308_v32 = vld [vmem:[%s8852_s10 + $0x150] sm:$0xff]  }
 0x674   : > { %v4188_v22 = vadd.f32 %v5999_v29, %v4179_v34  ;;  %v4189_v37 = vmax.f32 %v4187_v33, 0.0  ;;  %v7305_v29 = vld [vmem:[%s8852_s10 + $0x168] sm:$0xff]   ;;  %v7309_v34 = vld [vmem:[%s8852_s10 + $0x178] sm:$0xff]  }
 0x676   : > { %v4190_v38 = vmax.f32 %v4188_v22, 0.0  ;;  %v7310_v22 = vld [vmem:[%s8852_s10 + $0x158] sm:$0xff]  }
 0x678   : > { %v4191_v39 = vpack.c.bf16 %v4190_v38, %v4189_v37  ;;  %v7311_v37 = vld [vmem:[%s8852_s10 + $0x1a0] sm:$0xff]  }
 0x67a   : > { %4192 = vst.msk [vmem:[#allocation2] sm:$0xff] %vm676_vm1, %v4191_v39  ;;  %v7312_v39 = vld [vmem:[%s8852_s10 + $0x180] sm:$0xff]  }
 0x681   : > { %v4193_v41 = vld [vmem:[#allocation2] sm:$0x1]  ;;  %v4346_v36 = vld [vmem:[#allocation2] sm:$0x2]  ;;  %v4505_v60 = vld [vmem:[#allocation2] sm:$0x4] }
 0x682   : > { %v4211_v5 = vshrl.u32 %v4193_v41, 16  ;;  %6834 = vmatmul.mubr.msk.bf16.vlgmr.msra.gmra.mrb[232].mxu1 %vm676_vm1, %v4193_v41  ;;  %v4434_v8 = vshrl.u32 %v4346_v36, 16  ;;  %v4356_v54 = vrot.slane %v4346_v36, 1  ;;  %v4593_v63 = vshrl.u32 %v4505_v60, 16  ;;  %v4664_v44 = vld [vmem:[#allocation2] sm:$0x8] }
 0x683   : > { %6850 = vmatpush3.bf16.msra.mxu1 %v7271_v40  ;;  %6857 = vmatprep.mubr.msk.bf16.mxu1 %vm7345_vm0, %v7344_v1  ;;  %v4515_v4 = vrot.slane %v4505_v60, 2  ;;  %v4752_v12 = vshrl.u32 %v4664_v44, 16  ;;  %v4674_v15 = vrot.slane %v4664_v44, 3  ;;  %v4823_v21 = vld [vmem:[#allocation2] sm:$0x10]  ;;  %v7313_v41 = vld [vmem:[%s8852_s10 + $0x1a8] sm:$0xff]  }
 0x684   : > { %6822 = vmatmul.mubr.msk.bf16.vlgmr.msra.gmra.mrb[252].mxu0 %vm676_vm1, %v4211_v5  ;;  %6851 = vmatprep.subr.bf16.mxu1 %v7344_v1  ;;  %v4436_v51 = vrot.slane %v4434_v8, 1  ;;  %v4595_v3 = vrot.slane %v4593_v63, 2  ;;  %v4911_v23 = vshrl.u32 %v4823_v21, 16  ;;  %v4833_v28 = vrot.slane %v4823_v21, 4  ;;  %v4982_v33 = vld [vmem:[#allocation2] sm:$0x20] }
 0x685   : > { %6838 = vmatpush3.bf16.msra.mxu0 %v7272_v42  ;;  %6845 = vmatprep.mubr.msk.bf16.mxu0 %vm7345_vm0, %v7344_v1  ;;  %v4754_v56 = vrot.slane %v4752_v12, 3  ;;  %v5070_v35 = vshrl.u32 %v4982_v33, 16  ;;  %v4992_v40 = vrot.slane %v4982_v33, 5  ;;  %v7314_v42 = vld [vmem:[%s8852_s10 + $0x188] sm:$0xff]   ;;  %v7315_v5 = vld [vmem:[%s8852_s10 + $0x1b0] sm:$0xff]   ;;  %v7318_v36 = vld [vmem:[%s8852_s10 + $0x198] sm:$0xff]  }
 0x686   : > { %6839 = vmatprep.subr.bf16.mxu0 %v7344_v1  ;;  %v4913_v26 = vrot.slane %v4911_v23, 4  ;;  %v7326_v60 = vld [vmem:[%s8852_s10 + $0x1d8] sm:$0xff]   ;;  %v7327_v63 = vld [vmem:[%s8854_s12] sm:$0xff]   ;;  %v7334_v44 = vld [vmem:[%s8856_s14 + $0x30] sm:$0xff]  }
 0x687   : > { %6852 = vmatpush3.bf16.msra.mxu1 %v7273_v43  ;;  %v5072_v38 = vrot.slane %v5070_v35, 5  ;;  %v5141_v43 = vld [vmem:[#allocation2] sm:$0x40] }
 0x688   : > { %6853 = vmatprep.subr.bf16.mxu1 %v7344_v1 }
 0x689   : > { %6840 = vmatpush3.bf16.msra.mxu0 %v7274_v45  ;;  %v7316_v45 = vld [vmem:[%s8852_s10 + $0x190] sm:$0xff]  }
 0x68a   : > { %6841 = vmatprep.subr.bf16.mxu0 %v7344_v1 }
 0x68b   : > { %6854 = vmatpush3.bf16.msra.mxu1 %v7275_v46  ;;  %v7317_v46 = vld [vmem:[%s8852_s10 + $0x1b8] sm:$0xff]  }
 0x68c   : > { %6855 = vmatprep.subr.bf16.mxu1 %v7344_v1 }
 0x68d   : > { %6842 = vmatpush3.bf16.msra.mxu0 %v7276_v47  ;;  %v5229_v47 = vshrl.u32 %v5141_v43, 16 }
 0x68e   : > { %6843 = vmatprep.subr.bf16.mxu0 %v7344_v1 }
 0x68f   : > { %6856 = vmatpush3.bf16.msra.mxu1 %v7277_v48  ;;  %v7319_v48 = vld [vmem:[%s8852_s10 + $0x1e0] sm:$0xff]   ;;  %v5231_v8 = vrot.slane %v5229_v47, 6 }
 0x690   : > { %6873 = vmatprep.subr.bf16.mxu1 %v7344_v1 }
 0x691   : > { %6844 = vmatpush3.bf16.msra.mxu0 %v7278_v49  ;;  %v7320_v49 = vld [vmem:[%s8852_s10 + $0x1c0] sm:$0xff]  }
 0x692   : > { %6858 = vmatmul.mubr.msk.bf16.vlgmr.msra.gmra.mrb[236].mxu1 %vm676_vm1, %v4436_v51  ;;  %6861 = vmatprep.subr.bf16.mxu0 %v7344_v1  ;;  %v7321_v51 = vld [vmem:[%s8852_s10 + $0x1e8] sm:$0xff]  }
 0x693   : > { %6874 = vmatpush3.bf16.msra.mxu1 %v7279_v50  ;;  %6881 = vmatprep.mubr.msk.bf16.mxu1 %vm7345_vm0, %v7344_v1  ;;  %v5151_v50 = vrot.slane %v5141_v43, 6 }
 0x694   : > { %6846 = vmatmul.mubr.msk.bf16.vlgmr.msra.gmra.mrb[0].mxu0 %vm676_vm1, %v4356_v54  ;;  %6875 = vmatprep.subr.bf16.mxu1 %v7344_v1  ;;  %v7323_v54 = vld [vmem:[%s8852_s10 + $0x1f0] sm:$0xff]  }
 0x695   : > { %6862 = vmatpush3.bf16.msra.mxu0 %v7280_v53  ;;  %6869 = vmatprep.mubr.msk.bf16.mxu0 %vm7345_vm0, %v7344_v1  ;;  %v7322_v53 = vld [vmem:[%s8852_s10 + $0x1c8] sm:$0xff]  }
 0x696   : > { %6863 = vmatprep.subr.bf16.mxu0 %v7344_v1 }
 0x697   : > { %6876 = vmatpush3.bf16.msra.mxu1 %v7281_v55  ;;  %v5300_v55 = vld [vmem:[#allocation2] sm:$0x80] }
 0x698   : > { %6877 = vmatprep.subr.bf16.mxu1 %v7344_v1 }
 0x699   : > { %6864 = vmatpush3.bf16.msra.mxu0 %v7282_v18  ;;  %v7324_v18 = vld [vmem:[%s8852_s10 + $0x1d0] sm:$0xff]  }
 0x69a   : > { %6865 = vmatprep.subr.bf16.mxu0 %v7344_v1 }
 0x69b   : > { %6878 = vmatpush3.bf16.msra.mxu1 %v7283_v57  ;;  %v7325_v57 = vld [vmem:[%s8852_s10 + $0x1f8] sm:$0xff]  }
 0x69c   : > { %6879 = vmatprep.subr.bf16.mxu1 %v7344_v1 }
 0x69d   : > { %6866 = vmatpush3.bf16.msra.mxu0 %v7284_v59  ;;  %v5388_v59 = vshrl.u32 %v5300_v55, 16 }
 0x69e   : > { %6867 = vmatprep.subr.bf16.mxu0 %v7344_v1 }
 0x69f   : > { %6880 = vmatpush3.bf16.msra.mxu1 %v7285_v62  ;;  %v5390_v62 = vrot.slane %v5388_v59, 7 }
 0x6a0   : > { %6897 = vmatprep.subr.bf16.mxu1 %v7344_v1 }
 0x6a1   : > { %6868 = vmatpush3.bf16.msra.mxu0 %v7286_v0  ;;  %v5310_v0 = vrot.slane %v5300_v55, 7 }
 0x6a2   : > { %6882 = vmatmul.mubr.msk.bf16.vlgmr.msra.gmra.mrb[240].mxu1 %vm676_vm1, %v4595_v3  ;;  %6885 = vmatprep.subr.bf16.mxu0 %v7344_v1 }
 0x6a3   : > { %6898 = vmatpush3.bf16.msra.mxu1 %v7287_v2  ;;  %6905 = vmatprep.mubr.msk.bf16.mxu1 %vm7345_vm0, %v7344_v1  ;;  %v5462_v2 = vld [vmem:[%s529_s18] sm:$0x1] }
 0x6a4   : > { %6870 = vmatmul.mubr.msk.bf16.vlgmr.msra.gmra.mrb[4].mxu0 %vm676_vm1, %v4515_v4  ;;  %6899 = vmatprep.subr.bf16.mxu1 %v7344_v1  ;;  %v5463_v3 = vpack.c.bf16 %v5462_v2, %v5462_v2  ;;  %v7329_v4 = vld [vmem:[%s8856_s14 + $0x8] sm:$0xff]  }
 0x6a5   : > { %6886 = vmatpush3.bf16.msra.mxu0 %v7288_v13  ;;  %6893 = vmatprep.mubr.msk.bf16.mxu0 %vm7345_vm0, %v7344_v1  ;;  %v7328_v13 = vld [vmem:[%s8856_s14] sm:$0xff]  }
 0x6a6   : > { %6887 = vmatprep.subr.bf16.mxu0 %v7344_v1 }
 0x6a7   : > { %6900 = vmatpush3.bf16.msra.mxu1 %v7289_v6  ;;  %v7330_v6 = vld [vmem:[%s8856_s14 + $0x10] sm:$0xff]  }
 0x6a8   : > { %6901 = vmatprep.subr.bf16.mxu1 %v7344_v1 }
 0x6a9   : > { %6888 = vmatpush3.bf16.msra.mxu0 %v7290_v7  ;;  %v7331_v7 = vld [vmem:[%s8856_s14 + $0x18] sm:$0xff]  }
 0x6aa   : > { %6889 = vmatprep.subr.bf16.mxu0 %v7344_v1 }
 0x6ab   : > { %6902 = vmatpush3.bf16.msra.mxu1 %v7291_v9  ;;  %v7332_v9 = vld [vmem:[%s8856_s14 + $0x20] sm:$0xff]  }
 0x6ac   : > { %6903 = vmatprep.subr.bf16.mxu1 %v7344_v1 }
 0x6ad   : > { %6890 = vmatpush3.bf16.msra.mxu0 %v7292_v10  ;;  %v7333_v10 = vld [vmem:[%s8856_s14 + $0x28] sm:$0xff]  }
 0x6ae   : > { %6891 = vmatprep.subr.bf16.mxu0 %v7344_v1 }
 0x6af   : > { %6904 = vmatpush3.bf16.msra.mxu1 %v7293_v11  ;;  %v7335_v11 = vld [vmem:[%s8856_s14 + $0x38] sm:$0xff]  }
 0x6b0   : > { %6921 = vmatprep.subr.bf16.mxu1 %v7344_v1 }
 0x6b1   : > { %6892 = vmatpush3.bf16.msra.mxu0 %v7294_v14 }
 0x6b2   : > { %6906 = vmatmul.mubr.msk.bf16.vlgmr.msra.gmra.mrb[244].mxu1 %vm676_vm1, %v4754_v56  ;;  %6909 = vmatprep.subr.bf16.mxu0 %v7344_v1 }
 0x6b3   : > { %6922 = vmatpush3.bf16.msra.mxu1 %v7295_v52  ;;  %6929 = vmatprep.mubr.msk.bf16.mxu1 %vm7345_vm0, %v7344_v1 }
 0x6b4   : > { %6894 = vmatmul.mubr.msk.bf16.vlgmr.msra.gmra.mrb[8].mxu0 %vm676_vm1, %v4674_v15  ;;  %6923 = vmatprep.subr.bf16.mxu1 %v7344_v1 }
 0x6b5   : > { %6910 = vmatpush3.bf16.msra.mxu0 %v7296_v58  ;;  %6917 = vmatprep.mubr.msk.bf16.mxu0 %vm7345_vm0, %v7344_v1 }
 0x6b6   : > { %6911 = vmatprep.subr.bf16.mxu0 %v7344_v1 }
 0x6b7   : > { %6924 = vmatpush3.bf16.msra.mxu1 %v7297_v16 }
 0x6b8   : > { %6925 = vmatprep.subr.bf16.mxu1 %v7344_v1 }
 0x6b9   : > { %6912 = vmatpush3.bf16.msra.mxu0 %v7298_v19 }
 0x6ba   : > { %6913 = vmatprep.subr.bf16.mxu0 %v7344_v1 }
 0x6bb   : > { %6926 = vmatpush3.bf16.msra.mxu1 %v7299_v17 }
 0x6bc   : > { %6927 = vmatprep.subr.bf16.mxu1 %v7344_v1 }
 0x6bd   : > { %6914 = vmatpush3.bf16.msra.mxu0 %v7300_v20 }
 0x6be   : > { %6915 = vmatprep.subr.bf16.mxu0 %v7344_v1 }
 0x6bf   : > { %6928 = vmatpush3.bf16.msra.mxu1 %v7301_v61 }
 0x6c0   : > { %6945 = vmatprep.subr.bf16.mxu1 %v7344_v1 }
 0x6c1   : > { %6916 = vmatpush3.bf16.msra.mxu0 %v7302_v24 }
 0x6c2   : > { %6930 = vmatmul.mubr.msk.bf16.vlgmr.msra.gmra.mrb[248].mxu1 %vm676_vm1, %v4913_v26  ;;  %6933 = vmatprep.subr.bf16.mxu0 %v7344_v1 }
 0x6c3   : > { %6946 = vmatpush3.bf16.msra.mxu1 %v7303_v25  ;;  %6953 = vmatprep.mubr.msk.bf16.mxu1 %vm7345_vm0, %v7344_v1 }
 0x6c4   : > { %6918 = vmatmul.mubr.msk.bf16.vlgmr.msra.gmra.mrb[12].mxu0 %vm676_vm1, %v4833_v28  ;;  %6947 = vmatprep.subr.bf16.mxu1 %v7344_v1 }
 0x6c5   : > { %6934 = vmatpush3.bf16.msra.mxu0 %v7304_v27  ;;  %6941 = vmatprep.mubr.msk.bf16.mxu0 %vm7345_vm0, %v7344_v1 }
 0x6c6   : > { %6935 = vmatprep.subr.bf16.mxu0 %v7344_v1 }
 0x6c7   : > { %6948 = vmatpush3.bf16.msra.mxu1 %v7305_v29 }
 0x6c8   : > { %6949 = vmatprep.subr.bf16.mxu1 %v7344_v1 }
 0x6c9   : > { %6936 = vmatpush3.bf16.msra.mxu0 %v7306_v30 }
 0x6ca   : > { %6937 = vmatprep.subr.bf16.mxu0 %v7344_v1 }
 0x6cb   : > { %6950 = vmatpush3.bf16.msra.mxu1 %v7307_v31 }
 0x6cc   : > { %6951 = vmatprep.subr.bf16.mxu1 %v7344_v1 }
 0x6cd   : > { %6938 = vmatpush3.bf16.msra.mxu0 %v7308_v32 }
 0x6ce   : > { %6939 = vmatprep.subr.bf16.mxu0 %v7344_v1 }
 0x6cf   : > { %6952 = vmatpush3.bf16.msra.mxu1 %v7309_v34 }
 0x6d0   : > { %6969 = vmatprep.subr.bf16.mxu1 %v7344_v1 }
 0x6d1   : > { %6940 = vmatpush3.bf16.msra.mxu0 %v7310_v22 }
 0x6d2   : > { %6954 = vmatmul.mubr.msk.bf16.vlgmr.msra.gmra.mrb[252].mxu1 %vm676_vm1, %v5072_v38  ;;  %6957 = vmatprep.subr.bf16.mxu0 %v7344_v1 }
 0x6d3   : > { %6970 = vmatpush3.bf16.msra.mxu1 %v7311_v37  ;;  %6977 = vmatprep.mubr.msk.bf16.mxu1 %vm7345_vm0, %v7344_v1 }
 0x6d4   : > { %6942 = vmatmul.mubr.msk.bf16.vlgmr.msra.gmra.mrb[16].mxu0 %vm676_vm1, %v4992_v40  ;;  %6971 = vmatprep.subr.bf16.mxu1 %v7344_v1 }
 0x6d5   : > { %6958 = vmatpush3.bf16.msra.mxu0 %v7312_v39  ;;  %6965 = vmatprep.mubr.msk.bf16.mxu0 %vm7345_vm0, %v7344_v1 }
 0x6d6   : > { %6959 = vmatprep.subr.bf16.mxu0 %v7344_v1 }
 0x6d7   : > { %6972 = vmatpush3.bf16.msra.mxu1 %v7313_v41 }
 0x6d8   : > { %6973 = vmatprep.subr.bf16.mxu1 %v7344_v1 }
 0x6d9   : > { %6960 = vmatpush3.bf16.msra.mxu0 %v7314_v42 }
 0x6da   : > { %6961 = vmatprep.subr.bf16.mxu0 %v7344_v1 }
 0x6db   : > { %6974 = vmatpush3.bf16.msra.mxu1 %v7315_v5 }
 0x6dc   : > { %6975 = vmatprep.subr.bf16.mxu1 %v7344_v1 }
 0x6dd   : > { %6962 = vmatpush3.bf16.msra.mxu0 %v7316_v45 }
 0x6de   : > { %6963 = vmatprep.subr.bf16.mxu0 %v7344_v1 }
 0x6df   : > { %6976 = vmatpush3.bf16.msra.mxu1 %v7317_v46 }
 0x6e0   : > { %6993 = vmatprep.subr.bf16.mxu1 %v7344_v1 }
 0x6e1   : > { %6964 = vmatpush3.bf16.msra.mxu0 %v7318_v36 }
 0x6e2   : > { %6978 = vmatmul.mubr.msk.bf16.vlgmr.msra.gmra.mrb[0].mxu1 %vm676_vm1, %v5231_v8  ;;  %6981 = vmatprep.subr.bf16.mxu0 %v7344_v1 }
 0x6e3   : > { %6994 = vmatpush3.bf16.msra.mxu1 %v7319_v48  ;;  %7001 = vmatprep.mubr.msk.bf16.mxu1 %vm7345_vm0, %v7344_v1 }
 0x6e4   : > { %6966 = vmatmul.mubr.msk.bf16.vlgmr.msra.gmra.mrb[20].mxu0 %vm676_vm1, %v5151_v50  ;;  %6995 = vmatprep.subr.bf16.mxu1 %v7344_v1 }
 0x6e5   : > { %6982 = vmatpush3.bf16.msra.mxu0 %v7320_v49  ;;  %6989 = vmatprep.mubr.msk.bf16.mxu0 %vm7345_vm0, %v7344_v1 }
 0x6e6   : > { %6983 = vmatprep.subr.bf16.mxu0 %v7344_v1 }
 0x6e7   : > { %6996 = vmatpush3.bf16.msra.mxu1 %v7321_v51 }
 0x6e8   : > { %6997 = vmatprep.subr.bf16.mxu1 %v7344_v1 }
 0x6e9   : > { %6984 = vmatpush3.bf16.msra.mxu0 %v7322_v53 }
 0x6ea   : > { %6985 = vmatprep.subr.bf16.mxu0 %v7344_v1 }
 0x6eb   : > { %6998 = vmatpush3.bf16.msra.mxu1 %v7323_v54 }
 0x6ec   : > { %6999 = vmatprep.subr.bf16.mxu1 %v7344_v1 }
 0x6ed   : > { %6986 = vmatpush3.bf16.msra.mxu0 %v7324_v18 }
 0x6ee   : > { %6987 = vmatprep.subr.bf16.mxu0 %v7344_v1 }
 0x6ef   : > { %7000 = vmatpush3.bf16.msra.mxu1 %v7325_v57 }
 0x6f1   : > { %6988 = vmatpush3.bf16.msra.mxu0 %v7326_v60 }
 0x6f2   : > { %7002 = vmatmul.mubr.msk.bf16.vlgmr.msra.gmra.mrb[4].mxu1 %vm676_vm1, %v5390_v62  ;;  %7005 = vmatprep.subr.bf16.mxu0 %v7344_v1 }
 0x6f4   : > { %6990 = vmatmul.mubr.msk.bf16.vlgmr.msra.gmra.mrb[24].mxu0 %vm676_vm1, %v5310_v0 }
 0x6f5   : > { %7006 = vmatpush3.bf16.msra.mxu0 %v7327_v63  ;;  %7007 = vmatprep.mubr.msk.bf16.mxu0 %vm7345_vm0, %v7344_v1 }
 0x6f6   : > { %7011 = vmatprep.subr.bf16.mxu0 %v7344_v1 }
 0x6fc   : > { %7008 = vmatmul.mubr.msk.bf16.vlgmr.msra.gmra.mrb[28].mxu0 %vm5473_vm7, %v5463_v3 }
 0x6fd   : > { %7027 = vmatprep.mubr.msk.bf16.mxu0 %vm7345_vm0, %v7344_v1  ;;  %7012 = vmatpush3.bf16.msra.mxu0 %v7328_v13 }
 0x6fe   : > { %7013 = vmatprep.subr.bf16.mxu0 %v7344_v1 }
 0x701   : > { %7014 = vmatpush3.bf16.msra.mxu0 %v7329_v4 }
 0x702   : > { %7015 = vmatprep.subr.bf16.mxu0 %v7344_v1 }
 0x705   : > { %7016 = vmatpush3.bf16.msra.mxu0 %v7330_v6 }
 0x706   : > { %7017 = vmatprep.subr.bf16.mxu0 %v7344_v1 }
 0x709   : > { %7018 = vmatpush3.bf16.msra.mxu0 %v7331_v7 }
 0x70a   : > { %7019 = vmatprep.subr.bf16.mxu0 %v7344_v1 }
 0x70d   : > { %7020 = vmatpush3.bf16.msra.mxu0 %v7332_v9 }
 0x70e   : > { %7021 = vmatprep.subr.bf16.mxu0 %v7344_v1 }
 0x711   : > { %7022 = vmatpush3.bf16.msra.mxu0 %v7333_v10 }
 0x712   : > { %7023 = vmatprep.subr.bf16.mxu0 %v7344_v1 }
 0x715   : > { %7024 = vmatpush3.bf16.msra.mxu0 %v7334_v44 }
 0x716   : > { %7025 = vmatprep.subr.bf16.mxu0 %v7344_v1 }
 0x719   : > { %7026 = vmatpush3.bf16.msra.mxu0 %v7335_v11 }
 0x755   : > { %v4340_v12 = vpop.f32.mrb[232].mxu1 }
 0x756   : > { %v6835_v14 = vpop.f32.mrb[233].mxu1 }
 0x757   : > { %v4274_v52 = vpop.f32.mrb[252].mxu0  ;;  %v4343_v56 = vpop.f32.mrb[234].mxu1 }
 0x758   : > { %v4341_v58 = vadd.f32 %v4340_v12, %v4274_v52  ;;  %v6823_v15 = vpop.f32.mrb[253].mxu0  ;;  %v6836_v16 = vpop.f32.mrb[235].mxu1 }
 0x759   : > { %v4277_v19 = vpop.f32.mrb[254].mxu0 }
 0x75a   : > { %v6824_v17 = vpop.f32.mrb[255].mxu0 }
 0x765   : > { %v4498_v20 = vpop.f32.mrb[236].mxu1 }
 0x766   : > { %v6859_v21 = vpop.f32.mrb[237].mxu1 }
 0x767   : > { %v4418_v61 = vpop.f32.mrb[0].mxu0  ;;  %v4501_v23 = vpop.f32.mrb[238].mxu1 }
 0x768   : > { %v4424_v24 = vadd.f32 %v4418_v61, %v4341_v58  ;;  %v6847_v1 = vpop.f32.mrb[1].mxu0  ;;  %v6860_v25 = vpop.f32.mrb[239].mxu1  ;;  %v5459_v23 = vld [vmem:[%s8853_s11] sm:$0x1] }
 0x769   : > { %v4421_v26 = vpop.f32.mrb[2].mxu0  ;;  %v5625_v1 = vlaneseq }
 0x76a   : > { %v6848_v27 = vpop.f32.mrb[3].mxu0  ;;  %v4504_v28 = vadd.f32 %v4498_v20, %v4424_v24 }
 0x76b   : > { %vm8828_vm8 = vcmp.lt.s32.totalorder %v5625_v1, 128 }
 0x775   : > { %v4657_v29 = vpop.f32.mrb[240].mxu1 }
 0x776   : > { %v6883_v30 = vpop.f32.mrb[241].mxu1 }
 0x777   : > { %v4577_v31 = vpop.f32.mrb[4].mxu0  ;;  %v4660_v32 = vpop.f32.mrb[242].mxu1 }
 0x778   : > { %v4583_v33 = vadd.f32 %v4577_v31, %v4504_v28  ;;  %v6871_v34 = vpop.f32.mrb[5].mxu0  ;;  %v6884_v35 = vpop.f32.mrb[243].mxu1  ;;  %v5466_v28 = vld [vmem:[%s8855_s13] sm:$0x1] }
 0x779   : > { %v4580_v22 = vpop.f32.mrb[6].mxu0 }
 0x77a   : > { %v6872_v37 = vpop.f32.mrb[7].mxu0  ;;  %v4663_v38 = vadd.f32 %v4657_v29, %v4583_v33 }
 0x785   : > { %v4816_v39 = vpop.f32.mrb[244].mxu1 }
 0x786   : > { %v6907_v40 = vpop.f32.mrb[245].mxu1 }
 0x787   : > { %v4736_v41 = vpop.f32.mrb[8].mxu0  ;;  %v4819_v42 = vpop.f32.mrb[246].mxu1 }
 0x788   : > { %v4742_v5 = vadd.f32 %v4736_v41, %v4663_v38  ;;  %v6895_v43 = vpop.f32.mrb[9].mxu0  ;;  %v6908_v45 = vpop.f32.mrb[247].mxu1  ;;  %v5535_v38 = vld [vmem:[%s8857_s15] sm:$0x1] }
 0x789   : > { %v4739_v46 = vpop.f32.mrb[10].mxu0 }
 0x78a   : > { %v6896_v47 = vpop.f32.mrb[11].mxu0  ;;  %v4822_v36 = vadd.f32 %v4816_v39, %v4742_v5 }
 0x795   : > { %v4975_v48 = vpop.f32.mrb[248].mxu1 }
 0x796   : > { %v6931_v8 = vpop.f32.mrb[249].mxu1 }
 0x797   : > { %v4895_v49 = vpop.f32.mrb[12].mxu0  ;;  %v4978_v50 = vpop.f32.mrb[250].mxu1 }
 0x798   : > { %v4901_v51 = vadd.f32 %v4895_v49, %v4822_v36  ;;  %v6919_v53 = vpop.f32.mrb[13].mxu0  ;;  %v6932_v54 = vpop.f32.mrb[251].mxu1 }
 0x799   : > { %v4898_v55 = vpop.f32.mrb[14].mxu0 }
 0x79a   : > { %v6920_v18 = vpop.f32.mrb[15].mxu0  ;;  %v4981_v57 = vadd.f32 %v4975_v48, %v4901_v51 }
 0x7a5   : > { %v5134_v59 = vpop.f32.mrb[252].mxu1 }
 0x7a6   : > { %v6955_v60 = vpop.f32.mrb[253].mxu1 }
 0x7a7   : > { %v5054_v62 = vpop.f32.mrb[16].mxu0  ;;  %v5137_v63 = vpop.f32.mrb[254].mxu1 }
 0x7a8   : > { %v5060_v0 = vadd.f32 %v5054_v62, %v4981_v57  ;;  %v6943_v2 = vpop.f32.mrb[17].mxu0  ;;  %v6956_v3 = vpop.f32.mrb[255].mxu1 }
 0x7a9   : > { %v5057_v13 = vpop.f32.mrb[18].mxu0 }
 0x7aa   : > { %v6944_v4 = vpop.f32.mrb[19].mxu0  ;;  %v5140_v6 = vadd.f32 %v5134_v59, %v5060_v0 }
 0x7b5   : > { %v5293_v7 = vpop.f32.mrb[0].mxu1 }
 0x7b6   : > { %v6979_v9 = vpop.f32.mrb[1].mxu1 }
 0x7b7   : > { %v5213_v10 = vpop.f32.mrb[20].mxu0  ;;  %v5296_v44 = vpop.f32.mrb[2].mxu1 }
 0x7b8   : > { %v5219_v11 = vadd.f32 %v5213_v10, %v5140_v6  ;;  %v6967_v12 = vpop.f32.mrb[21].mxu0  ;;  %v6980_v14 = vpop.f32.mrb[3].mxu1 }
 0x7b9   : > { %v5216_v52 = vpop.f32.mrb[22].mxu0 }
 0x7ba   : > { %v6968_v56 = vpop.f32.mrb[23].mxu0  ;;  %v5299_v58 = vadd.f32 %v5293_v7, %v5219_v11 }
 0x7c5   : > { %v5452_v15 = vpop.f32.mrb[4].mxu1 }
 0x7c6   : > { %v7003_v16 = vpop.f32.mrb[5].mxu1 }
 0x7c7   : > { %v5372_v19 = vpop.f32.mrb[24].mxu0  ;;  %v5455_v17 = vpop.f32.mrb[6].mxu1 }
 0x7c8   : > { %v5378_v20 = vadd.f32 %v5372_v19, %v5299_v58  ;;  %v6991_v21 = vpop.f32.mrb[25].mxu0  ;;  %v7004_v61 = vpop.f32.mrb[7].mxu1 }
 0x7c9   : > { %v5375_v24 = vpop.f32.mrb[26].mxu0 }
 0x7ca   : > { %v5458_v25 = vadd.f32 %v5452_v15, %v5378_v20  ;;  %v6992_v26 = vpop.f32.mrb[27].mxu0 }
 0x7cc   : > { %v5460_v27 = vadd.f32 %v5459_v23, %v5458_v25 }
 0x7ce   : > { %v5461_v30 = vmax.f32 %v5460_v27, 0.0 }
 0x7cf   : > { %v5511_v31 = vpop.f32.mrb[28].mxu0 }
 0x7d0   : > { %v5512_v32 = vadd.f32 %v5511_v31, %v5466_v28  ;;  %v7009_v33 = vpop.f32.mrb[29].mxu0  ;;  %5629 = vst.msk [vmem:[%s533_s0] sm:$0x1] %vm8828_vm8, %v5461_v30 }
 0x7d1   : > { %v5514_v34 = vpop.f32.mrb[30].mxu0 }
 0x7d2   : > { %v5517_v35 = vmax.f32 %v5512_v32, 0.0  ;;  %v7010_v22 = vpop.f32.mrb[31].mxu0 }
 0x7d4   : > { %v5518_v37 = vpack.c.bf16 %v5517_v35, %v5517_v35 }
 0x7d6   : > { %7028 = vmatmul.mubr.bf16.vlgmr.msra.gmra.mrb[32].mxu0 %v5518_v37 }
 0x8a9   : > { %v5618_v39 = vpop.f32.mrb[32].mxu0 }
 0x8aa   : > { %v5619_v40 = vadd.f32 %v5618_v39, %v5535_v38  ;;  %v7029_v41 = vpop.f32.mrb[33].mxu0 }
 0x8ab   : > { %v5621_v42 = vpop.f32.mrb[34].mxu0 }
 0x8ac   : > { %v5624_v5 = vmax.f32 %v5619_v40, 0.0  ;;  %v7030_v43 = vpop.f32.mrb[35].mxu0 }
 0x8ae   : > { %5630 = vst.msk [vmem:[%s533_s0 + $0x1] sm:$0x1] %vm8828_vm8, %v5624_v5 }
 0x8af PF: > { %s26_s21 = sadd.s32 1, %s7342_s21  }
 0x8b0   : > { %p23_p4 = scmp.ge.s32.totalorder %s26_s21, 4  }
 0x8b2   :  { %25 = sbr.rel (!%p23_p4) target bundleno = 2 (0x2), region = 117 }

</bundles_post_ra>
